<compile_context>
chip_gen: v7x
topology: tpu7x:2x2x1
jax: 0.10.0
libtpu: 0.0.40
codegen_flags: <defaults>
</compile_context>

<pallas_src>
import functools

import jax
import jax.numpy as jnp
import numpy as np
from jax.experimental import pallas as pl
from jax.experimental.pallas import tpu as pltpu


def _mapping_kernel(num_domains,
                    z_ref, y_ref,
                    sw0, sb0, sw1, sb1, sw2, sb2, sw3, sb3,
                    uw0, ub0, uw1, ub1, uw2, ub2, uw3, ub3,
                    o_ref):
    # z_ref : (TB, latent_dim) f32     y_ref : (TB, 1) int32 domain labels
    # swX   : (in, 512) bf16           sbX   : (1, 512) f32         -- shared trunk
    # uwX   : (D, 512, out) bf16       ubX   : (D, 1, out) f32      -- stacked branches
    # o_ref : (TB, style_pad) f32
    #
    # bf16 only on the MXU operands; bias/ReLU/select math stays f32.
    x = z_ref[...].astype(jnp.bfloat16)

    # Shared trunk: 4 x (Linear + ReLU), f32 accumulation on the MXU.
    h = jnp.maximum(jnp.dot(x, sw0[...], preferred_element_type=jnp.float32) + sb0[...], 0.0)
    h = jnp.maximum(jnp.dot(h.astype(jnp.bfloat16), sw1[...],
                            preferred_element_type=jnp.float32) + sb1[...], 0.0)
    h = jnp.maximum(jnp.dot(h.astype(jnp.bfloat16), sw2[...],
                            preferred_element_type=jnp.float32) + sb2[...], 0.0)
    h = jnp.maximum(jnp.dot(h.astype(jnp.bfloat16), sw3[...],
                            preferred_element_type=jnp.float32) + sb3[...], 0.0)
    hb = h.astype(jnp.bfloat16)

    y = y_ref[...]                                    # (TB, 1) int32
    out = jnp.zeros(o_ref.shape, jnp.float32)         # (TB, style_pad)

    # Per-domain branches (static unroll, num_domains is tiny), fused row select.
    for d in range(num_domains):
        g = jnp.maximum(jnp.dot(hb, uw0[d], preferred_element_type=jnp.float32) + ub0[d], 0.0)
        g = jnp.maximum(jnp.dot(g.astype(jnp.bfloat16), uw1[d],
                                preferred_element_type=jnp.float32) + ub1[d], 0.0)
        g = jnp.maximum(jnp.dot(g.astype(jnp.bfloat16), uw2[d],
                                preferred_element_type=jnp.float32) + ub2[d], 0.0)
        s_d = jnp.dot(g.astype(jnp.bfloat16), uw3[d],
                      preferred_element_type=jnp.float32) + ub3[d]    # no ReLU on last layer
        out = jnp.where(y == d, s_d, out)             # (TB,1) mask broadcast over lanes

    o_ref[...] = out.astype(o_ref.dtype)


def _round_up(a, b):
    return (a + b - 1) // b * b


@functools.partial(jax.jit, static_argnames=("tile_rows",))
def mapping_network_pallas(z, y, params, *, tile_rows=256):
    """z: (N, latent_dim) f32, y: (N,) int domain labels.

    params (PyTorch layout):
      shared_w  : list of 4 arrays (out, in)       shared_b  : list of 4 (out,)
      unshared_w: list of 4 arrays (D, out, in)    unshared_b: list of 4 (D, out)
    Returns s: (N, style_dim) f32.
    """
    N, latent_dim = z.shape

    # Transpose once to (in, out); weights to bf16 (MXU operands), biases stay f32.
    sw = [jnp.asarray(w, jnp.float32).T.astype(jnp.bfloat16) for w in params["shared_w"]]
    sb = [jnp.asarray(b, jnp.float32).reshape(1, -1) for b in params["shared_b"]]
    uw = [jnp.transpose(jnp.asarray(w, jnp.float32), (0, 2, 1)).astype(jnp.bfloat16)
          for w in params["unshared_w"]]
    ub = [jnp.asarray(b, jnp.float32)[:, None, :] for b in params["unshared_b"]]

    hidden = sw[0].shape[1]
    style_dim = uw[3].shape[2]
    num_domains = uw[0].shape[0]

    # Lane-dense output: pad the style dim up to a multiple of 128.  Zero weight
    # and bias columns are free compute; avoids masked partial stores.
    style_pad = _round_up(style_dim, 128)
    if style_pad != style_dim:
        uw[3] = jnp.pad(uw[3], ((0, 0), (0, 0), (0, style_pad - style_dim)))
        ub[3] = jnp.pad(ub[3], ((0, 0), (0, 0), (0, style_pad - style_dim)))

    # Batch tile: multiple of 8 sublanes.  256 fills v6e/v7x's 256-wide MXU rows;
    # pass tile_rows=128 on v5e (4x128x128 MXU).
    TB = _round_up(min(tile_rows, max(N, 8)), 8)
    padded_N = _round_up(N, TB)

    if padded_N != N:
        z = jnp.pad(z, ((0, padded_N - N), (0, 0)))
        y = jnp.pad(y, (0, padded_N - N))       # padded rows pick domain 0, sliced off below
    y2d = y.astype(jnp.int32).reshape(padded_N, 1)

    # Weight/bias blocks never change across the grid -> single-buffer them so the
    # pipeline doesn't hold a dead second copy in VMEM.
    def const2(shape):
        return pl.BlockSpec(shape, lambda i: (0, 0), pipeline_mode=pl.Buffered(1))

    def const3(shape):
        return pl.BlockSpec(shape, lambda i: (0, 0, 0), pipeline_mode=pl.Buffered(1))

    in_specs = [
        pl.BlockSpec((TB, latent_dim), lambda i: (i, 0)),   # z tile
        pl.BlockSpec((TB, 1), lambda i: (i, 0)),            # y tile
        const2((latent_dim, hidden)), const2((1, hidden)),  # shared L0
        const2((hidden, hidden)), const2((1, hidden)),      # shared L1
        const2((hidden, hidden)), const2((1, hidden)),      # shared L2
        const2((hidden, hidden)), const2((1, hidden)),      # shared L3
        const3((num_domains, hidden, hidden)), const3((num_domains, 1, hidden)),        # unshared L0
        const3((num_domains, hidden, hidden)), const3((num_domains, 1, hidden)),        # unshared L1
        const3((num_domains, hidden, hidden)), const3((num_domains, 1, hidden)),        # unshared L2
        const3((num_domains, hidden, style_pad)), const3((num_domains, 1, style_pad)),  # unshared L3
    ]

    # VMEM budget: single-buffered params + double-buffered z/y/out tiles
    # + explicit f32 activation scratch (h, g, s_d, out + matmul staging) + headroom.
    param_arrays = sw + sb + uw + ub
    param_bytes = sum(int(np.prod(a.shape)) * a.dtype.itemsize for a in param_arrays)
    tile_bytes = 2 * TB * (latent_dim * 4 + 4 + style_pad * 4)
    act_bytes = (num_domains + 4) * TB * hidden * 4
    vmem_limit = int(param_bytes + tile_bytes + act_bytes + (4 << 20))

    out = pl.pallas_call(
        functools.partial(_mapping_kernel, num_domains),
        out_shape=jax.ShapeDtypeStruct((padded_N, style_pad), z.dtype),
        grid_spec=pltpu.PrefetchScalarGridSpec(
            num_scalar_prefetch=0,
            grid=(padded_N // TB,),
            in_specs=in_specs,
            out_specs=pl.BlockSpec((TB, style_pad), lambda i: (i, 0)),
        ),
        compiler_params=pltpu.CompilerParams(
            dimension_semantics=("parallel",),
            vmem_limit_bytes=vmem_limit),
    )(z, y2d,
      sw[0], sb[0], sw[1], sb[1], sw[2], sb[2], sw[3], sb[3],
      uw[0], ub[0], uw[1], ub[1], uw[2], ub[2], uw[3], ub[3])

    return out[:N, :style_dim]


def mapping_network_reference(z, y, params):
    """Pure-JAX f32 reference matching the PyTorch module exactly."""
    h = z
    for w, b in zip(params["shared_w"], params["shared_b"]):
        h = jnp.maximum(h @ w.T + b, 0.0)
    num_domains = params["unshared_w"][0].shape[0]
    n_layers = len(params["unshared_w"])
    outs = []
    for d in range(num_domains):
        g = h
        for li, (w, b) in enumerate(zip(params["unshared_w"], params["unshared_b"])):
            g = g @ w[d].T + b[d]
            if li < n_layers - 1:
                g = jnp.maximum(g, 0.0)
        outs.append(g)
    out = jnp.stack(outs, axis=1)                 # (N, D, style_dim)
    idx = jnp.arange(z.shape[0])
    return out[idx, y]


if __name__ == "__main__":
    latent_dim, style_dim, num_domains, hidden = 16, 64, 2, 512
    N = 2

    key = jax.random.PRNGKey(0)
    keys = jax.random.split(key, 32)
    ki = iter(keys)

    def he(k, shape, fan_in):
        return jax.random.normal(k, shape, jnp.float32) * np.sqrt(2.0 / fan_in)

    # Shared trunk params (PyTorch (out, in) layout).
    shared_w = [he(next(ki), (hidden, latent_dim), latent_dim)]
    shared_b = [jax.random.normal(next(ki), (hidden,), jnp.float32) * 0.1]
    for _ in range(3):
        shared_w.append(he(next(ki), (hidden, hidden), hidden))
        shared_b.append(jax.random.normal(next(ki), (hidden,), jnp.float32) * 0.1)

    # Per-domain branch params, stacked over domains.
    branch_dims = [(hidden, hidden), (hidden, hidden), (hidden, hidden), (style_dim, hidden)]
    unshared_w, unshared_b = [], []
    for dout, din in branch_dims:
        unshared_w.append(he(next(ki), (num_domains, dout, din), din))
        unshared_b.append(jax.random.normal(next(ki), (num_domains, dout), jnp.float32) * 0.1)

    params = {"shared_w": shared_w, "shared_b": shared_b,
              "unshared_w": unshared_w, "unshared_b": unshared_b}

    z = jax.random.normal(next(ki), (N, latent_dim), jnp.float32)
    y = jnp.array([1, 0], dtype=jnp.int32)   # exercise both domain branches

    out = mapping_network_pallas(z, y, params)
    out = jax.block_until_ready(out)
    assert out.shape == (N, style_dim)

    ref = mapping_network_reference(z, y, params)
    # bf16 MXU operands with f32 accumulation: ~1e-2 relative error through the
    # 8-layer stack; structural errors would be O(1), far above this tolerance.
    np.testing.assert_allclose(np.asarray(out), np.asarray(ref), rtol=5e-2, atol=5e-2)

    print("KERNEL_OK")
</pallas_src>

<mosaic_0001>
module attributes {stable_mosaic.version = 11 : i64} {
  func.func @_mapping_kernel(%arg0: i32, %arg1: memref<8x16xf32, #tpu.memory_space<vmem>>, %arg2: memref<8x1xi32, #tpu.memory_space<vmem>>, %arg3: memref<16x512xbf16, #tpu.memory_space<vmem>>, %arg4: memref<1x512xf32, #tpu.memory_space<vmem>>, %arg5: memref<512x512xbf16, #tpu.memory_space<vmem>>, %arg6: memref<1x512xf32, #tpu.memory_space<vmem>>, %arg7: memref<512x512xbf16, #tpu.memory_space<vmem>>, %arg8: memref<1x512xf32, #tpu.memory_space<vmem>>, %arg9: memref<512x512xbf16, #tpu.memory_space<vmem>>, %arg10: memref<1x512xf32, #tpu.memory_space<vmem>>, %arg11: memref<2x512x512xbf16, #tpu.memory_space<vmem>>, %arg12: memref<2x1x512xf32, #tpu.memory_space<vmem>>, %arg13: memref<2x512x512xbf16, #tpu.memory_space<vmem>>, %arg14: memref<2x1x512xf32, #tpu.memory_space<vmem>>, %arg15: memref<2x512x512xbf16, #tpu.memory_space<vmem>>, %arg16: memref<2x1x512xf32, #tpu.memory_space<vmem>>, %arg17: memref<2x512x128xbf16, #tpu.memory_space<vmem>>, %arg18: memref<2x1x128xf32, #tpu.memory_space<vmem>>, %arg19: memref<8x128xf32, #tpu.memory_space<vmem>>) attributes {dimension_semantics = [#tpu.dimension_semantics<parallel>], iteration_bounds = array<i64: 1>, scalar_prefetch = 0 : i64, scratch_operands = 0 : i64, tpu.core_type = #tpu.core_type<tc>, window_params = [{transform_indices = @transform_0, window_bounds = array<i64: 8, 16>}, {transform_indices = @transform_1, window_bounds = array<i64: 8, 1>}, {pipeline_mode = #tpu.pipeline_mode<synchronous>, transform_indices = @transform_2, window_bounds = array<i64: 16, 512>}, {pipeline_mode = #tpu.pipeline_mode<synchronous>, transform_indices = @transform_3, window_bounds = array<i64: 1, 512>}, {pipeline_mode = #tpu.pipeline_mode<synchronous>, transform_indices = @transform_4, window_bounds = array<i64: 512, 512>}, {pipeline_mode = #tpu.pipeline_mode<synchronous>, transform_indices = @transform_5, window_bounds = array<i64: 1, 512>}, {pipeline_mode = #tpu.pipeline_mode<synchronous>, transform_indices = @transform_6, window_bounds = array<i64: 512, 512>}, {pipeline_mode = #tpu.pipeline_mode<synchronous>, transform_indices = @transform_7, window_bounds = array<i64: 1, 512>}, {pipeline_mode = #tpu.pipeline_mode<synchronous>, transform_indices = @transform_8, window_bounds = array<i64: 512, 512>}, {pipeline_mode = #tpu.pipeline_mode<synchronous>, transform_indices = @transform_9, window_bounds = array<i64: 1, 512>}, {pipeline_mode = #tpu.pipeline_mode<synchronous>, transform_indices = @transform_10, window_bounds = array<i64: 2, 512, 512>}, {pipeline_mode = #tpu.pipeline_mode<synchronous>, transform_indices = @transform_11, window_bounds = array<i64: 2, 1, 512>}, {pipeline_mode = #tpu.pipeline_mode<synchronous>, transform_indices = @transform_12, window_bounds = array<i64: 2, 512, 512>}, {pipeline_mode = #tpu.pipeline_mode<synchronous>, transform_indices = @transform_13, window_bounds = array<i64: 2, 1, 512>}, {pipeline_mode = #tpu.pipeline_mode<synchronous>, transform_indices = @transform_14, window_bounds = array<i64: 2, 512, 512>}, {pipeline_mode = #tpu.pipeline_mode<synchronous>, transform_indices = @transform_15, window_bounds = array<i64: 2, 1, 512>}, {pipeline_mode = #tpu.pipeline_mode<synchronous>, transform_indices = @transform_16, window_bounds = array<i64: 2, 512, 128>}, {pipeline_mode = #tpu.pipeline_mode<synchronous>, transform_indices = @transform_17, window_bounds = array<i64: 2, 1, 128>}, {transform_indices = @transform_18, window_bounds = array<i64: 8, 128>}]} {
    %c0 = arith.constant 0 : index
    %c0_0 = arith.constant 0 : index
    %0 = vector.load %arg1[%c0, %c0_0] : memref<8x16xf32, #tpu.memory_space<vmem>>, vector<8x16xf32>
    %1 = arith.truncf %0 : vector<8x16xf32> to vector<8x16xbf16>
    %c0_1 = arith.constant 0 : index
    %c0_2 = arith.constant 0 : index
    %2 = vector.load %arg3[%c0_1, %c0_2] : memref<16x512xbf16, #tpu.memory_space<vmem>>, vector<16x512xbf16>
    %cst = arith.constant dense<0.000000e+00> : vector<8x512xf32>
    %3 = tpu.matmul %1, %2, %cst {dimension_numbers = #tpu.dot_dimension_numbers<[1], [0], [0], [1], [0, 0, 1, 1], [], []>} : vector<8x16xbf16>, vector<16x512xbf16>, vector<8x512xf32> -> vector<8x512xf32>
    %c0_3 = arith.constant 0 : index
    %c0_4 = arith.constant 0 : index
    %4 = vector.load %arg4[%c0_3, %c0_4] : memref<1x512xf32, #tpu.memory_space<vmem>>, vector<1x512xf32>
    %5 = vector.broadcast %4 : vector<1x512xf32> to vector<8x512xf32>
    %6 = arith.addf %3, %5 : vector<8x512xf32>
    %cst_5 = arith.constant 0.000000e+00 : f32
    %7 = vector.broadcast %cst_5 : f32 to vector<8x512xf32>
    %8 = arith.maximumf %6, %7 : vector<8x512xf32>
    %9 = arith.truncf %8 : vector<8x512xf32> to vector<8x512xbf16>
    %c0_6 = arith.constant 0 : index
    %c0_7 = arith.constant 0 : index
    %10 = vector.load %arg5[%c0_6, %c0_7] : memref<512x512xbf16, #tpu.memory_space<vmem>>, vector<512x512xbf16>
    %cst_8 = arith.constant dense<0.000000e+00> : vector<8x512xf32>
    %11 = tpu.matmul %9, %10, %cst_8 {dimension_numbers = #tpu.dot_dimension_numbers<[1], [0], [0], [1], [0, 0, 1, 1], [], []>} : vector<8x512xbf16>, vector<512x512xbf16>, vector<8x512xf32> -> vector<8x512xf32>
    %c0_9 = arith.constant 0 : index
    %c0_10 = arith.constant 0 : index
    %12 = vector.load %arg6[%c0_9, %c0_10] : memref<1x512xf32, #tpu.memory_space<vmem>>, vector<1x512xf32>
    %13 = vector.broadcast %12 : vector<1x512xf32> to vector<8x512xf32>
    %14 = arith.addf %11, %13 : vector<8x512xf32>
    %cst_11 = arith.constant 0.000000e+00 : f32
    %15 = vector.broadcast %cst_11 : f32 to vector<8x512xf32>
    %16 = arith.maximumf %14, %15 : vector<8x512xf32>
    %17 = arith.truncf %16 : vector<8x512xf32> to vector<8x512xbf16>
    %c0_12 = arith.constant 0 : index
    %c0_13 = arith.constant 0 : index
    %18 = vector.load %arg7[%c0_12, %c0_13] : memref<512x512xbf16, #tpu.memory_space<vmem>>, vector<512x512xbf16>
    %cst_14 = arith.constant dense<0.000000e+00> : vector<8x512xf32>
    %19 = tpu.matmul %17, %18, %cst_14 {dimension_numbers = #tpu.dot_dimension_numbers<[1], [0], [0], [1], [0, 0, 1, 1], [], []>} : vector<8x512xbf16>, vector<512x512xbf16>, vector<8x512xf32> -> vector<8x512xf32>
    %c0_15 = arith.constant 0 : index
    %c0_16 = arith.constant 0 : index
    %20 = vector.load %arg8[%c0_15, %c0_16] : memref<1x512xf32, #tpu.memory_space<vmem>>, vector<1x512xf32>
    %21 = vector.broadcast %20 : vector<1x512xf32> to vector<8x512xf32>
    %22 = arith.addf %19, %21 : vector<8x512xf32>
    %cst_17 = arith.constant 0.000000e+00 : f32
    %23 = vector.broadcast %cst_17 : f32 to vector<8x512xf32>
    %24 = arith.maximumf %22, %23 : vector<8x512xf32>
    %25 = arith.truncf %24 : vector<8x512xf32> to vector<8x512xbf16>
    %c0_18 = arith.constant 0 : index
    %c0_19 = arith.constant 0 : index
    %26 = vector.load %arg9[%c0_18, %c0_19] : memref<512x512xbf16, #tpu.memory_space<vmem>>, vector<512x512xbf16>
    %cst_20 = arith.constant dense<0.000000e+00> : vector<8x512xf32>
    %27 = tpu.matmul %25, %26, %cst_20 {dimension_numbers = #tpu.dot_dimension_numbers<[1], [0], [0], [1], [0, 0, 1, 1], [], []>} : vector<8x512xbf16>, vector<512x512xbf16>, vector<8x512xf32> -> vector<8x512xf32>
    %c0_21 = arith.constant 0 : index
    %c0_22 = arith.constant 0 : index
    %28 = vector.load %arg10[%c0_21, %c0_22] : memref<1x512xf32, #tpu.memory_space<vmem>>, vector<1x512xf32>
    %29 = vector.broadcast %28 : vector<1x512xf32> to vector<8x512xf32>
    %30 = arith.addf %27, %29 : vector<8x512xf32>
    %cst_23 = arith.constant 0.000000e+00 : f32
    %31 = vector.broadcast %cst_23 : f32 to vector<8x512xf32>
    %32 = arith.maximumf %30, %31 : vector<8x512xf32>
    %33 = arith.truncf %32 : vector<8x512xf32> to vector<8x512xbf16>
    %c0_24 = arith.constant 0 : index
    %c0_25 = arith.constant 0 : index
    %34 = vector.load %arg2[%c0_24, %c0_25] : memref<8x1xi32, #tpu.memory_space<vmem>>, vector<8x1xi32>
    %cst_26 = arith.constant 0.000000e+00 : f32
    %35 = vector.broadcast %cst_26 : f32 to vector<8x128xf32>
    %c0_27 = arith.constant 0 : index
    %c0_28 = arith.constant 0 : index
    %c0_29 = arith.constant 0 : index
    %36 = vector.load %arg11[%c0_27, %c0_28, %c0_29] : memref<2x512x512xbf16, #tpu.memory_space<vmem>>, vector<1x512x512xbf16>
    %37 = vector.shape_cast %36 : vector<1x512x512xbf16> to vector<512x512xbf16>
    %cst_30 = arith.constant dense<0.000000e+00> : vector<8x512xf32>
    %38 = tpu.matmul %33, %37, %cst_30 {dimension_numbers = #tpu.dot_dimension_numbers<[1], [0], [0], [1], [0, 0, 1, 1], [], []>} : vector<8x512xbf16>, vector<512x512xbf16>, vector<8x512xf32> -> vector<8x512xf32>
    %c0_31 = arith.constant 0 : index
    %c0_32 = arith.constant 0 : index
    %c0_33 = arith.constant 0 : index
    %39 = vector.load %arg12[%c0_31, %c0_32, %c0_33] : memref<2x1x512xf32, #tpu.memory_space<vmem>>, vector<1x1x512xf32>
    %40 = vector.shape_cast %39 : vector<1x1x512xf32> to vector<1x512xf32>
    %41 = vector.broadcast %40 : vector<1x512xf32> to vector<8x512xf32>
    %42 = arith.addf %38, %41 : vector<8x512xf32>
    %cst_34 = arith.constant 0.000000e+00 : f32
    %43 = vector.broadcast %cst_34 : f32 to vector<8x512xf32>
    %44 = arith.maximumf %42, %43 : vector<8x512xf32>
    %45 = arith.truncf %44 : vector<8x512xf32> to vector<8x512xbf16>
    %c0_35 = arith.constant 0 : index
    %c0_36 = arith.constant 0 : index
    %c0_37 = arith.constant 0 : index
    %46 = vector.load %arg13[%c0_35, %c0_36, %c0_37] : memref<2x512x512xbf16, #tpu.memory_space<vmem>>, vector<1x512x512xbf16>
    %47 = vector.shape_cast %46 : vector<1x512x512xbf16> to vector<512x512xbf16>
    %cst_38 = arith.constant dense<0.000000e+00> : vector<8x512xf32>
    %48 = tpu.matmul %45, %47, %cst_38 {dimension_numbers = #tpu.dot_dimension_numbers<[1], [0], [0], [1], [0, 0, 1, 1], [], []>} : vector<8x512xbf16>, vector<512x512xbf16>, vector<8x512xf32> -> vector<8x512xf32>
    %c0_39 = arith.constant 0 : index
    %c0_40 = arith.constant 0 : index
    %c0_41 = arith.constant 0 : index
    %49 = vector.load %arg14[%c0_39, %c0_40, %c0_41] : memref<2x1x512xf32, #tpu.memory_space<vmem>>, vector<1x1x512xf32>
    %50 = vector.shape_cast %49 : vector<1x1x512xf32> to vector<1x512xf32>
    %51 = vector.broadcast %50 : vector<1x512xf32> to vector<8x512xf32>
    %52 = arith.addf %48, %51 : vector<8x512xf32>
    %cst_42 = arith.constant 0.000000e+00 : f32
    %53 = vector.broadcast %cst_42 : f32 to vector<8x512xf32>
    %54 = arith.maximumf %52, %53 : vector<8x512xf32>
    %55 = arith.truncf %54 : vector<8x512xf32> to vector<8x512xbf16>
    %c0_43 = arith.constant 0 : index
    %c0_44 = arith.constant 0 : index
    %c0_45 = arith.constant 0 : index
    %56 = vector.load %arg15[%c0_43, %c0_44, %c0_45] : memref<2x512x512xbf16, #tpu.memory_space<vmem>>, vector<1x512x512xbf16>
    %57 = vector.shape_cast %56 : vector<1x512x512xbf16> to vector<512x512xbf16>
    %cst_46 = arith.constant dense<0.000000e+00> : vector<8x512xf32>
    %58 = tpu.matmul %55, %57, %cst_46 {dimension_numbers = #tpu.dot_dimension_numbers<[1], [0], [0], [1], [0, 0, 1, 1], [], []>} : vector<8x512xbf16>, vector<512x512xbf16>, vector<8x512xf32> -> vector<8x512xf32>
    %c0_47 = arith.constant 0 : index
    %c0_48 = arith.constant 0 : index
    %c0_49 = arith.constant 0 : index
    %59 = vector.load %arg16[%c0_47, %c0_48, %c0_49] : memref<2x1x512xf32, #tpu.memory_space<vmem>>, vector<1x1x512xf32>
    %60 = vector.shape_cast %59 : vector<1x1x512xf32> to vector<1x512xf32>
    %61 = vector.broadcast %60 : vector<1x512xf32> to vector<8x512xf32>
    %62 = arith.addf %58, %61 : vector<8x512xf32>
    %cst_50 = arith.constant 0.000000e+00 : f32
    %63 = vector.broadcast %cst_50 : f32 to vector<8x512xf32>
    %64 = arith.maximumf %62, %63 : vector<8x512xf32>
    %65 = arith.truncf %64 : vector<8x512xf32> to vector<8x512xbf16>
    %c0_51 = arith.constant 0 : index
    %c0_52 = arith.constant 0 : index
    %c0_53 = arith.constant 0 : index
    %66 = vector.load %arg17[%c0_51, %c0_52, %c0_53] : memref<2x512x128xbf16, #tpu.memory_space<vmem>>, vector<1x512x128xbf16>
    %67 = vector.shape_cast %66 : vector<1x512x128xbf16> to vector<512x128xbf16>
    %cst_54 = arith.constant dense<0.000000e+00> : vector<8x128xf32>
    %68 = tpu.matmul %65, %67, %cst_54 {dimension_numbers = #tpu.dot_dimension_numbers<[1], [0], [0], [1], [0, 0, 1, 1], [], []>} : vector<8x512xbf16>, vector<512x128xbf16>, vector<8x128xf32> -> vector<8x128xf32>
    %c0_55 = arith.constant 0 : index
    %c0_56 = arith.constant 0 : index
    %c0_57 = arith.constant 0 : index
    %69 = vector.load %arg18[%c0_55, %c0_56, %c0_57] : memref<2x1x128xf32, #tpu.memory_space<vmem>>, vector<1x1x128xf32>
    %70 = vector.shape_cast %69 : vector<1x1x128xf32> to vector<1x128xf32>
    %71 = vector.broadcast %70 : vector<1x128xf32> to vector<8x128xf32>
    %72 = arith.addf %68, %71 : vector<8x128xf32>
    %c0_i32 = arith.constant 0 : i32
    %73 = vector.broadcast %c0_i32 : i32 to vector<8x1xi32>
    %74 = arith.cmpi eq, %34, %73 : vector<8x1xi32>
    %75 = vector.shape_cast %74 : vector<8x1xi1> to vector<8x1xi1>
    %76 = vector.broadcast %75 : vector<8x1xi1> to vector<8x128xi1>
    %77 = arith.select %76, %72, %35 : vector<8x128xi1>, vector<8x128xf32>
    %c1 = arith.constant 1 : index
    %c0_58 = arith.constant 0 : index
    %c0_59 = arith.constant 0 : index
    %78 = vector.load %arg11[%c1, %c0_58, %c0_59] : memref<2x512x512xbf16, #tpu.memory_space<vmem>>, vector<1x512x512xbf16>
    %79 = vector.shape_cast %78 : vector<1x512x512xbf16> to vector<512x512xbf16>
    %cst_60 = arith.constant dense<0.000000e+00> : vector<8x512xf32>
    %80 = tpu.matmul %33, %79, %cst_60 {dimension_numbers = #tpu.dot_dimension_numbers<[1], [0], [0], [1], [0, 0, 1, 1], [], []>} : vector<8x512xbf16>, vector<512x512xbf16>, vector<8x512xf32> -> vector<8x512xf32>
    %c1_61 = arith.constant 1 : index
    %c0_62 = arith.constant 0 : index
    %c0_63 = arith.constant 0 : index
    %81 = vector.load %arg12[%c1_61, %c0_62, %c0_63] : memref<2x1x512xf32, #tpu.memory_space<vmem>>, vector<1x1x512xf32>
    %82 = vector.shape_cast %81 : vector<1x1x512xf32> to vector<1x512xf32>
    %83 = vector.broadcast %82 : vector<1x512xf32> to vector<8x512xf32>
    %84 = arith.addf %80, %83 : vector<8x512xf32>
    %cst_64 = arith.constant 0.000000e+00 : f32
    %85 = vector.broadcast %cst_64 : f32 to vector<8x512xf32>
    %86 = arith.maximumf %84, %85 : vector<8x512xf32>
    %87 = arith.truncf %86 : vector<8x512xf32> to vector<8x512xbf16>
    %c1_65 = arith.constant 1 : index
    %c0_66 = arith.constant 0 : index
    %c0_67 = arith.constant 0 : index
    %88 = vector.load %arg13[%c1_65, %c0_66, %c0_67] : memref<2x512x512xbf16, #tpu.memory_space<vmem>>, vector<1x512x512xbf16>
    %89 = vector.shape_cast %88 : vector<1x512x512xbf16> to vector<512x512xbf16>
    %cst_68 = arith.constant dense<0.000000e+00> : vector<8x512xf32>
    %90 = tpu.matmul %87, %89, %cst_68 {dimension_numbers = #tpu.dot_dimension_numbers<[1], [0], [0], [1], [0, 0, 1, 1], [], []>} : vector<8x512xbf16>, vector<512x512xbf16>, vector<8x512xf32> -> vector<8x512xf32>
    %c1_69 = arith.constant 1 : index
    %c0_70 = arith.constant 0 : index
    %c0_71 = arith.constant 0 : index
    %91 = vector.load %arg14[%c1_69, %c0_70, %c0_71] : memref<2x1x512xf32, #tpu.memory_space<vmem>>, vector<1x1x512xf32>
    %92 = vector.shape_cast %91 : vector<1x1x512xf32> to vector<1x512xf32>
    %93 = vector.broadcast %92 : vector<1x512xf32> to vector<8x512xf32>
    %94 = arith.addf %90, %93 : vector<8x512xf32>
    %cst_72 = arith.constant 0.000000e+00 : f32
    %95 = vector.broadcast %cst_72 : f32 to vector<8x512xf32>
    %96 = arith.maximumf %94, %95 : vector<8x512xf32>
    %97 = arith.truncf %96 : vector<8x512xf32> to vector<8x512xbf16>
    %c1_73 = arith.constant 1 : index
    %c0_74 = arith.constant 0 : index
    %c0_75 = arith.constant 0 : index
    %98 = vector.load %arg15[%c1_73, %c0_74, %c0_75] : memref<2x512x512xbf16, #tpu.memory_space<vmem>>, vector<1x512x512xbf16>
    %99 = vector.shape_cast %98 : vector<1x512x512xbf16> to vector<512x512xbf16>
    %cst_76 = arith.constant dense<0.000000e+00> : vector<8x512xf32>
    %100 = tpu.matmul %97, %99, %cst_76 {dimension_numbers = #tpu.dot_dimension_numbers<[1], [0], [0], [1], [0, 0, 1, 1], [], []>} : vector<8x512xbf16>, vector<512x512xbf16>, vector<8x512xf32> -> vector<8x512xf32>
    %c1_77 = arith.constant 1 : index
    %c0_78 = arith.constant 0 : index
    %c0_79 = arith.constant 0 : index
    %101 = vector.load %arg16[%c1_77, %c0_78, %c0_79] : memref<2x1x512xf32, #tpu.memory_space<vmem>>, vector<1x1x512xf32>
    %102 = vector.shape_cast %101 : vector<1x1x512xf32> to vector<1x512xf32>
    %103 = vector.broadcast %102 : vector<1x512xf32> to vector<8x512xf32>
    %104 = arith.addf %100, %103 : vector<8x512xf32>
    %cst_80 = arith.constant 0.000000e+00 : f32
    %105 = vector.broadcast %cst_80 : f32 to vector<8x512xf32>
    %106 = arith.maximumf %104, %105 : vector<8x512xf32>
    %107 = arith.truncf %106 : vector<8x512xf32> to vector<8x512xbf16>
    %c1_81 = arith.constant 1 : index
    %c0_82 = arith.constant 0 : index
    %c0_83 = arith.constant 0 : index
    %108 = vector.load %arg17[%c1_81, %c0_82, %c0_83] : memref<2x512x128xbf16, #tpu.memory_space<vmem>>, vector<1x512x128xbf16>
    %109 = vector.shape_cast %108 : vector<1x512x128xbf16> to vector<512x128xbf16>
    %cst_84 = arith.constant dense<0.000000e+00> : vector<8x128xf32>
    %110 = tpu.matmul %107, %109, %cst_84 {dimension_numbers = #tpu.dot_dimension_numbers<[1], [0], [0], [1], [0, 0, 1, 1], [], []>} : vector<8x512xbf16>, vector<512x128xbf16>, vector<8x128xf32> -> vector<8x128xf32>
    %c1_85 = arith.constant 1 : index
    %c0_86 = arith.constant 0 : index
    %c0_87 = arith.constant 0 : index
    %111 = vector.load %arg18[%c1_85, %c0_86, %c0_87] : memref<2x1x128xf32, #tpu.memory_space<vmem>>, vector<1x1x128xf32>
    %112 = vector.shape_cast %111 : vector<1x1x128xf32> to vector<1x128xf32>
    %113 = vector.broadcast %112 : vector<1x128xf32> to vector<8x128xf32>
    %114 = arith.addf %110, %113 : vector<8x128xf32>
    %c1_i32 = arith.constant 1 : i32
    %115 = vector.broadcast %c1_i32 : i32 to vector<8x1xi32>
    %116 = arith.cmpi eq, %34, %115 : vector<8x1xi32>
    %117 = vector.shape_cast %116 : vector<8x1xi1> to vector<8x1xi1>
    %118 = vector.broadcast %117 : vector<8x1xi1> to vector<8x128xi1>
    %119 = arith.select %118, %114, %77 : vector<8x128xi1>, vector<8x128xf32>
    %c0_88 = arith.constant 0 : index
    %c0_89 = arith.constant 0 : index
    %120 = vector.load %arg19[%c0_88, %c0_89] : memref<8x128xf32, #tpu.memory_space<vmem>>, vector<8x128xf32>
    tpu.vector_store %arg19[%c0_88, %c0_89], %119 {strides = array<i32>} : memref<8x128xf32, #tpu.memory_space<vmem>>, vector<8x128xf32>,
    return
  }
  func.func @transform_0(%arg0: i32) -> (i32, i32) {
    %c0_i32 = arith.constant 0 : i32
    %c0_i32_0 = arith.constant 0 : i32
    return %arg0, %c0_i32 : i32, i32
  }
  func.func @transform_1(%arg0: i32) -> (i32, i32) {
    %c0_i32 = arith.constant 0 : i32
    %c0_i32_0 = arith.constant 0 : i32
    return %arg0, %c0_i32 : i32, i32
  }
  func.func @transform_2(%arg0: i32) -> (i32, i32) {
    %c0_i32 = arith.constant 0 : i32
    %c0_i32_0 = arith.constant 0 : i32
    %c0_i32_1 = arith.constant 0 : i32
    return %c0_i32, %c0_i32_0 : i32, i32
  }
  func.func @transform_3(%arg0: i32) -> (i32, i32) {
    %c0_i32 = arith.constant 0 : i32
    %c0_i32_0 = arith.constant 0 : i32
    %c0_i32_1 = arith.constant 0 : i32
    return %c0_i32, %c0_i32_0 : i32, i32
  }
  func.func @transform_4(%arg0: i32) -> (i32, i32) {
    %c0_i32 = arith.constant 0 : i32
    %c0_i32_0 = arith.constant 0 : i32
    %c0_i32_1 = arith.constant 0 : i32
    return %c0_i32, %c0_i32_0 : i32, i32
  }
  func.func @transform_5(%arg0: i32) -> (i32, i32) {
    %c0_i32 = arith.constant 0 : i32
    %c0_i32_0 = arith.constant 0 : i32
    %c0_i32_1 = arith.constant 0 : i32
    return %c0_i32, %c0_i32_0 : i32, i32
  }
  func.func @transform_6(%arg0: i32) -> (i32, i32) {
    %c0_i32 = arith.constant 0 : i32
    %c0_i32_0 = arith.constant 0 : i32
    %c0_i32_1 = arith.constant 0 : i32
    return %c0_i32, %c0_i32_0 : i32, i32
  }
  func.func @transform_7(%arg0: i32) -> (i32, i32) {
    %c0_i32 = arith.constant 0 : i32
    %c0_i32_0 = arith.constant 0 : i32
    %c0_i32_1 = arith.constant 0 : i32
    return %c0_i32, %c0_i32_0 : i32, i32
  }
  func.func @transform_8(%arg0: i32) -> (i32, i32) {
    %c0_i32 = arith.constant 0 : i32
    %c0_i32_0 = arith.constant 0 : i32
    %c0_i32_1 = arith.constant 0 : i32
    return %c0_i32, %c0_i32_0 : i32, i32
  }
  func.func @transform_9(%arg0: i32) -> (i32, i32) {
    %c0_i32 = arith.constant 0 : i32
    %c0_i32_0 = arith.constant 0 : i32
    %c0_i32_1 = arith.constant 0 : i32
    return %c0_i32, %c0_i32_0 : i32, i32
  }
  func.func @transform_10(%arg0: i32) -> (i32, i32, i32) {
    %c0_i32 = arith.constant 0 : i32
    %c0_i32_0 = arith.constant 0 : i32
    %c0_i32_1 = arith.constant 0 : i32
    %c0_i32_2 = arith.constant 0 : i32
    return %c0_i32, %c0_i32_0, %c0_i32_1 : i32, i32, i32
  }
  func.func @transform_11(%arg0: i32) -> (i32, i32, i32) {
    %c0_i32 = arith.constant 0 : i32
    %c0_i32_0 = arith.constant 0 : i32
    %c0_i32_1 = arith.constant 0 : i32
    %c0_i32_2 = arith.constant 0 : i32
    return %c0_i32, %c0_i32_0, %c0_i32_1 : i32, i32, i32
  }
  func.func @transform_12(%arg0: i32) -> (i32, i32, i32) {
    %c0_i32 = arith.constant 0 : i32
    %c0_i32_0 = arith.constant 0 : i32
    %c0_i32_1 = arith.constant 0 : i32
    %c0_i32_2 = arith.constant 0 : i32
    return %c0_i32, %c0_i32_0, %c0_i32_1 : i32, i32, i32
  }
  func.func @transform_13(%arg0: i32) -> (i32, i32, i32) {
    %c0_i32 = arith.constant 0 : i32
    %c0_i32_0 = arith.constant 0 : i32
    %c0_i32_1 = arith.constant 0 : i32
    %c0_i32_2 = arith.constant 0 : i32
    return %c0_i32, %c0_i32_0, %c0_i32_1 : i32, i32, i32
  }
  func.func @transform_14(%arg0: i32) -> (i32, i32, i32) {
    %c0_i32 = arith.constant 0 : i32
    %c0_i32_0 = arith.constant 0 : i32
    %c0_i32_1 = arith.constant 0 : i32
    %c0_i32_2 = arith.constant 0 : i32
    return %c0_i32, %c0_i32_0, %c0_i32_1 : i32, i32, i32
  }
  func.func @transform_15(%arg0: i32) -> (i32, i32, i32) {
    %c0_i32 = arith.constant 0 : i32
    %c0_i32_0 = arith.constant 0 : i32
    %c0_i32_1 = arith.constant 0 : i32
    %c0_i32_2 = arith.constant 0 : i32
    return %c0_i32, %c0_i32_0, %c0_i32_1 : i32, i32, i32
  }
  func.func @transform_16(%arg0: i32) -> (i32, i32, i32) {
    %c0_i32 = arith.constant 0 : i32
    %c0_i32_0 = arith.constant 0 : i32
    %c0_i32_1 = arith.constant 0 : i32
    %c0_i32_2 = arith.constant 0 : i32
    return %c0_i32, %c0_i32_0, %c0_i32_1 : i32, i32, i32
  }
  func.func @transform_17(%arg0: i32) -> (i32, i32, i32) {
    %c0_i32 = arith.constant 0 : i32
    %c0_i32_0 = arith.constant 0 : i32
    %c0_i32_1 = arith.constant 0 : i32
    %c0_i32_2 = arith.constant 0 : i32
    return %c0_i32, %c0_i32_0, %c0_i32_1 : i32, i32, i32
  }
  func.func @transform_18(%arg0: i32) -> (i32, i32) {
    %c0_i32 = arith.constant 0 : i32
    %c0_i32_0 = arith.constant 0 : i32
    return %arg0, %c0_i32 : i32, i32
  }
}

</mosaic_0001>

<bundles_post_ra>
// kernel: mapping_network_pallas.1
= control target key start
LH: loop header
LB: loop body
LE: loop exit
PB: predicated region body
PF: predicated region fallthrough
CT: control target
= control target key end

     0   :  { %v13247_v1 = vmov 0   ;;  %vm108_vm0 = vcmask 130048   ;;  %s17209_s2 = inlined_call_operand.vmem [shape: bf16[16,512], index: 2, kind: input, shape index: {}]   ;;  %s17210_s0 = inlined_call_operand.vmem [shape: f32[8,16], index: 0, kind: input, shape index: {}]   ;;  %s17211_s4 = inlined_call_operand.vmem [shape: bf16[512,512], index: 4, kind: input, shape index: {}]   ;;  %s17212_s6 = inlined_call_operand.vmem [shape: bf16[512,512], index: 6, kind: input, shape index: {}]   ;;  %s17213_s3 = inlined_call_operand.vmem [shape: f32[1,512], index: 3, kind: input, shape index: {}]   ;;  %s17214_s8 = inlined_call_operand.vmem [shape: bf16[512,512], index: 8, kind: input, shape index: {}]   ;;  %s17215_s5 = inlined_call_operand.vmem [shape: f32[1,512], index: 5, kind: input, shape index: {}]   ;;  %s17216_s10 = inlined_call_operand.vmem [shape: bf16[2,512,512], index: 10, kind: input, shape index: {}]   ;;  %s17217_s7 = inlined_call_operand.vmem [shape: f32[1,512], index: 7, kind: input, shape index: {}]   ;;  %s17218_s12 = inlined_call_operand.vmem [shape: bf16[2,512,512], index: 12, kind: input, shape index: {}]   ;;  %s17219_s9 = inlined_call_operand.vmem [shape: f32[1,512], index: 9, kind: input, shape index: {}]   ;;  %s17220_s14 = inlined_call_operand.vmem [shape: bf16[2,512,512], index: 14, kind: input, shape index: {}]   ;;  %s17221_s11 = inlined_call_operand.vmem [shape: f32[2,1,512], index: 11, kind: input, shape index: {}]   ;;  %s17222_s16 = inlined_call_operand.vmem [shape: bf16[2,512,128], index: 16, kind: input, shape index: {}]   ;;  %s17223_s13 = inlined_call_operand.vmem [shape: f32[2,1,512], index: 13, kind: input, shape index: {}]   ;;  %s17224_s1 = inlined_call_operand.vmem [shape: s32[8,1], index: 1, kind: input, shape index: {}]   ;;  %s17225_s15 = inlined_call_operand.vmem [shape: f32[2,1,512], index: 15, kind: input, shape index: {}]   ;;  %s17226_s17 = inlined_call_operand.vmem [shape: f32[2,1,128], index: 17, kind: input, shape index: {}]   ;;  %s17227_s18 = inlined_call_operand.vmem [shape: f32[8,128], index: 18, kind: output, shape index: {}]  }
   0x1   :  { %17230 = sst [smem:[#allocation2_spill]] %s17209_s2  ;;  %144 = vmatprep.mubr.bf16.mxu0 %v13247_v1  ;;  %185 = vmatprep.mubr.bf16.mxu1 %v13247_v1 }
   0x2   :  { %17231 = sst [smem:[#allocation3_spill]] %s17210_s0  ;;  %s17233_s29 = sld [smem:[#allocation2_spill]]  ;;  %11447 = vset.pattern.permute.xlu0 %v13247_v1 }
   0x3   :  { %17232 = sst [smem:[#allocation4_spill]] %s17211_s4  ;;  %s17234_s20 = sld [smem:[#allocation3_spill]] }
   0x4   :  { %s17235_s26 = sld [smem:[#allocation4_spill]] }
   0x8   :  { %v11448_v0 = vld [vmem:[%s17233_s29 + $0x4] ss:$16 sps:$4 sm:$0xff]   ;;  %v11450_v2 = vld [vmem:[%s17233_s29] ss:$16 sps:$4 sm:$0xff]   ;;  %v11451_v5 = vld [vmem:[%s17233_s29 + $0xc] ss:$16 sps:$4 sm:$0xff]  }
   0x9   :  { %v60_v3 = vld [vmem:[%s17234_s20] sm:$0xff]  ;;  %112 = vmatprep.subr.bf16.mxu0 %v11448_v0  ;;  %v11453_v6 = vld [vmem:[%s17233_s29 + $0x8] ss:$16 sps:$4 sm:$0xff]   ;;  %153 = vmatprep.subr.bf16.mxu1 %v11451_v5 }
   0xa   :  { %v61_v4 = vpack.c.bf16 %v60_v3, %v60_v3  ;;  %113 = vmatpush1.bf16.msra.mxu0 %v11450_v2  ;;  %v11454_v7 = vld [vmem:[%s17235_s26] ss:$16 sps:$4 sm:$0xff]   ;;  %v11456_v8 = vld [vmem:[%s17235_s26 + $0x4] ss:$16 sps:$4 sm:$0xff]   ;;  %154 = vmatpush1.bf16.msra.mxu1 %v11453_v6  ;;  %v11457_v9 = vld [vmem:[%s17235_s26 + $0x8] ss:$16 sps:$4 sm:$0xff]  }
   0xb   :  { %v11459_v10 = vld [vmem:[%s17235_s26 + $0xc] ss:$16 sps:$4 sm:$0xff]   ;;  %992 = vmatprep.subr.bf16.mxu0 %v11456_v8  ;;  %v11462_v11 = vld [vmem:[%s17235_s26 + $0x24] ss:$16 sps:$4 sm:$0xff]   ;;  %v11460_v12 = vld [vmem:[%s17235_s26 + $0x20] ss:$16 sps:$4 sm:$0xff]  }
   0xc   :  { %1074 = vmatprep.subr.bf16.mxu1 %v11459_v10  ;;  %v11465_v13 = vld [vmem:[%s17235_s26 + $0x2c] ss:$16 sps:$4 sm:$0xff]   ;;  %v11463_v14 = vld [vmem:[%s17235_s26 + $0x28] ss:$16 sps:$4 sm:$0xff]   ;;  %v11468_v15 = vld [vmem:[%s17235_s26 + $0x44] ss:$16 sps:$4 sm:$0xff]   ;;  %v68_v10 = vlaneseq }
   0xd   :  { %9578 = vmatmul.mubr.msk.bf16.vlgmr.msra.gmra.mrb[0].mxu0 %vm108_vm0, %v61_v4  ;;  %9579 = vmatmul.mubr.msk.bf16.vlgmr.msra.gmra.mrb[0].mxu1 %vm108_vm0, %v61_v4  ;;  %v11471_v16 = vld [vmem:[%s17235_s26 + $0x4c] ss:$16 sps:$4 sm:$0xff]   ;;  %v11466_v17 = vld [vmem:[%s17235_s26 + $0x40] ss:$16 sps:$4 sm:$0xff]   ;;  %v11474_v18 = vld [vmem:[%s17235_s26 + $0x64] ss:$16 sps:$4 sm:$0xff]  }
   0xe   :  { %993 = vmatpush1.bf16.msra.mxu0 %v11454_v7  ;;  %1075 = vmatpush1.bf16.msra.mxu1 %v11457_v9  ;;  %v11469_v19 = vld [vmem:[%s17235_s26 + $0x48] ss:$16 sps:$4 sm:$0xff]   ;;  %v11477_v20 = vld [vmem:[%s17235_s26 + $0x6c] ss:$16 sps:$4 sm:$0xff]   ;;  %v11472_v21 = vld [vmem:[%s17235_s26 + $0x60] ss:$16 sps:$4 sm:$0xff]  }
   0xf   :  { %994 = vmatprep.subr.bf16.mxu0 %v11462_v11  ;;  %1076 = vmatprep.subr.bf16.mxu1 %v11465_v13  ;;  %v11480_v22 = vld [vmem:[%s17235_s26 + $0x84] ss:$16 sps:$4 sm:$0xff]   ;;  %v11475_v23 = vld [vmem:[%s17235_s26 + $0x68] ss:$16 sps:$4 sm:$0xff]   ;;  %v11483_v24 = vld [vmem:[%s17235_s26 + $0x8c] ss:$16 sps:$4 sm:$0xff]  }
  0x10   :  { %v11478_v25 = vld [vmem:[%s17235_s26 + $0x80] ss:$16 sps:$4 sm:$0xff]   ;;  %v11486_v26 = vld [vmem:[%s17235_s26 + $0xa4] ss:$16 sps:$4 sm:$0xff]   ;;  %v11481_v27 = vld [vmem:[%s17235_s26 + $0x88] ss:$16 sps:$4 sm:$0xff]  }
  0x11   :  { %v11489_v28 = vld [vmem:[%s17235_s26 + $0xac] ss:$16 sps:$4 sm:$0xff]   ;;  %v11484_v29 = vld [vmem:[%s17235_s26 + $0xa0] ss:$16 sps:$4 sm:$0xff]   ;;  %v11492_v30 = vld [vmem:[%s17235_s26 + $0xc4] ss:$16 sps:$4 sm:$0xff]  }
  0x12   :  { %995 = vmatpush1.bf16.msra.mxu0 %v11460_v12  ;;  %1077 = vmatpush1.bf16.msra.mxu1 %v11463_v14  ;;  %v11487_v31 = vld [vmem:[%s17235_s26 + $0xa8] ss:$16 sps:$4 sm:$0xff]   ;;  %v11495_v32 = vld [vmem:[%s17235_s26 + $0xcc] ss:$16 sps:$4 sm:$0xff]   ;;  %v11490_v33 = vld [vmem:[%s17235_s26 + $0xc0] ss:$16 sps:$4 sm:$0xff]  }
  0x13   :  { %996 = vmatprep.subr.bf16.mxu0 %v11468_v15  ;;  %1078 = vmatprep.subr.bf16.mxu1 %v11471_v16  ;;  %v11498_v34 = vld [vmem:[%s17235_s26 + $0xe4] ss:$16 sps:$4 sm:$0xff]   ;;  %v11493_v35 = vld [vmem:[%s17235_s26 + $0xc8] ss:$16 sps:$4 sm:$0xff]   ;;  %v11501_v36 = vld [vmem:[%s17235_s26 + $0xec] ss:$16 sps:$4 sm:$0xff]  }
  0x14   :  { %v11496_v37 = vld [vmem:[%s17235_s26 + $0xe0] ss:$16 sps:$4 sm:$0xff]   ;;  %v11504_v38 = vld [vmem:[%s17235_s26 + $0x104] ss:$16 sps:$4 sm:$0xff]   ;;  %v11499_v39 = vld [vmem:[%s17235_s26 + $0xe8] ss:$16 sps:$4 sm:$0xff]  }
  0x15   :  { %v11507_v40 = vld [vmem:[%s17235_s26 + $0x10c] ss:$16 sps:$4 sm:$0xff]   ;;  %v11502_v41 = vld [vmem:[%s17235_s26 + $0x100] ss:$16 sps:$4 sm:$0xff]   ;;  %v11510_v42 = vld [vmem:[%s17235_s26 + $0x124] ss:$16 sps:$4 sm:$0xff]  }
  0x16   :  { %997 = vmatpush1.bf16.msra.mxu0 %v11466_v17  ;;  %1079 = vmatpush1.bf16.msra.mxu1 %v11469_v19  ;;  %v11505_v43 = vld [vmem:[%s17235_s26 + $0x108] ss:$16 sps:$4 sm:$0xff]   ;;  %v11508_v44 = vld [vmem:[%s17235_s26 + $0x120] ss:$16 sps:$4 sm:$0xff]   ;;  %v11513_v45 = vld [vmem:[%s17235_s26 + $0x12c] ss:$16 sps:$4 sm:$0xff]  }
  0x17   :  { %998 = vmatprep.subr.bf16.mxu0 %v11474_v18  ;;  %1080 = vmatprep.subr.bf16.mxu1 %v11477_v20  ;;  %v11511_v46 = vld [vmem:[%s17235_s26 + $0x128] ss:$16 sps:$4 sm:$0xff]   ;;  %v11516_v47 = vld [vmem:[%s17235_s26 + $0x144] ss:$16 sps:$4 sm:$0xff]   ;;  %v11519_v48 = vld [vmem:[%s17235_s26 + $0x14c] ss:$16 sps:$4 sm:$0xff]  }
  0x18   :  { %v11514_v49 = vld [vmem:[%s17235_s26 + $0x140] ss:$16 sps:$4 sm:$0xff]   ;;  %v11522_v50 = vld [vmem:[%s17235_s26 + $0x164] ss:$16 sps:$4 sm:$0xff]   ;;  %v11517_v51 = vld [vmem:[%s17235_s26 + $0x148] ss:$16 sps:$4 sm:$0xff]  }
  0x19   :  { %v11525_v52 = vld [vmem:[%s17235_s26 + $0x16c] ss:$16 sps:$4 sm:$0xff]   ;;  %v11520_v53 = vld [vmem:[%s17235_s26 + $0x160] ss:$16 sps:$4 sm:$0xff]   ;;  %v11528_v54 = vld [vmem:[%s17235_s26 + $0x184] ss:$16 sps:$4 sm:$0xff]  }
  0x1a   :  { %999 = vmatpush1.bf16.msra.mxu0 %v11472_v21  ;;  %1081 = vmatpush1.bf16.msra.mxu1 %v11475_v23  ;;  %v11523_v55 = vld [vmem:[%s17235_s26 + $0x168] ss:$16 sps:$4 sm:$0xff]   ;;  %v11531_v56 = vld [vmem:[%s17235_s26 + $0x18c] ss:$16 sps:$4 sm:$0xff]   ;;  %v11526_v57 = vld [vmem:[%s17235_s26 + $0x180] ss:$16 sps:$4 sm:$0xff]  }
  0x1b   :  { %1000 = vmatprep.subr.bf16.mxu0 %v11480_v22  ;;  %1082 = vmatprep.subr.bf16.mxu1 %v11483_v24  ;;  %v11534_v58 = vld [vmem:[%s17235_s26 + $0x1a4] ss:$16 sps:$4 sm:$0xff]   ;;  %v11529_v59 = vld [vmem:[%s17235_s26 + $0x188] ss:$16 sps:$4 sm:$0xff]   ;;  %v11537_v60 = vld [vmem:[%s17235_s26 + $0x1ac] ss:$16 sps:$4 sm:$0xff]  }
  0x1c   :  { %v11532_v61 = vld [vmem:[%s17235_s26 + $0x1a0] ss:$16 sps:$4 sm:$0xff]   ;;  %v11535_v62 = vld [vmem:[%s17235_s26 + $0x1a8] ss:$16 sps:$4 sm:$0xff]   ;;  %v11540_v63 = vld [vmem:[%s17235_s26 + $0x1c4] ss:$16 sps:$4 sm:$0xff]  }
  0x1d   :  { %v11543_v0 = vld [vmem:[%s17235_s26 + $0x1cc] ss:$16 sps:$4 sm:$0xff]   ;;  %v11538_v2 = vld [vmem:[%s17235_s26 + $0x1c0] ss:$16 sps:$4 sm:$0xff]   ;;  %v11541_v3 = vld [vmem:[%s17235_s26 + $0x1c8] ss:$16 sps:$4 sm:$0xff]  }
  0x1e   :  { %1001 = vmatpush1.bf16.msra.mxu0 %v11478_v25  ;;  %1083 = vmatpush1.bf16.msra.mxu1 %v11481_v27  ;;  %v11546_v4 = vld [vmem:[%s17235_s26 + $0x1e4] ss:$16 sps:$4 sm:$0xff]   ;;  %v11549_v5 = vld [vmem:[%s17235_s26 + $0x1ec] ss:$16 sps:$4 sm:$0xff]   ;;  %v11544_v6 = vld [vmem:[%s17235_s26 + $0x1e0] ss:$16 sps:$4 sm:$0xff]  }
  0x1f   :  { %1002 = vmatprep.subr.bf16.mxu0 %v11486_v26  ;;  %1084 = vmatprep.subr.bf16.mxu1 %v11489_v28  ;;  %v11547_v7 = vld [vmem:[%s17235_s26 + $0x1e8] ss:$16 sps:$4 sm:$0xff]   ;;  %v11552_v8 = vld [vmem:[%s17235_s26 + $0x204] ss:$16 sps:$4 sm:$0xff]   ;;  %v11555_v9 = vld [vmem:[%s17235_s26 + $0x20c] ss:$16 sps:$4 sm:$0xff]  }
  0x20   :  { %v13559_v11 = vshrl.u32 %v68_v10, 7  ;;  %v13567_v13 = vld [vmem:[%s17213_s3] sm:$0xf]  ;;  %v11607_v10 = vld [vmem:[%s17235_s26 + $0x328] ss:$16 sps:$4 sm:$0xff]  }
  0x22   :  { %1003 = vmatpush1.bf16.msra.mxu0 %v11484_v29  ;;  %1085 = vmatpush1.bf16.msra.mxu1 %v11487_v31  ;;  %v13562_v12 = vsub.s32 0, %v13559_v11  ;;  %v13570_v14 = vsub.s32 1, %v13559_v11  ;;  %v13573_v15 = vsub.s32 3, %v13559_v11  ;;  %v11550_v29 = vld [vmem:[%s17235_s26 + $0x200] ss:$16 sps:$4 sm:$0xff]  }
  0x23   :  { %1004 = vmatprep.subr.bf16.mxu0 %v11492_v30  ;;  %1086 = vmatprep.subr.bf16.mxu1 %v11495_v32  ;;  %v11553_v30 = vld [vmem:[%s17235_s26 + $0x208] ss:$16 sps:$4 sm:$0xff]  }
  0x24   :  { %v71_v16 = vrot.slane %v13567_v13, %v13562_v12  ;;  %v75_v17 = vrot.slane %v13567_v13, %v13570_v14  ;;  %v83_v19 = vrot.slane %v13567_v13, %v13573_v15 }
  0x26   :  { %1005 = vmatpush1.bf16.msra.mxu0 %v11490_v33  ;;  %1087 = vmatpush1.bf16.msra.mxu1 %v11493_v35  ;;  %v11558_v33 = vld [vmem:[%s17235_s26 + $0x224] ss:$16 sps:$4 sm:$0xff]  }
  0x27   :  { %1006 = vmatprep.subr.bf16.mxu0 %v11498_v34  ;;  %1088 = vmatprep.subr.bf16.mxu1 %v11501_v36 }
  0x2a   :  { %1007 = vmatpush1.bf16.msra.mxu0 %v11496_v37  ;;  %1089 = vmatpush1.bf16.msra.mxu1 %v11499_v39 }
  0x2b   :  { %1008 = vmatprep.subr.bf16.mxu0 %v11504_v38  ;;  %1090 = vmatprep.subr.bf16.mxu1 %v11507_v40  ;;  %v11561_v38 = vld [vmem:[%s17235_s26 + $0x22c] ss:$16 sps:$4 sm:$0xff]   ;;  %v11556_v40 = vld [vmem:[%s17235_s26 + $0x220] ss:$16 sps:$4 sm:$0xff]  }
  0x2e   :  { %1009 = vmatpush1.bf16.msra.mxu0 %v11502_v41  ;;  %1091 = vmatpush1.bf16.msra.mxu1 %v11505_v43  ;;  %v11559_v41 = vld [vmem:[%s17235_s26 + $0x228] ss:$16 sps:$4 sm:$0xff]   ;;  %v11567_v43 = vld [vmem:[%s17235_s26 + $0x24c] ss:$16 sps:$4 sm:$0xff]  }
  0x2f   :  { %1010 = vmatprep.subr.bf16.mxu0 %v11510_v42  ;;  %1092 = vmatprep.subr.bf16.mxu1 %v11513_v45  ;;  %v11564_v42 = vld [vmem:[%s17235_s26 + $0x244] ss:$16 sps:$4 sm:$0xff]   ;;  %v11565_v45 = vld [vmem:[%s17235_s26 + $0x248] ss:$16 sps:$4 sm:$0xff]  }
  0x32   :  { %1011 = vmatpush1.bf16.msra.mxu0 %v11508_v44  ;;  %1093 = vmatpush1.bf16.msra.mxu1 %v11511_v46  ;;  %v11562_v44 = vld [vmem:[%s17235_s26 + $0x240] ss:$16 sps:$4 sm:$0xff]   ;;  %v11570_v46 = vld [vmem:[%s17235_s26 + $0x264] ss:$16 sps:$4 sm:$0xff]  }
  0x33   :  { %1012 = vmatprep.subr.bf16.mxu0 %v11516_v47  ;;  %1094 = vmatprep.subr.bf16.mxu1 %v11519_v48  ;;  %v11573_v47 = vld [vmem:[%s17235_s26 + $0x26c] ss:$16 sps:$4 sm:$0xff]   ;;  %v11568_v48 = vld [vmem:[%s17235_s26 + $0x260] ss:$16 sps:$4 sm:$0xff]  }
  0x36   :  { %1013 = vmatpush1.bf16.msra.mxu0 %v11514_v49  ;;  %1095 = vmatpush1.bf16.msra.mxu1 %v11517_v51  ;;  %v11571_v49 = vld [vmem:[%s17235_s26 + $0x268] ss:$16 sps:$4 sm:$0xff]   ;;  %v11579_v51 = vld [vmem:[%s17235_s26 + $0x28c] ss:$16 sps:$4 sm:$0xff]  }
  0x37   :  { %1014 = vmatprep.subr.bf16.mxu0 %v11522_v50  ;;  %1096 = vmatprep.subr.bf16.mxu1 %v11525_v52  ;;  %v11576_v50 = vld [vmem:[%s17235_s26 + $0x284] ss:$16 sps:$4 sm:$0xff]   ;;  %v11574_v52 = vld [vmem:[%s17235_s26 + $0x280] ss:$16 sps:$4 sm:$0xff]  }
  0x3a   :  { %1015 = vmatpush1.bf16.msra.mxu0 %v11520_v53  ;;  %1097 = vmatpush1.bf16.msra.mxu1 %v11523_v55  ;;  %v11577_v53 = vld [vmem:[%s17235_s26 + $0x288] ss:$16 sps:$4 sm:$0xff]   ;;  %v11585_v55 = vld [vmem:[%s17235_s26 + $0x2ac] ss:$16 sps:$4 sm:$0xff]  }
  0x3b   :  { %1016 = vmatprep.subr.bf16.mxu0 %v11528_v54  ;;  %1098 = vmatprep.subr.bf16.mxu1 %v11531_v56  ;;  %v11582_v54 = vld [vmem:[%s17235_s26 + $0x2a4] ss:$16 sps:$4 sm:$0xff]   ;;  %v11580_v56 = vld [vmem:[%s17235_s26 + $0x2a0] ss:$16 sps:$4 sm:$0xff]  }
  0x3e   :  { %1017 = vmatpush1.bf16.msra.mxu0 %v11526_v57  ;;  %1099 = vmatpush1.bf16.msra.mxu1 %v11529_v59  ;;  %v11583_v57 = vld [vmem:[%s17235_s26 + $0x2a8] ss:$16 sps:$4 sm:$0xff]   ;;  %v11591_v59 = vld [vmem:[%s17235_s26 + $0x2cc] ss:$16 sps:$4 sm:$0xff]  }
  0x3f   :  { %1018 = vmatprep.subr.bf16.mxu0 %v11534_v58  ;;  %1100 = vmatprep.subr.bf16.mxu1 %v11537_v60  ;;  %v11588_v58 = vld [vmem:[%s17235_s26 + $0x2c4] ss:$16 sps:$4 sm:$0xff]   ;;  %v11586_v60 = vld [vmem:[%s17235_s26 + $0x2c0] ss:$16 sps:$4 sm:$0xff]  }
  0x42   :  { %1019 = vmatpush1.bf16.msra.mxu0 %v11532_v61  ;;  %1101 = vmatpush1.bf16.msra.mxu1 %v11535_v62  ;;  %v11589_v61 = vld [vmem:[%s17235_s26 + $0x2c8] ss:$16 sps:$4 sm:$0xff]   ;;  %v11594_v62 = vld [vmem:[%s17235_s26 + $0x2e4] ss:$16 sps:$4 sm:$0xff]  }
  0x43   :  { %1020 = vmatprep.subr.bf16.mxu0 %v11540_v63  ;;  %1102 = vmatprep.subr.bf16.mxu1 %v11543_v0  ;;  %v11597_v63 = vld [vmem:[%s17235_s26 + $0x2ec] ss:$16 sps:$4 sm:$0xff]   ;;  %v11592_v0 = vld [vmem:[%s17235_s26 + $0x2e0] ss:$16 sps:$4 sm:$0xff]  }
  0x46   :  { %1021 = vmatpush1.bf16.msra.mxu0 %v11538_v2  ;;  %1103 = vmatpush1.bf16.msra.mxu1 %v11541_v3  ;;  %v11595_v2 = vld [vmem:[%s17235_s26 + $0x2e8] ss:$16 sps:$4 sm:$0xff]   ;;  %v11600_v3 = vld [vmem:[%s17235_s26 + $0x304] ss:$16 sps:$4 sm:$0xff]  }
  0x47   :  { %1022 = vmatprep.subr.bf16.mxu0 %v11546_v4  ;;  %1104 = vmatprep.subr.bf16.mxu1 %v11549_v5  ;;  %v11603_v4 = vld [vmem:[%s17235_s26 + $0x30c] ss:$16 sps:$4 sm:$0xff]   ;;  %v11598_v5 = vld [vmem:[%s17235_s26 + $0x300] ss:$16 sps:$4 sm:$0xff]  }
  0x4a   :  { %1023 = vmatpush1.bf16.msra.mxu0 %v11544_v6  ;;  %1105 = vmatpush1.bf16.msra.mxu1 %v11547_v7  ;;  %v11601_v6 = vld [vmem:[%s17235_s26 + $0x308] ss:$16 sps:$4 sm:$0xff]   ;;  %v11606_v7 = vld [vmem:[%s17235_s26 + $0x324] ss:$16 sps:$4 sm:$0xff]  }
  0x4b   :  { %1033 = vmatprep.subr.bf16.mxu0 %v11552_v8  ;;  %1115 = vmatprep.subr.bf16.mxu1 %v11555_v9  ;;  %v11609_v8 = vld [vmem:[%s17235_s26 + $0x32c] ss:$16 sps:$4 sm:$0xff]   ;;  %v11604_v9 = vld [vmem:[%s17235_s26 + $0x320] ss:$16 sps:$4 sm:$0xff]  }
  0xe0   :  { %v146_v18 = vpop.f32.mrb[0].mxu0  ;;  %v13581_v24 = vpop.f32.mrb[0].mxu1 }
  0xe1   :  { %v147_v20 = vadd.f32 %v146_v18, %v71_v16  ;;  %v148_v21 = vpop.f32.mrb[1].mxu0  ;;  %v189_v27 = vpop.f32.mrb[1].mxu1  ;;  %v11612_v16 = vld [vmem:[%s17235_s26 + $0x344] ss:$16 sps:$4 sm:$0xff]   ;;  %v11610_v18 = vld [vmem:[%s17235_s26 + $0x340] ss:$16 sps:$4 sm:$0xff]  }
  0xe2   :  { %v149_v22 = vadd.f32 %v148_v21, %v75_v17  ;;  %v150_v23 = vpop.f32.mrb[2].mxu0  ;;  %v190_v31 = vadd.f32 %v189_v27, %v83_v19  ;;  %v191_v32 = vpop.f32.mrb[2].mxu1  ;;  %v11615_v17 = vld [vmem:[%s17235_s26 + $0x34c] ss:$16 sps:$4 sm:$0xff]   ;;  %v11613_v19 = vld [vmem:[%s17235_s26 + $0x348] ss:$16 sps:$4 sm:$0xff]  }
  0xe3   :  { %v194_v25 = vmax.f32 %v147_v20, 0.0  ;;  %v151_v26 = vpop.f32.mrb[3].mxu0  ;;  %v192_v34 = vpop.f32.mrb[3].mxu1  ;;  %v11618_v20 = vld [vmem:[%s17235_s26 + $0x364] ss:$16 sps:$4 sm:$0xff]  }
  0xe4   :  { %v195_v28 = vmax.f32 %v149_v22, 0.0  ;;  %v197_v36 = vmax.f32 %v190_v31, 0.0  ;;  %v11621_v21 = vld [vmem:[%s17235_s26 + $0x36c] ss:$16 sps:$4 sm:$0xff]   ;;  %v11616_v22 = vld [vmem:[%s17235_s26 + $0x360] ss:$16 sps:$4 sm:$0xff]  }
  0xe5   :  { %v198_v37 = vpack.c.bf16 %v194_v25, %v194_v25  ;;  %v11619_v23 = vld [vmem:[%s17235_s26 + $0x368] ss:$16 sps:$4 sm:$0xff]   ;;  %v11624_v25 = vld [vmem:[%s17235_s26 + $0x384] ss:$16 sps:$4 sm:$0xff]   ;;  %v11627_v26 = vld [vmem:[%s17235_s26 + $0x38c] ss:$16 sps:$4 sm:$0xff]  }
  0xe6   :  { %v199_v35 = vpack.c.bf16 %v195_v28, %v195_v28  ;;  %v201_v39 = vpack.c.bf16 %v197_v36, %v197_v36  ;;  %v11622_v27 = vld [vmem:[%s17235_s26 + $0x380] ss:$16 sps:$4 sm:$0xff]   ;;  %v11625_v28 = vld [vmem:[%s17235_s26 + $0x388] ss:$16 sps:$4 sm:$0xff]   ;;  %v11633_v31 = vld [vmem:[%s17235_s26 + $0x3ac] ss:$16 sps:$4 sm:$0xff]  }
  0xe7   :  { %v11628_v32 = vld [vmem:[%s17235_s26 + $0x3a0] ss:$16 sps:$4 sm:$0xff]   ;;  %v11636_v34 = vld [vmem:[%s17235_s26 + $0x3c4] ss:$16 sps:$4 sm:$0xff]  }
  0xe8   :  { %1024 = vmatprep.mubr.bf16.mxu0 %v199_v35  ;;  %1106 = vmatprep.mubr.bf16.mxu1 %v199_v35  ;;  %v11639_v35 = vld [vmem:[%s17235_s26 + $0x3cc] ss:$16 sps:$4 sm:$0xff]   ;;  %v11634_v36 = vld [vmem:[%s17235_s26 + $0x3c0] ss:$16 sps:$4 sm:$0xff]  }
  0xe9   :  { %1025 = vmatmul.mubr.bf16.vlgmr.msra.gmra.mrb[4].mxu0 %v198_v37  ;;  %1107 = vmatmul.mubr.bf16.vlgmr.msra.gmra.mrb[4].mxu1 %v198_v37 }
  0xea   :  { %1034 = vmatpush1.bf16.msra.mxu0 %v11550_v29  ;;  %1116 = vmatpush1.bf16.msra.mxu1 %v11553_v30  ;;  %v13734_v29 = vsub.s32 2, %v13559_v11  ;;  %v11630_v30 = vld [vmem:[%s17235_s26 + $0x3a4] ss:$16 sps:$4 sm:$0xff]  }
  0xeb   :  { %1035 = vmatprep.subr.bf16.mxu0 %v11558_v33  ;;  %1117 = vmatprep.subr.bf16.mxu1 %v11561_v38  ;;  %v11631_v33 = vld [vmem:[%s17235_s26 + $0x3a8] ss:$16 sps:$4 sm:$0xff]   ;;  %v11642_v38 = vld [vmem:[%s17235_s26 + $0x3e4] ss:$16 sps:$4 sm:$0xff]  }
  0xec   :  { %1065 = vmatprep.mubr.bf16.mxu0 %v201_v39  ;;  %1147 = vmatprep.mubr.bf16.mxu1 %v201_v39  ;;  %v79_v11 = vrot.slane %v13567_v13, %v13734_v29  ;;  %v11637_v13 = vld [vmem:[%s17235_s26 + $0x3c8] ss:$16 sps:$4 sm:$0xff]   ;;  %v11645_v39 = vld [vmem:[%s17235_s26 + $0x3ec] ss:$16 sps:$4 sm:$0xff]  }
  0xee   :  { %1036 = vmatpush1.bf16.msra.mxu0 %v11556_v40  ;;  %1118 = vmatpush1.bf16.msra.mxu1 %v11559_v41  ;;  %v188_v37 = vadd.f32 %v13581_v24, %v79_v11  ;;  %v11640_v40 = vld [vmem:[%s17235_s26 + $0x3e0] ss:$16 sps:$4 sm:$0xff]   ;;  %v11643_v24 = vld [vmem:[%s17235_s26 + $0x3e8] ss:$16 sps:$4 sm:$0xff]  }
  0xef   :  { %1037 = vmatprep.subr.bf16.mxu0 %v11564_v42  ;;  %1119 = vmatprep.subr.bf16.mxu1 %v11567_v43  ;;  %v11648_v42 = vld [vmem:[%s17212_s6 + $0x4] ss:$16 sps:$4 sm:$0xff]   ;;  %v11651_v43 = vld [vmem:[%s17212_s6 + $0xc] ss:$16 sps:$4 sm:$0xff]   ;;  %v11715_v11 = vld [vmem:[%s17212_s6 + $0x168] ss:$16 sps:$4 sm:$0xff]  }
  0xf0   :  { %v196_v41 = vmax.f32 %v188_v37, 0.0  ;;  %v11726_v37 = vld [vmem:[%s17212_s6 + $0x1a4] ss:$16 sps:$4 sm:$0xff]  }
  0xf2   :  { %1038 = vmatpush1.bf16.msra.mxu0 %v11562_v44  ;;  %1120 = vmatpush1.bf16.msra.mxu1 %v11565_v45  ;;  %v11646_v44 = vld [vmem:[%s17212_s6] ss:$16 sps:$4 sm:$0xff]   ;;  %v11649_v45 = vld [vmem:[%s17212_s6 + $0x8] ss:$16 sps:$4 sm:$0xff]  }
  0xf3   :  { %1039 = vmatprep.subr.bf16.mxu0 %v11570_v46  ;;  %1121 = vmatprep.subr.bf16.mxu1 %v11573_v47  ;;  %v200_v46 = vpack.c.bf16 %v196_v41, %v196_v41  ;;  %v11654_v47 = vld [vmem:[%s17212_s6 + $0x24] ss:$16 sps:$4 sm:$0xff]   ;;  %v11735_v41 = vld [vmem:[%s17212_s6 + $0x1cc] ss:$16 sps:$4 sm:$0xff]  }
  0xf6   :  { %1040 = vmatpush1.bf16.msra.mxu0 %v11568_v48  ;;  %1122 = vmatpush1.bf16.msra.mxu1 %v11571_v49  ;;  %v11657_v48 = vld [vmem:[%s17212_s6 + $0x2c] ss:$16 sps:$4 sm:$0xff]   ;;  %v11652_v49 = vld [vmem:[%s17212_s6 + $0x20] ss:$16 sps:$4 sm:$0xff]  }
  0xf7   :  { %1041 = vmatprep.subr.bf16.mxu0 %v11576_v50  ;;  %1123 = vmatprep.subr.bf16.mxu1 %v11579_v51  ;;  %v11655_v50 = vld [vmem:[%s17212_s6 + $0x28] ss:$16 sps:$4 sm:$0xff]   ;;  %v11660_v51 = vld [vmem:[%s17212_s6 + $0x44] ss:$16 sps:$4 sm:$0xff]  }
  0xfa   :  { %1042 = vmatpush1.bf16.msra.mxu0 %v11574_v52  ;;  %1124 = vmatpush1.bf16.msra.mxu1 %v11577_v53  ;;  %v11663_v52 = vld [vmem:[%s17212_s6 + $0x4c] ss:$16 sps:$4 sm:$0xff]   ;;  %v11658_v53 = vld [vmem:[%s17212_s6 + $0x40] ss:$16 sps:$4 sm:$0xff]  }
  0xfb   :  { %1043 = vmatprep.subr.bf16.mxu0 %v11582_v54  ;;  %1125 = vmatprep.subr.bf16.mxu1 %v11585_v55  ;;  %v11661_v54 = vld [vmem:[%s17212_s6 + $0x48] ss:$16 sps:$4 sm:$0xff]   ;;  %v11666_v55 = vld [vmem:[%s17212_s6 + $0x64] ss:$16 sps:$4 sm:$0xff]  }
  0xfe   :  { %1044 = vmatpush1.bf16.msra.mxu0 %v11580_v56  ;;  %1126 = vmatpush1.bf16.msra.mxu1 %v11583_v57  ;;  %v11669_v56 = vld [vmem:[%s17212_s6 + $0x6c] ss:$16 sps:$4 sm:$0xff]   ;;  %v11664_v57 = vld [vmem:[%s17212_s6 + $0x60] ss:$16 sps:$4 sm:$0xff]  }
  0xff   :  { %1045 = vmatprep.subr.bf16.mxu0 %v11588_v58  ;;  %1127 = vmatprep.subr.bf16.mxu1 %v11591_v59  ;;  %v11667_v58 = vld [vmem:[%s17212_s6 + $0x68] ss:$16 sps:$4 sm:$0xff]   ;;  %v11672_v59 = vld [vmem:[%s17212_s6 + $0x84] ss:$16 sps:$4 sm:$0xff]  }
 0x102   :  { %1046 = vmatpush1.bf16.msra.mxu0 %v11586_v60  ;;  %1128 = vmatpush1.bf16.msra.mxu1 %v11589_v61  ;;  %v11675_v60 = vld [vmem:[%s17212_s6 + $0x8c] ss:$16 sps:$4 sm:$0xff]   ;;  %v11670_v61 = vld [vmem:[%s17212_s6 + $0x80] ss:$16 sps:$4 sm:$0xff]  }
 0x103   :  { %1047 = vmatprep.subr.bf16.mxu0 %v11594_v62  ;;  %1129 = vmatprep.subr.bf16.mxu1 %v11597_v63  ;;  %v11673_v62 = vld [vmem:[%s17212_s6 + $0x88] ss:$16 sps:$4 sm:$0xff]   ;;  %v11678_v63 = vld [vmem:[%s17212_s6 + $0xa4] ss:$16 sps:$4 sm:$0xff]  }
 0x106   :  { %1048 = vmatpush1.bf16.msra.mxu0 %v11592_v0  ;;  %1130 = vmatpush1.bf16.msra.mxu1 %v11595_v2  ;;  %v11681_v0 = vld [vmem:[%s17212_s6 + $0xac] ss:$16 sps:$4 sm:$0xff]   ;;  %v11676_v2 = vld [vmem:[%s17212_s6 + $0xa0] ss:$16 sps:$4 sm:$0xff]  }
 0x107   :  { %1049 = vmatprep.subr.bf16.mxu0 %v11600_v3  ;;  %1131 = vmatprep.subr.bf16.mxu1 %v11603_v4  ;;  %v11679_v3 = vld [vmem:[%s17212_s6 + $0xa8] ss:$16 sps:$4 sm:$0xff]   ;;  %v11684_v4 = vld [vmem:[%s17212_s6 + $0xc4] ss:$16 sps:$4 sm:$0xff]  }
 0x10a   :  { %1050 = vmatpush1.bf16.msra.mxu0 %v11598_v5  ;;  %1132 = vmatpush1.bf16.msra.mxu1 %v11601_v6  ;;  %v11687_v5 = vld [vmem:[%s17212_s6 + $0xcc] ss:$16 sps:$4 sm:$0xff]   ;;  %v11682_v6 = vld [vmem:[%s17212_s6 + $0xc0] ss:$16 sps:$4 sm:$0xff]  }
 0x10b   :  { %1051 = vmatprep.subr.bf16.mxu0 %v11606_v7  ;;  %1133 = vmatprep.subr.bf16.mxu1 %v11609_v8  ;;  %v11685_v7 = vld [vmem:[%s17212_s6 + $0xc8] ss:$16 sps:$4 sm:$0xff]   ;;  %v11690_v8 = vld [vmem:[%s17212_s6 + $0xe4] ss:$16 sps:$4 sm:$0xff]  }
 0x10e   :  { %1052 = vmatpush1.bf16.msra.mxu0 %v11604_v9  ;;  %1134 = vmatpush1.bf16.msra.mxu1 %v11607_v10  ;;  %v11693_v9 = vld [vmem:[%s17212_s6 + $0xec] ss:$16 sps:$4 sm:$0xff]   ;;  %v11688_v10 = vld [vmem:[%s17212_s6 + $0xe0] ss:$16 sps:$4 sm:$0xff]  }
 0x10f   :  { %1053 = vmatprep.subr.bf16.mxu0 %v11612_v16  ;;  %1135 = vmatprep.subr.bf16.mxu1 %v11615_v17  ;;  %v11691_v16 = vld [vmem:[%s17212_s6 + $0xe8] ss:$16 sps:$4 sm:$0xff]   ;;  %v11696_v17 = vld [vmem:[%s17212_s6 + $0x104] ss:$16 sps:$4 sm:$0xff]  }
 0x112   :  { %1054 = vmatpush1.bf16.msra.mxu0 %v11610_v18  ;;  %1136 = vmatpush1.bf16.msra.mxu1 %v11613_v19  ;;  %v11699_v18 = vld [vmem:[%s17212_s6 + $0x10c] ss:$16 sps:$4 sm:$0xff]   ;;  %v11694_v19 = vld [vmem:[%s17212_s6 + $0x100] ss:$16 sps:$4 sm:$0xff]  }
 0x113   :  { %1055 = vmatprep.subr.bf16.mxu0 %v11618_v20  ;;  %1137 = vmatprep.subr.bf16.mxu1 %v11621_v21  ;;  %v11697_v20 = vld [vmem:[%s17212_s6 + $0x108] ss:$16 sps:$4 sm:$0xff]   ;;  %v11702_v21 = vld [vmem:[%s17212_s6 + $0x124] ss:$16 sps:$4 sm:$0xff]  }
 0x116   :  { %1056 = vmatpush1.bf16.msra.mxu0 %v11616_v22  ;;  %1138 = vmatpush1.bf16.msra.mxu1 %v11619_v23  ;;  %v11705_v22 = vld [vmem:[%s17212_s6 + $0x12c] ss:$16 sps:$4 sm:$0xff]   ;;  %v11700_v23 = vld [vmem:[%s17212_s6 + $0x120] ss:$16 sps:$4 sm:$0xff]  }
 0x117   :  { %1057 = vmatprep.subr.bf16.mxu0 %v11624_v25  ;;  %1139 = vmatprep.subr.bf16.mxu1 %v11627_v26  ;;  %v11703_v25 = vld [vmem:[%s17212_s6 + $0x128] ss:$16 sps:$4 sm:$0xff]   ;;  %v11708_v26 = vld [vmem:[%s17212_s6 + $0x144] ss:$16 sps:$4 sm:$0xff]  }
 0x11a   :  { %1058 = vmatpush1.bf16.msra.mxu0 %v11622_v27  ;;  %1140 = vmatpush1.bf16.msra.mxu1 %v11625_v28  ;;  %v11711_v27 = vld [vmem:[%s17212_s6 + $0x14c] ss:$16 sps:$4 sm:$0xff]   ;;  %v11706_v28 = vld [vmem:[%s17212_s6 + $0x140] ss:$16 sps:$4 sm:$0xff]  }
 0x11b   :  { %1059 = vmatprep.subr.bf16.mxu0 %v11630_v30  ;;  %1141 = vmatprep.subr.bf16.mxu1 %v11633_v31  ;;  %v11709_v30 = vld [vmem:[%s17212_s6 + $0x148] ss:$16 sps:$4 sm:$0xff]   ;;  %v11714_v31 = vld [vmem:[%s17212_s6 + $0x164] ss:$16 sps:$4 sm:$0xff]  }
 0x11e   :  { %1060 = vmatpush1.bf16.msra.mxu0 %v11628_v32  ;;  %1142 = vmatpush1.bf16.msra.mxu1 %v11631_v33  ;;  %v11717_v32 = vld [vmem:[%s17212_s6 + $0x16c] ss:$16 sps:$4 sm:$0xff]   ;;  %v11712_v33 = vld [vmem:[%s17212_s6 + $0x160] ss:$16 sps:$4 sm:$0xff]  }
 0x11f   :  { %1061 = vmatprep.subr.bf16.mxu0 %v11636_v34  ;;  %1143 = vmatprep.subr.bf16.mxu1 %v11639_v35  ;;  %v11720_v34 = vld [vmem:[%s17212_s6 + $0x184] ss:$16 sps:$4 sm:$0xff]   ;;  %v11723_v35 = vld [vmem:[%s17212_s6 + $0x18c] ss:$16 sps:$4 sm:$0xff]  }
 0x122   :  { %1062 = vmatpush1.bf16.msra.mxu0 %v11634_v36  ;;  %1144 = vmatpush1.bf16.msra.mxu1 %v11637_v13  ;;  %v11718_v36 = vld [vmem:[%s17212_s6 + $0x180] ss:$16 sps:$4 sm:$0xff]   ;;  %v11721_v13 = vld [vmem:[%s17212_s6 + $0x188] ss:$16 sps:$4 sm:$0xff]  }
 0x123   :  { %1063 = vmatprep.subr.bf16.mxu0 %v11642_v38  ;;  %1145 = vmatprep.subr.bf16.mxu1 %v11645_v39  ;;  %v11729_v38 = vld [vmem:[%s17212_s6 + $0x1ac] ss:$16 sps:$4 sm:$0xff]   ;;  %v11724_v39 = vld [vmem:[%s17212_s6 + $0x1a0] ss:$16 sps:$4 sm:$0xff]  }
 0x126   :  { %1064 = vmatpush1.bf16.msra.mxu0 %v11640_v40  ;;  %1146 = vmatpush1.bf16.msra.mxu1 %v11643_v24  ;;  %v11727_v40 = vld [vmem:[%s17212_s6 + $0x1a8] ss:$16 sps:$4 sm:$0xff]   ;;  %v11732_v24 = vld [vmem:[%s17212_s6 + $0x1c4] ss:$16 sps:$4 sm:$0xff]  }
 0x127   :  { %1954 = vmatprep.subr.bf16.mxu0 %v11648_v42  ;;  %2036 = vmatprep.subr.bf16.mxu1 %v11651_v43  ;;  %v11730_v42 = vld [vmem:[%s17212_s6 + $0x1c0] ss:$16 sps:$4 sm:$0xff]   ;;  %v11733_v43 = vld [vmem:[%s17212_s6 + $0x1c8] ss:$16 sps:$4 sm:$0xff]  }
 0x129   :  { %1066 = vmatmul.mubr.bf16.vlgmr.msra.gmra.mrb[4].mxu0 %v200_v46  ;;  %1148 = vmatmul.mubr.bf16.vlgmr.msra.gmra.mrb[4].mxu1 %v200_v46  ;;  %v11736_v46 = vld [vmem:[%s17212_s6 + $0x1e0] ss:$16 sps:$4 sm:$0xff]  }
 0x12a   :  { %1955 = vmatpush1.bf16.msra.mxu0 %v11646_v44  ;;  %2037 = vmatpush1.bf16.msra.mxu1 %v11649_v45  ;;  %v11738_v44 = vld [vmem:[%s17212_s6 + $0x1e4] ss:$16 sps:$4 sm:$0xff]   ;;  %v11741_v45 = vld [vmem:[%s17212_s6 + $0x1ec] ss:$16 sps:$4 sm:$0xff]  }
 0x12b   :  { %1956 = vmatprep.subr.bf16.mxu0 %v11654_v47  ;;  %2038 = vmatprep.subr.bf16.mxu1 %v11657_v48  ;;  %v11739_v47 = vld [vmem:[%s17212_s6 + $0x1e8] ss:$16 sps:$4 sm:$0xff]   ;;  %v11744_v48 = vld [vmem:[%s17212_s6 + $0x204] ss:$16 sps:$4 sm:$0xff]  }
 0x12e   :  { %1957 = vmatpush1.bf16.msra.mxu0 %v11652_v49  ;;  %2039 = vmatpush1.bf16.msra.mxu1 %v11655_v50  ;;  %v11747_v49 = vld [vmem:[%s17212_s6 + $0x20c] ss:$16 sps:$4 sm:$0xff]   ;;  %v13976_v50 = vld [vmem:[%s17215_s5] sm:$0xf] }
 0x12f   :  { %1958 = vmatprep.subr.bf16.mxu0 %v11660_v51  ;;  %2040 = vmatprep.subr.bf16.mxu1 %v11663_v52  ;;  %v335_v51 = vrot.slane %v13976_v50, %v13562_v12  ;;  %v339_v52 = vrot.slane %v13976_v50, %v13570_v14 }
 0x132   :  { %1959 = vmatpush1.bf16.msra.mxu0 %v11658_v53  ;;  %2041 = vmatpush1.bf16.msra.mxu1 %v11661_v54  ;;  %v347_v53 = vrot.slane %v13976_v50, %v13573_v15 }
 0x133   :  { %1960 = vmatprep.subr.bf16.mxu0 %v11666_v55  ;;  %2042 = vmatprep.subr.bf16.mxu1 %v11669_v56 }
 0x136   :  { %1961 = vmatpush1.bf16.msra.mxu0 %v11664_v57  ;;  %2043 = vmatpush1.bf16.msra.mxu1 %v11667_v58 }
 0x137   :  { %1962 = vmatprep.subr.bf16.mxu0 %v11672_v59  ;;  %2044 = vmatprep.subr.bf16.mxu1 %v11675_v60 }
 0x13a   :  { %1963 = vmatpush1.bf16.msra.mxu0 %v11670_v61  ;;  %2045 = vmatpush1.bf16.msra.mxu1 %v11673_v62 }
 0x13b   :  { %1964 = vmatprep.subr.bf16.mxu0 %v11678_v63  ;;  %2046 = vmatprep.subr.bf16.mxu1 %v11681_v0 }
 0x13e   :  { %1965 = vmatpush1.bf16.msra.mxu0 %v11676_v2  ;;  %2047 = vmatpush1.bf16.msra.mxu1 %v11679_v3 }
 0x13f   :  { %1966 = vmatprep.subr.bf16.mxu0 %v11684_v4  ;;  %2048 = vmatprep.subr.bf16.mxu1 %v11687_v5  ;;  %v11742_v4 = vld [vmem:[%s17212_s6 + $0x200] ss:$16 sps:$4 sm:$0xff]   ;;  %v11745_v5 = vld [vmem:[%s17212_s6 + $0x208] ss:$16 sps:$4 sm:$0xff]  }
 0x142   :  { %1967 = vmatpush1.bf16.msra.mxu0 %v11682_v6  ;;  %2049 = vmatpush1.bf16.msra.mxu1 %v11685_v7 }
 0x143   :  { %1968 = vmatprep.subr.bf16.mxu0 %v11690_v8  ;;  %2050 = vmatprep.subr.bf16.mxu1 %v11693_v9  ;;  %v11750_v9 = vld [vmem:[%s17212_s6 + $0x224] ss:$16 sps:$4 sm:$0xff]  }
 0x146   :  { %1969 = vmatpush1.bf16.msra.mxu0 %v11688_v10  ;;  %2051 = vmatpush1.bf16.msra.mxu1 %v11691_v16  ;;  %v11753_v10 = vld [vmem:[%s17212_s6 + $0x22c] ss:$16 sps:$4 sm:$0xff]  }
 0x147   :  { %1970 = vmatprep.subr.bf16.mxu0 %v11696_v17  ;;  %2052 = vmatprep.subr.bf16.mxu1 %v11699_v18  ;;  %v11748_v17 = vld [vmem:[%s17212_s6 + $0x220] ss:$16 sps:$4 sm:$0xff]   ;;  %v11751_v18 = vld [vmem:[%s17212_s6 + $0x228] ss:$16 sps:$4 sm:$0xff]  }
 0x14a   :  { %1971 = vmatpush1.bf16.msra.mxu0 %v11694_v19  ;;  %2053 = vmatpush1.bf16.msra.mxu1 %v11697_v20  ;;  %v11756_v19 = vld [vmem:[%s17212_s6 + $0x244] ss:$16 sps:$4 sm:$0xff]   ;;  %v11759_v20 = vld [vmem:[%s17212_s6 + $0x24c] ss:$16 sps:$4 sm:$0xff]  }
 0x14b   :  { %1972 = vmatprep.subr.bf16.mxu0 %v11702_v21  ;;  %2054 = vmatprep.subr.bf16.mxu1 %v11705_v22  ;;  %v11754_v21 = vld [vmem:[%s17212_s6 + $0x240] ss:$16 sps:$4 sm:$0xff]   ;;  %v11757_v22 = vld [vmem:[%s17212_s6 + $0x248] ss:$16 sps:$4 sm:$0xff]  }
 0x14e   :  { %1973 = vmatpush1.bf16.msra.mxu0 %v11700_v23  ;;  %2055 = vmatpush1.bf16.msra.mxu1 %v11703_v25  ;;  %v11762_v23 = vld [vmem:[%s17212_s6 + $0x264] ss:$16 sps:$4 sm:$0xff]   ;;  %v11765_v25 = vld [vmem:[%s17212_s6 + $0x26c] ss:$16 sps:$4 sm:$0xff]  }
 0x14f   :  { %1974 = vmatprep.subr.bf16.mxu0 %v11708_v26  ;;  %2056 = vmatprep.subr.bf16.mxu1 %v11711_v27  ;;  %v11760_v26 = vld [vmem:[%s17212_s6 + $0x260] ss:$16 sps:$4 sm:$0xff]   ;;  %v11763_v27 = vld [vmem:[%s17212_s6 + $0x268] ss:$16 sps:$4 sm:$0xff]  }
 0x152   :  { %1975 = vmatpush1.bf16.msra.mxu0 %v11706_v28  ;;  %2057 = vmatpush1.bf16.msra.mxu1 %v11709_v30  ;;  %v11768_v28 = vld [vmem:[%s17212_s6 + $0x284] ss:$16 sps:$4 sm:$0xff]   ;;  %v11771_v30 = vld [vmem:[%s17212_s6 + $0x28c] ss:$16 sps:$4 sm:$0xff]  }
 0x153   :  { %1976 = vmatprep.subr.bf16.mxu0 %v11714_v31  ;;  %2058 = vmatprep.subr.bf16.mxu1 %v11717_v32  ;;  %v11766_v31 = vld [vmem:[%s17212_s6 + $0x280] ss:$16 sps:$4 sm:$0xff]   ;;  %v11769_v32 = vld [vmem:[%s17212_s6 + $0x288] ss:$16 sps:$4 sm:$0xff]  }
 0x156   :  { %1977 = vmatpush1.bf16.msra.mxu0 %v11712_v33  ;;  %2059 = vmatpush1.bf16.msra.mxu1 %v11715_v11  ;;  %v11774_v33 = vld [vmem:[%s17212_s6 + $0x2a4] ss:$16 sps:$4 sm:$0xff]   ;;  %v11777_v11 = vld [vmem:[%s17212_s6 + $0x2ac] ss:$16 sps:$4 sm:$0xff]  }
 0x157   :  { %1978 = vmatprep.subr.bf16.mxu0 %v11720_v34  ;;  %2060 = vmatprep.subr.bf16.mxu1 %v11723_v35  ;;  %v11772_v34 = vld [vmem:[%s17212_s6 + $0x2a0] ss:$16 sps:$4 sm:$0xff]   ;;  %v11775_v35 = vld [vmem:[%s17212_s6 + $0x2a8] ss:$16 sps:$4 sm:$0xff]  }
 0x15a   :  { %1979 = vmatpush1.bf16.msra.mxu0 %v11718_v36  ;;  %2061 = vmatpush1.bf16.msra.mxu1 %v11721_v13  ;;  %v11780_v36 = vld [vmem:[%s17212_s6 + $0x2c4] ss:$16 sps:$4 sm:$0xff]   ;;  %v11783_v13 = vld [vmem:[%s17212_s6 + $0x2cc] ss:$16 sps:$4 sm:$0xff]  }
 0x15b   :  { %1980 = vmatprep.subr.bf16.mxu0 %v11726_v37  ;;  %2062 = vmatprep.subr.bf16.mxu1 %v11729_v38  ;;  %v11778_v37 = vld [vmem:[%s17212_s6 + $0x2c0] ss:$16 sps:$4 sm:$0xff]   ;;  %v11781_v38 = vld [vmem:[%s17212_s6 + $0x2c8] ss:$16 sps:$4 sm:$0xff]  }
 0x15e   :  { %1981 = vmatpush1.bf16.msra.mxu0 %v11724_v39  ;;  %2063 = vmatpush1.bf16.msra.mxu1 %v11727_v40  ;;  %v11786_v39 = vld [vmem:[%s17212_s6 + $0x2e4] ss:$16 sps:$4 sm:$0xff]   ;;  %v11789_v40 = vld [vmem:[%s17212_s6 + $0x2ec] ss:$16 sps:$4 sm:$0xff]  }
 0x15f   :  { %1982 = vmatprep.subr.bf16.mxu0 %v11732_v24  ;;  %2064 = vmatprep.subr.bf16.mxu1 %v11735_v41  ;;  %v11784_v24 = vld [vmem:[%s17212_s6 + $0x2e0] ss:$16 sps:$4 sm:$0xff]   ;;  %v11787_v41 = vld [vmem:[%s17212_s6 + $0x2e8] ss:$16 sps:$4 sm:$0xff]  }
 0x162   :  { %1983 = vmatpush1.bf16.msra.mxu0 %v11730_v42  ;;  %2065 = vmatpush1.bf16.msra.mxu1 %v11733_v43  ;;  %v11792_v42 = vld [vmem:[%s17212_s6 + $0x304] ss:$16 sps:$4 sm:$0xff]   ;;  %v11795_v43 = vld [vmem:[%s17212_s6 + $0x30c] ss:$16 sps:$4 sm:$0xff]  }
 0x163   :  { %1984 = vmatprep.subr.bf16.mxu0 %v11738_v44  ;;  %2066 = vmatprep.subr.bf16.mxu1 %v11741_v45  ;;  %v11790_v44 = vld [vmem:[%s17212_s6 + $0x300] ss:$16 sps:$4 sm:$0xff]   ;;  %v11793_v45 = vld [vmem:[%s17212_s6 + $0x308] ss:$16 sps:$4 sm:$0xff]  }
 0x166   :  { %1985 = vmatpush1.bf16.msra.mxu0 %v11736_v46  ;;  %2067 = vmatpush1.bf16.msra.mxu1 %v11739_v47  ;;  %v11798_v46 = vld [vmem:[%s17212_s6 + $0x324] ss:$16 sps:$4 sm:$0xff]   ;;  %v11801_v47 = vld [vmem:[%s17212_s6 + $0x32c] ss:$16 sps:$4 sm:$0xff]  }
 0x167   :  { %1995 = vmatprep.subr.bf16.mxu0 %v11744_v48  ;;  %2077 = vmatprep.subr.bf16.mxu1 %v11747_v49  ;;  %v11796_v48 = vld [vmem:[%s17212_s6 + $0x320] ss:$16 sps:$4 sm:$0xff]   ;;  %v11799_v49 = vld [vmem:[%s17212_s6 + $0x328] ss:$16 sps:$4 sm:$0xff]  }
 0x1fc   :  { %v1067_v54 = vpop.f32.mrb[4].mxu0  ;;  %v13984_v55 = vpop.f32.mrb[4].mxu1 }
 0x1fd   :  { %v11338_v56 = vadd.f32 %v1067_v54, %v335_v51  ;;  %v1069_v57 = vpop.f32.mrb[5].mxu0  ;;  %v1151_v58 = vpop.f32.mrb[5].mxu1  ;;  %v11804_v51 = vld [vmem:[%s17212_s6 + $0x344] ss:$16 sps:$4 sm:$0xff]   ;;  %v11805_v54 = vld [vmem:[%s17212_s6 + $0x348] ss:$16 sps:$4 sm:$0xff]  }
 0x1fe   :  { %v11339_v59 = vadd.f32 %v1069_v57, %v339_v52  ;;  %v11341_v60 = vadd.f32 %v1151_v58, %v347_v53  ;;  %v1071_v61 = vpop.f32.mrb[6].mxu0  ;;  %v1153_v62 = vpop.f32.mrb[6].mxu1  ;;  %v11807_v52 = vld [vmem:[%s17212_s6 + $0x34c] ss:$16 sps:$4 sm:$0xff]   ;;  %v11802_v53 = vld [vmem:[%s17212_s6 + $0x340] ss:$16 sps:$4 sm:$0xff]  }
 0x1ff   :  { %v1156_v63 = vmax.f32 %v11338_v56, 0.0  ;;  %v1072_v0 = vpop.f32.mrb[7].mxu0  ;;  %v1154_v2 = vpop.f32.mrb[7].mxu1  ;;  %v11810_v56 = vld [vmem:[%s17212_s6 + $0x364] ss:$16 sps:$4 sm:$0xff]  }
 0x200   :  { %v1157_v3 = vmax.f32 %v11339_v59, 0.0  ;;  %v1159_v6 = vmax.f32 %v11341_v60, 0.0  ;;  %v11813_v57 = vld [vmem:[%s17212_s6 + $0x36c] ss:$16 sps:$4 sm:$0xff]   ;;  %v11808_v58 = vld [vmem:[%s17212_s6 + $0x360] ss:$16 sps:$4 sm:$0xff]  }
 0x201   :  { %v1160_v8 = vpack.c.bf16 %v1156_v63, %v1156_v63  ;;  %v11811_v59 = vld [vmem:[%s17212_s6 + $0x368] ss:$16 sps:$4 sm:$0xff]   ;;  %v11816_v60 = vld [vmem:[%s17212_s6 + $0x384] ss:$16 sps:$4 sm:$0xff]   ;;  %v11819_v61 = vld [vmem:[%s17212_s6 + $0x38c] ss:$16 sps:$4 sm:$0xff]  }
 0x202   :  { %v1161_v7 = vpack.c.bf16 %v1157_v3, %v1157_v3  ;;  %v1163_v16 = vpack.c.bf16 %v1159_v6, %v1159_v6  ;;  %v11814_v62 = vld [vmem:[%s17212_s6 + $0x380] ss:$16 sps:$4 sm:$0xff]   ;;  %v11817_v63 = vld [vmem:[%s17212_s6 + $0x388] ss:$16 sps:$4 sm:$0xff]   ;;  %v11822_v0 = vld [vmem:[%s17212_s6 + $0x3a4] ss:$16 sps:$4 sm:$0xff]  }
 0x203   :  { %v11825_v2 = vld [vmem:[%s17212_s6 + $0x3ac] ss:$16 sps:$4 sm:$0xff]   ;;  %v11820_v3 = vld [vmem:[%s17212_s6 + $0x3a0] ss:$16 sps:$4 sm:$0xff]   ;;  %v11828_v6 = vld [vmem:[%s17212_s6 + $0x3c4] ss:$16 sps:$4 sm:$0xff]  }
 0x204   :  { %1986 = vmatprep.mubr.bf16.mxu0 %v1161_v7  ;;  %2068 = vmatprep.mubr.bf16.mxu1 %v1161_v7  ;;  %v11831_v7 = vld [vmem:[%s17212_s6 + $0x3cc] ss:$16 sps:$4 sm:$0xff]  }
 0x205   :  { %1987 = vmatmul.mubr.bf16.vlgmr.msra.gmra.mrb[8].mxu0 %v1160_v8  ;;  %2069 = vmatmul.mubr.bf16.vlgmr.msra.gmra.mrb[8].mxu1 %v1160_v8  ;;  %v11826_v8 = vld [vmem:[%s17212_s6 + $0x3c0] ss:$16 sps:$4 sm:$0xff]  }
 0x206   :  { %1996 = vmatpush1.bf16.msra.mxu0 %v11742_v4  ;;  %2078 = vmatpush1.bf16.msra.mxu1 %v11745_v5  ;;  %v11823_v4 = vld [vmem:[%s17212_s6 + $0x3a8] ss:$16 sps:$4 sm:$0xff]   ;;  %v343_v5 = vrot.slane %v13976_v50, %v13734_v29 }
 0x207   :  { %2027 = vmatprep.mubr.bf16.mxu0 %v1163_v16  ;;  %2109 = vmatprep.mubr.bf16.mxu1 %v1163_v16  ;;  %v11829_v50 = vld [vmem:[%s17212_s6 + $0x3c8] ss:$16 sps:$4 sm:$0xff]   ;;  %v11837_v16 = vld [vmem:[%s17212_s6 + $0x3ec] ss:$16 sps:$4 sm:$0xff]  }
 0x208   :  { %1997 = vmatprep.subr.bf16.mxu0 %v11750_v9  ;;  %2079 = vmatprep.subr.bf16.mxu1 %v11753_v10  ;;  %v11340_v9 = vadd.f32 %v13984_v55, %v343_v5  ;;  %v11834_v10 = vld [vmem:[%s17212_s6 + $0x3e4] ss:$16 sps:$4 sm:$0xff]   ;;  %v11835_v55 = vld [vmem:[%s17212_s6 + $0x3e8] ss:$16 sps:$4 sm:$0xff]  }
 0x209   :  { %v11907_v5 = vld [vmem:[%s17214_s8 + $0x168] ss:$16 sps:$4 sm:$0xff]  }
 0x20a   :  { %1998 = vmatpush1.bf16.msra.mxu0 %v11748_v17  ;;  %2080 = vmatpush1.bf16.msra.mxu1 %v11751_v18  ;;  %v11832_v17 = vld [vmem:[%s17212_s6 + $0x3e0] ss:$16 sps:$4 sm:$0xff]   ;;  %v1158_v18 = vmax.f32 %v11340_v9, 0.0  ;;  %v11918_v9 = vld [vmem:[%s17214_s8 + $0x1a4] ss:$16 sps:$4 sm:$0xff]  }
 0x20b   :  { %1999 = vmatprep.subr.bf16.mxu0 %v11756_v19  ;;  %2081 = vmatprep.subr.bf16.mxu1 %v11759_v20  ;;  %v11840_v19 = vld [vmem:[%s17214_s8 + $0x4] ss:$16 sps:$4 sm:$0xff]   ;;  %v11843_v20 = vld [vmem:[%s17214_s8 + $0xc] ss:$16 sps:$4 sm:$0xff]  }
 0x20e   :  { %2000 = vmatpush1.bf16.msra.mxu0 %v11754_v21  ;;  %2082 = vmatpush1.bf16.msra.mxu1 %v11757_v22  ;;  %v11838_v21 = vld [vmem:[%s17214_s8] ss:$16 sps:$4 sm:$0xff]   ;;  %v11841_v22 = vld [vmem:[%s17214_s8 + $0x8] ss:$16 sps:$4 sm:$0xff]  }
 0x20f   :  { %2001 = vmatprep.subr.bf16.mxu0 %v11762_v23  ;;  %2083 = vmatprep.subr.bf16.mxu1 %v11765_v25  ;;  %v1162_v23 = vpack.c.bf16 %v1158_v18, %v1158_v18  ;;  %v11846_v25 = vld [vmem:[%s17214_s8 + $0x24] ss:$16 sps:$4 sm:$0xff]   ;;  %v11927_v18 = vld [vmem:[%s17214_s8 + $0x1cc] ss:$16 sps:$4 sm:$0xff]  }
 0x212   :  { %2002 = vmatpush1.bf16.msra.mxu0 %v11760_v26  ;;  %2084 = vmatpush1.bf16.msra.mxu1 %v11763_v27  ;;  %v11849_v26 = vld [vmem:[%s17214_s8 + $0x2c] ss:$16 sps:$4 sm:$0xff]   ;;  %v11844_v27 = vld [vmem:[%s17214_s8 + $0x20] ss:$16 sps:$4 sm:$0xff]  }
 0x213   :  { %2003 = vmatprep.subr.bf16.mxu0 %v11768_v28  ;;  %2085 = vmatprep.subr.bf16.mxu1 %v11771_v30  ;;  %v11847_v28 = vld [vmem:[%s17214_s8 + $0x28] ss:$16 sps:$4 sm:$0xff]   ;;  %v11852_v30 = vld [vmem:[%s17214_s8 + $0x44] ss:$16 sps:$4 sm:$0xff]  }
 0x216   :  { %2004 = vmatpush1.bf16.msra.mxu0 %v11766_v31  ;;  %2086 = vmatpush1.bf16.msra.mxu1 %v11769_v32  ;;  %v11855_v31 = vld [vmem:[%s17214_s8 + $0x4c] ss:$16 sps:$4 sm:$0xff]   ;;  %v11850_v32 = vld [vmem:[%s17214_s8 + $0x40] ss:$16 sps:$4 sm:$0xff]  }
 0x217   :  { %2005 = vmatprep.subr.bf16.mxu0 %v11774_v33  ;;  %2087 = vmatprep.subr.bf16.mxu1 %v11777_v11  ;;  %v11853_v33 = vld [vmem:[%s17214_s8 + $0x48] ss:$16 sps:$4 sm:$0xff]   ;;  %v11858_v11 = vld [vmem:[%s17214_s8 + $0x64] ss:$16 sps:$4 sm:$0xff]  }
 0x21a   :  { %2006 = vmatpush1.bf16.msra.mxu0 %v11772_v34  ;;  %2088 = vmatpush1.bf16.msra.mxu1 %v11775_v35  ;;  %v11861_v34 = vld [vmem:[%s17214_s8 + $0x6c] ss:$16 sps:$4 sm:$0xff]   ;;  %v11856_v35 = vld [vmem:[%s17214_s8 + $0x60] ss:$16 sps:$4 sm:$0xff]  }
 0x21b   :  { %2007 = vmatprep.subr.bf16.mxu0 %v11780_v36  ;;  %2089 = vmatprep.subr.bf16.mxu1 %v11783_v13  ;;  %v11859_v36 = vld [vmem:[%s17214_s8 + $0x68] ss:$16 sps:$4 sm:$0xff]   ;;  %v11864_v13 = vld [vmem:[%s17214_s8 + $0x84] ss:$16 sps:$4 sm:$0xff]  }
 0x21e   :  { %2008 = vmatpush1.bf16.msra.mxu0 %v11778_v37  ;;  %2090 = vmatpush1.bf16.msra.mxu1 %v11781_v38  ;;  %v11867_v37 = vld [vmem:[%s17214_s8 + $0x8c] ss:$16 sps:$4 sm:$0xff]   ;;  %v11862_v38 = vld [vmem:[%s17214_s8 + $0x80] ss:$16 sps:$4 sm:$0xff]  }
 0x21f   :  { %2009 = vmatprep.subr.bf16.mxu0 %v11786_v39  ;;  %2091 = vmatprep.subr.bf16.mxu1 %v11789_v40  ;;  %v11865_v39 = vld [vmem:[%s17214_s8 + $0x88] ss:$16 sps:$4 sm:$0xff]   ;;  %v11870_v40 = vld [vmem:[%s17214_s8 + $0xa4] ss:$16 sps:$4 sm:$0xff]  }
 0x222   :  { %2010 = vmatpush1.bf16.msra.mxu0 %v11784_v24  ;;  %2092 = vmatpush1.bf16.msra.mxu1 %v11787_v41  ;;  %v11873_v24 = vld [vmem:[%s17214_s8 + $0xac] ss:$16 sps:$4 sm:$0xff]   ;;  %v11868_v41 = vld [vmem:[%s17214_s8 + $0xa0] ss:$16 sps:$4 sm:$0xff]  }
 0x223   :  { %2011 = vmatprep.subr.bf16.mxu0 %v11792_v42  ;;  %2093 = vmatprep.subr.bf16.mxu1 %v11795_v43  ;;  %v11871_v42 = vld [vmem:[%s17214_s8 + $0xa8] ss:$16 sps:$4 sm:$0xff]   ;;  %v11876_v43 = vld [vmem:[%s17214_s8 + $0xc4] ss:$16 sps:$4 sm:$0xff]  }
 0x226   :  { %2012 = vmatpush1.bf16.msra.mxu0 %v11790_v44  ;;  %2094 = vmatpush1.bf16.msra.mxu1 %v11793_v45  ;;  %v11879_v44 = vld [vmem:[%s17214_s8 + $0xcc] ss:$16 sps:$4 sm:$0xff]   ;;  %v11874_v45 = vld [vmem:[%s17214_s8 + $0xc0] ss:$16 sps:$4 sm:$0xff]  }
 0x227   :  { %2013 = vmatprep.subr.bf16.mxu0 %v11798_v46  ;;  %2095 = vmatprep.subr.bf16.mxu1 %v11801_v47  ;;  %v11877_v46 = vld [vmem:[%s17214_s8 + $0xc8] ss:$16 sps:$4 sm:$0xff]   ;;  %v11882_v47 = vld [vmem:[%s17214_s8 + $0xe4] ss:$16 sps:$4 sm:$0xff]  }
 0x22a   :  { %2014 = vmatpush1.bf16.msra.mxu0 %v11796_v48  ;;  %2096 = vmatpush1.bf16.msra.mxu1 %v11799_v49  ;;  %v11885_v48 = vld [vmem:[%s17214_s8 + $0xec] ss:$16 sps:$4 sm:$0xff]   ;;  %v11880_v49 = vld [vmem:[%s17214_s8 + $0xe0] ss:$16 sps:$4 sm:$0xff]  }
 0x22b   :  { %2015 = vmatprep.subr.bf16.mxu0 %v11804_v51  ;;  %2097 = vmatprep.subr.bf16.mxu1 %v11807_v52  ;;  %v11883_v51 = vld [vmem:[%s17214_s8 + $0xe8] ss:$16 sps:$4 sm:$0xff]   ;;  %v11888_v52 = vld [vmem:[%s17214_s8 + $0x104] ss:$16 sps:$4 sm:$0xff]  }
 0x22e   :  { %2016 = vmatpush1.bf16.msra.mxu0 %v11802_v53  ;;  %2098 = vmatpush1.bf16.msra.mxu1 %v11805_v54  ;;  %v11891_v53 = vld [vmem:[%s17214_s8 + $0x10c] ss:$16 sps:$4 sm:$0xff]   ;;  %v11886_v54 = vld [vmem:[%s17214_s8 + $0x100] ss:$16 sps:$4 sm:$0xff]  }
 0x22f   :  { %2017 = vmatprep.subr.bf16.mxu0 %v11810_v56  ;;  %2099 = vmatprep.subr.bf16.mxu1 %v11813_v57  ;;  %v11889_v56 = vld [vmem:[%s17214_s8 + $0x108] ss:$16 sps:$4 sm:$0xff]   ;;  %v11894_v57 = vld [vmem:[%s17214_s8 + $0x124] ss:$16 sps:$4 sm:$0xff]  }
 0x232   :  { %2018 = vmatpush1.bf16.msra.mxu0 %v11808_v58  ;;  %2100 = vmatpush1.bf16.msra.mxu1 %v11811_v59  ;;  %v11897_v58 = vld [vmem:[%s17214_s8 + $0x12c] ss:$16 sps:$4 sm:$0xff]   ;;  %v11892_v59 = vld [vmem:[%s17214_s8 + $0x120] ss:$16 sps:$4 sm:$0xff]  }
 0x233   :  { %2019 = vmatprep.subr.bf16.mxu0 %v11816_v60  ;;  %2101 = vmatprep.subr.bf16.mxu1 %v11819_v61  ;;  %v11895_v60 = vld [vmem:[%s17214_s8 + $0x128] ss:$16 sps:$4 sm:$0xff]   ;;  %v11900_v61 = vld [vmem:[%s17214_s8 + $0x144] ss:$16 sps:$4 sm:$0xff]  }
 0x236   :  { %2020 = vmatpush1.bf16.msra.mxu0 %v11814_v62  ;;  %2102 = vmatpush1.bf16.msra.mxu1 %v11817_v63  ;;  %v11903_v62 = vld [vmem:[%s17214_s8 + $0x14c] ss:$16 sps:$4 sm:$0xff]   ;;  %v11898_v63 = vld [vmem:[%s17214_s8 + $0x140] ss:$16 sps:$4 sm:$0xff]  }
 0x237   :  { %2021 = vmatprep.subr.bf16.mxu0 %v11822_v0  ;;  %2103 = vmatprep.subr.bf16.mxu1 %v11825_v2  ;;  %v11901_v0 = vld [vmem:[%s17214_s8 + $0x148] ss:$16 sps:$4 sm:$0xff]   ;;  %v11906_v2 = vld [vmem:[%s17214_s8 + $0x164] ss:$16 sps:$4 sm:$0xff]  }
 0x23a   :  { %2022 = vmatpush1.bf16.msra.mxu0 %v11820_v3  ;;  %2104 = vmatpush1.bf16.msra.mxu1 %v11823_v4  ;;  %v11909_v3 = vld [vmem:[%s17214_s8 + $0x16c] ss:$16 sps:$4 sm:$0xff]   ;;  %v11904_v4 = vld [vmem:[%s17214_s8 + $0x160] ss:$16 sps:$4 sm:$0xff]  }
 0x23b   :  { %2023 = vmatprep.subr.bf16.mxu0 %v11828_v6  ;;  %2105 = vmatprep.subr.bf16.mxu1 %v11831_v7  ;;  %v11912_v6 = vld [vmem:[%s17214_s8 + $0x184] ss:$16 sps:$4 sm:$0xff]   ;;  %v11915_v7 = vld [vmem:[%s17214_s8 + $0x18c] ss:$16 sps:$4 sm:$0xff]  }
 0x23e   :  { %2024 = vmatpush1.bf16.msra.mxu0 %v11826_v8  ;;  %2106 = vmatpush1.bf16.msra.mxu1 %v11829_v50  ;;  %v11910_v8 = vld [vmem:[%s17214_s8 + $0x180] ss:$16 sps:$4 sm:$0xff]   ;;  %v11913_v50 = vld [vmem:[%s17214_s8 + $0x188] ss:$16 sps:$4 sm:$0xff]  }
 0x23f   :  { %2025 = vmatprep.subr.bf16.mxu0 %v11834_v10  ;;  %2107 = vmatprep.subr.bf16.mxu1 %v11837_v16  ;;  %v11921_v10 = vld [vmem:[%s17214_s8 + $0x1ac] ss:$16 sps:$4 sm:$0xff]   ;;  %v11916_v16 = vld [vmem:[%s17214_s8 + $0x1a0] ss:$16 sps:$4 sm:$0xff]  }
 0x242   :  { %2026 = vmatpush1.bf16.msra.mxu0 %v11832_v17  ;;  %2108 = vmatpush1.bf16.msra.mxu1 %v11835_v55  ;;  %v11919_v17 = vld [vmem:[%s17214_s8 + $0x1a8] ss:$16 sps:$4 sm:$0xff]   ;;  %v11924_v55 = vld [vmem:[%s17214_s8 + $0x1c4] ss:$16 sps:$4 sm:$0xff]  }
 0x243   :  { %2916 = vmatprep.subr.bf16.mxu0 %v11840_v19  ;;  %2998 = vmatprep.subr.bf16.mxu1 %v11843_v20  ;;  %v11922_v19 = vld [vmem:[%s17214_s8 + $0x1c0] ss:$16 sps:$4 sm:$0xff]   ;;  %v11925_v20 = vld [vmem:[%s17214_s8 + $0x1c8] ss:$16 sps:$4 sm:$0xff]  }
 0x245   :  { %2028 = vmatmul.mubr.bf16.vlgmr.msra.gmra.mrb[8].mxu0 %v1162_v23  ;;  %2110 = vmatmul.mubr.bf16.vlgmr.msra.gmra.mrb[8].mxu1 %v1162_v23  ;;  %v11928_v23 = vld [vmem:[%s17214_s8 + $0x1e0] ss:$16 sps:$4 sm:$0xff]  }
 0x246   :  { %2917 = vmatpush1.bf16.msra.mxu0 %v11838_v21  ;;  %2999 = vmatpush1.bf16.msra.mxu1 %v11841_v22  ;;  %v11930_v21 = vld [vmem:[%s17214_s8 + $0x1e4] ss:$16 sps:$4 sm:$0xff]   ;;  %v11933_v22 = vld [vmem:[%s17214_s8 + $0x1ec] ss:$16 sps:$4 sm:$0xff]  }
 0x247   :  { %2918 = vmatprep.subr.bf16.mxu0 %v11846_v25  ;;  %3000 = vmatprep.subr.bf16.mxu1 %v11849_v26  ;;  %v11931_v25 = vld [vmem:[%s17214_s8 + $0x1e8] ss:$16 sps:$4 sm:$0xff]   ;;  %v11936_v26 = vld [vmem:[%s17214_s8 + $0x204] ss:$16 sps:$4 sm:$0xff]  }
 0x24a   :  { %2919 = vmatpush1.bf16.msra.mxu0 %v11844_v27  ;;  %3001 = vmatpush1.bf16.msra.mxu1 %v11847_v28  ;;  %v11939_v27 = vld [vmem:[%s17214_s8 + $0x20c] ss:$16 sps:$4 sm:$0xff]   ;;  %v14376_v28 = vld [vmem:[%s17217_s7] sm:$0xf] }
 0x24b   :  { %2920 = vmatprep.subr.bf16.mxu0 %v11852_v30  ;;  %3002 = vmatprep.subr.bf16.mxu1 %v11855_v31  ;;  %v1297_v30 = vrot.slane %v14376_v28, %v13562_v12  ;;  %v1301_v31 = vrot.slane %v14376_v28, %v13570_v14 }
 0x24e   :  { %2921 = vmatpush1.bf16.msra.mxu0 %v11850_v32  ;;  %3003 = vmatpush1.bf16.msra.mxu1 %v11853_v33  ;;  %v1309_v32 = vrot.slane %v14376_v28, %v13573_v15 }
 0x24f   :  { %2922 = vmatprep.subr.bf16.mxu0 %v11858_v11  ;;  %3004 = vmatprep.subr.bf16.mxu1 %v11861_v34 }
 0x252   :  { %2923 = vmatpush1.bf16.msra.mxu0 %v11856_v35  ;;  %3005 = vmatpush1.bf16.msra.mxu1 %v11859_v36 }
 0x253   :  { %2924 = vmatprep.subr.bf16.mxu0 %v11864_v13  ;;  %3006 = vmatprep.subr.bf16.mxu1 %v11867_v37 }
 0x256   :  { %2925 = vmatpush1.bf16.msra.mxu0 %v11862_v38  ;;  %3007 = vmatpush1.bf16.msra.mxu1 %v11865_v39 }
 0x257   :  { %2926 = vmatprep.subr.bf16.mxu0 %v11870_v40  ;;  %3008 = vmatprep.subr.bf16.mxu1 %v11873_v24 }
 0x25a   :  { %2927 = vmatpush1.bf16.msra.mxu0 %v11868_v41  ;;  %3009 = vmatpush1.bf16.msra.mxu1 %v11871_v42 }
 0x25b   :  { %2928 = vmatprep.subr.bf16.mxu0 %v11876_v43  ;;  %3010 = vmatprep.subr.bf16.mxu1 %v11879_v44  ;;  %v11934_v43 = vld [vmem:[%s17214_s8 + $0x200] ss:$16 sps:$4 sm:$0xff]   ;;  %v11937_v44 = vld [vmem:[%s17214_s8 + $0x208] ss:$16 sps:$4 sm:$0xff]  }
 0x25e   :  { %2929 = vmatpush1.bf16.msra.mxu0 %v11874_v45  ;;  %3011 = vmatpush1.bf16.msra.mxu1 %v11877_v46 }
 0x25f   :  { %2930 = vmatprep.subr.bf16.mxu0 %v11882_v47  ;;  %3012 = vmatprep.subr.bf16.mxu1 %v11885_v48  ;;  %v11942_v47 = vld [vmem:[%s17214_s8 + $0x224] ss:$16 sps:$4 sm:$0xff]   ;;  %v11945_v48 = vld [vmem:[%s17214_s8 + $0x22c] ss:$16 sps:$4 sm:$0xff]  }
 0x262   :  { %2931 = vmatpush1.bf16.msra.mxu0 %v11880_v49  ;;  %3013 = vmatpush1.bf16.msra.mxu1 %v11883_v51  ;;  %v11940_v51 = vld [vmem:[%s17214_s8 + $0x220] ss:$16 sps:$4 sm:$0xff]  }
 0x263   :  { %2932 = vmatprep.subr.bf16.mxu0 %v11888_v52  ;;  %3014 = vmatprep.subr.bf16.mxu1 %v11891_v53  ;;  %v11943_v52 = vld [vmem:[%s17214_s8 + $0x228] ss:$16 sps:$4 sm:$0xff]  }
 0x266   :  { %2933 = vmatpush1.bf16.msra.mxu0 %v11886_v54  ;;  %3015 = vmatpush1.bf16.msra.mxu1 %v11889_v56  ;;  %v11948_v54 = vld [vmem:[%s17214_s8 + $0x244] ss:$16 sps:$4 sm:$0xff]   ;;  %v11951_v56 = vld [vmem:[%s17214_s8 + $0x24c] ss:$16 sps:$4 sm:$0xff]  }
 0x267   :  { %2934 = vmatprep.subr.bf16.mxu0 %v11894_v57  ;;  %3016 = vmatprep.subr.bf16.mxu1 %v11897_v58  ;;  %v11946_v57 = vld [vmem:[%s17214_s8 + $0x240] ss:$16 sps:$4 sm:$0xff]   ;;  %v11949_v58 = vld [vmem:[%s17214_s8 + $0x248] ss:$16 sps:$4 sm:$0xff]  }
 0x26a   :  { %2935 = vmatpush1.bf16.msra.mxu0 %v11892_v59  ;;  %3017 = vmatpush1.bf16.msra.mxu1 %v11895_v60  ;;  %v11954_v59 = vld [vmem:[%s17214_s8 + $0x264] ss:$16 sps:$4 sm:$0xff]   ;;  %v11957_v60 = vld [vmem:[%s17214_s8 + $0x26c] ss:$16 sps:$4 sm:$0xff]  }
 0x26b   :  { %2936 = vmatprep.subr.bf16.mxu0 %v11900_v61  ;;  %3018 = vmatprep.subr.bf16.mxu1 %v11903_v62  ;;  %v11952_v61 = vld [vmem:[%s17214_s8 + $0x260] ss:$16 sps:$4 sm:$0xff]   ;;  %v11955_v62 = vld [vmem:[%s17214_s8 + $0x268] ss:$16 sps:$4 sm:$0xff]  }
 0x26e   :  { %2937 = vmatpush1.bf16.msra.mxu0 %v11898_v63  ;;  %3019 = vmatpush1.bf16.msra.mxu1 %v11901_v0  ;;  %v11960_v63 = vld [vmem:[%s17214_s8 + $0x284] ss:$16 sps:$4 sm:$0xff]   ;;  %v11963_v0 = vld [vmem:[%s17214_s8 + $0x28c] ss:$16 sps:$4 sm:$0xff]  }
 0x26f   :  { %2938 = vmatprep.subr.bf16.mxu0 %v11906_v2  ;;  %3020 = vmatprep.subr.bf16.mxu1 %v11909_v3  ;;  %v11958_v2 = vld [vmem:[%s17214_s8 + $0x280] ss:$16 sps:$4 sm:$0xff]   ;;  %v11961_v3 = vld [vmem:[%s17214_s8 + $0x288] ss:$16 sps:$4 sm:$0xff]  }
 0x272   :  { %2939 = vmatpush1.bf16.msra.mxu0 %v11904_v4  ;;  %3021 = vmatpush1.bf16.msra.mxu1 %v11907_v5  ;;  %v11966_v4 = vld [vmem:[%s17214_s8 + $0x2a4] ss:$16 sps:$4 sm:$0xff]   ;;  %v11969_v5 = vld [vmem:[%s17214_s8 + $0x2ac] ss:$16 sps:$4 sm:$0xff]  }
 0x273   :  { %2940 = vmatprep.subr.bf16.mxu0 %v11912_v6  ;;  %3022 = vmatprep.subr.bf16.mxu1 %v11915_v7  ;;  %v11964_v6 = vld [vmem:[%s17214_s8 + $0x2a0] ss:$16 sps:$4 sm:$0xff]   ;;  %v11967_v7 = vld [vmem:[%s17214_s8 + $0x2a8] ss:$16 sps:$4 sm:$0xff]  }
 0x276   :  { %2941 = vmatpush1.bf16.msra.mxu0 %v11910_v8  ;;  %3023 = vmatpush1.bf16.msra.mxu1 %v11913_v50  ;;  %v11972_v8 = vld [vmem:[%s17214_s8 + $0x2c4] ss:$16 sps:$4 sm:$0xff]   ;;  %v11975_v50 = vld [vmem:[%s17214_s8 + $0x2cc] ss:$16 sps:$4 sm:$0xff]  }
 0x277   :  { %2942 = vmatprep.subr.bf16.mxu0 %v11918_v9  ;;  %3024 = vmatprep.subr.bf16.mxu1 %v11921_v10  ;;  %v11970_v9 = vld [vmem:[%s17214_s8 + $0x2c0] ss:$16 sps:$4 sm:$0xff]   ;;  %v11973_v10 = vld [vmem:[%s17214_s8 + $0x2c8] ss:$16 sps:$4 sm:$0xff]  }
 0x27a   :  { %2943 = vmatpush1.bf16.msra.mxu0 %v11916_v16  ;;  %3025 = vmatpush1.bf16.msra.mxu1 %v11919_v17  ;;  %v11978_v16 = vld [vmem:[%s17214_s8 + $0x2e4] ss:$16 sps:$4 sm:$0xff]   ;;  %v11981_v17 = vld [vmem:[%s17214_s8 + $0x2ec] ss:$16 sps:$4 sm:$0xff]  }
 0x27b   :  { %2944 = vmatprep.subr.bf16.mxu0 %v11924_v55  ;;  %3026 = vmatprep.subr.bf16.mxu1 %v11927_v18  ;;  %v11976_v55 = vld [vmem:[%s17214_s8 + $0x2e0] ss:$16 sps:$4 sm:$0xff]   ;;  %v11979_v18 = vld [vmem:[%s17214_s8 + $0x2e8] ss:$16 sps:$4 sm:$0xff]  }
 0x27e   :  { %2945 = vmatpush1.bf16.msra.mxu0 %v11922_v19  ;;  %3027 = vmatpush1.bf16.msra.mxu1 %v11925_v20  ;;  %v11984_v19 = vld [vmem:[%s17214_s8 + $0x304] ss:$16 sps:$4 sm:$0xff]   ;;  %v11987_v20 = vld [vmem:[%s17214_s8 + $0x30c] ss:$16 sps:$4 sm:$0xff]  }
 0x27f   :  { %2946 = vmatprep.subr.bf16.mxu0 %v11930_v21  ;;  %3028 = vmatprep.subr.bf16.mxu1 %v11933_v22  ;;  %v11982_v21 = vld [vmem:[%s17214_s8 + $0x300] ss:$16 sps:$4 sm:$0xff]   ;;  %v11985_v22 = vld [vmem:[%s17214_s8 + $0x308] ss:$16 sps:$4 sm:$0xff]  }
 0x282   :  { %2947 = vmatpush1.bf16.msra.mxu0 %v11928_v23  ;;  %3029 = vmatpush1.bf16.msra.mxu1 %v11931_v25  ;;  %v11990_v23 = vld [vmem:[%s17214_s8 + $0x324] ss:$16 sps:$4 sm:$0xff]   ;;  %v11993_v25 = vld [vmem:[%s17214_s8 + $0x32c] ss:$16 sps:$4 sm:$0xff]  }
 0x283   :  { %2957 = vmatprep.subr.bf16.mxu0 %v11936_v26  ;;  %3039 = vmatprep.subr.bf16.mxu1 %v11939_v27  ;;  %v11988_v26 = vld [vmem:[%s17214_s8 + $0x320] ss:$16 sps:$4 sm:$0xff]   ;;  %v11991_v27 = vld [vmem:[%s17214_s8 + $0x328] ss:$16 sps:$4 sm:$0xff]  }
 0x318   :  { %v2029_v33 = vpop.f32.mrb[8].mxu0  ;;  %v14384_v11 = vpop.f32.mrb[8].mxu1 }
 0x319   :  { %v11342_v34 = vadd.f32 %v2029_v33, %v1297_v30  ;;  %v2031_v35 = vpop.f32.mrb[9].mxu0  ;;  %v2113_v36 = vpop.f32.mrb[9].mxu1  ;;  %v11996_v30 = vld [vmem:[%s17214_s8 + $0x344] ss:$16 sps:$4 sm:$0xff]   ;;  %v11997_v33 = vld [vmem:[%s17214_s8 + $0x348] ss:$16 sps:$4 sm:$0xff]  }
 0x31a   :  { %v11343_v13 = vadd.f32 %v2031_v35, %v1301_v31  ;;  %v11345_v37 = vadd.f32 %v2113_v36, %v1309_v32  ;;  %v2033_v38 = vpop.f32.mrb[10].mxu0  ;;  %v2115_v39 = vpop.f32.mrb[10].mxu1  ;;  %v11999_v31 = vld [vmem:[%s17214_s8 + $0x34c] ss:$16 sps:$4 sm:$0xff]   ;;  %v11994_v32 = vld [vmem:[%s17214_s8 + $0x340] ss:$16 sps:$4 sm:$0xff]  }
 0x31b   :  { %v2118_v40 = vmax.f32 %v11342_v34, 0.0  ;;  %v2034_v24 = vpop.f32.mrb[11].mxu0  ;;  %v2116_v41 = vpop.f32.mrb[11].mxu1  ;;  %v12002_v34 = vld [vmem:[%s17214_s8 + $0x364] ss:$16 sps:$4 sm:$0xff]  }
 0x31c   :  { %v2119_v42 = vmax.f32 %v11343_v13, 0.0  ;;  %v2121_v45 = vmax.f32 %v11345_v37, 0.0  ;;  %v12005_v35 = vld [vmem:[%s17214_s8 + $0x36c] ss:$16 sps:$4 sm:$0xff]   ;;  %v12000_v36 = vld [vmem:[%s17214_s8 + $0x360] ss:$16 sps:$4 sm:$0xff]  }
 0x31d   :  { %v2122_v49 = vpack.c.bf16 %v2118_v40, %v2118_v40  ;;  %v12003_v13 = vld [vmem:[%s17214_s8 + $0x368] ss:$16 sps:$4 sm:$0xff]   ;;  %v12008_v37 = vld [vmem:[%s17214_s8 + $0x384] ss:$16 sps:$4 sm:$0xff]   ;;  %v12011_v38 = vld [vmem:[%s17214_s8 + $0x38c] ss:$16 sps:$4 sm:$0xff]  }
 0x31e   :  { %v2123_v46 = vpack.c.bf16 %v2119_v42, %v2119_v42  ;;  %v2125_v53 = vpack.c.bf16 %v2121_v45, %v2121_v45  ;;  %v12006_v39 = vld [vmem:[%s17214_s8 + $0x380] ss:$16 sps:$4 sm:$0xff]   ;;  %v12009_v40 = vld [vmem:[%s17214_s8 + $0x388] ss:$16 sps:$4 sm:$0xff]   ;;  %v12014_v24 = vld [vmem:[%s17214_s8 + $0x3a4] ss:$16 sps:$4 sm:$0xff]  }
 0x31f   :  { %v12017_v41 = vld [vmem:[%s17214_s8 + $0x3ac] ss:$16 sps:$4 sm:$0xff]   ;;  %v12012_v42 = vld [vmem:[%s17214_s8 + $0x3a0] ss:$16 sps:$4 sm:$0xff]   ;;  %v12020_v45 = vld [vmem:[%s17214_s8 + $0x3c4] ss:$16 sps:$4 sm:$0xff]  }
 0x320   :  { %2948 = vmatprep.mubr.bf16.mxu0 %v2123_v46  ;;  %3030 = vmatprep.mubr.bf16.mxu1 %v2123_v46  ;;  %v12023_v46 = vld [vmem:[%s17214_s8 + $0x3cc] ss:$16 sps:$4 sm:$0xff]  }
 0x321   :  { %2949 = vmatmul.mubr.bf16.vlgmr.msra.gmra.mrb[12].mxu0 %v2122_v49  ;;  %3031 = vmatmul.mubr.bf16.vlgmr.msra.gmra.mrb[12].mxu1 %v2122_v49  ;;  %v12026_v49 = vld [vmem:[%s17214_s8 + $0x3e4] ss:$16 sps:$4 sm:$0xff]  }
 0x322   :  { %2958 = vmatpush1.bf16.msra.mxu0 %v11934_v43  ;;  %3040 = vmatpush1.bf16.msra.mxu1 %v11937_v44  ;;  %v12015_v43 = vld [vmem:[%s17214_s8 + $0x3a8] ss:$16 sps:$4 sm:$0xff]   ;;  %v1305_v44 = vrot.slane %v14376_v28, %v13734_v29 }
 0x323   :  { %2989 = vmatprep.mubr.bf16.mxu0 %v2125_v53  ;;  %3071 = vmatprep.mubr.bf16.mxu1 %v2125_v53  ;;  %v12021_v28 = vld [vmem:[%s17214_s8 + $0x3c8] ss:$16 sps:$4 sm:$0xff]  }
 0x324   :  { %2959 = vmatprep.subr.bf16.mxu0 %v11942_v47  ;;  %3041 = vmatprep.subr.bf16.mxu1 %v11945_v48  ;;  %v12018_v47 = vld [vmem:[%s17214_s8 + $0x3c0] ss:$16 sps:$4 sm:$0xff]   ;;  %v11344_v48 = vadd.f32 %v14384_v11, %v1305_v44  ;;  %v12027_v11 = vld [vmem:[%s17214_s8 + $0x3e8] ss:$16 sps:$4 sm:$0xff]  }
 0x325   :  { %v12099_v44 = vld [vmem:[%s17216_s10 + $0x168] ss:$16 sps:$4 sm:$0xff]  }
 0x326   :  { %2960 = vmatpush1.bf16.msra.mxu0 %v11940_v51  ;;  %3042 = vmatpush1.bf16.msra.mxu1 %v11943_v52  ;;  %v12029_v51 = vld [vmem:[%s17214_s8 + $0x3ec] ss:$16 sps:$4 sm:$0xff]   ;;  %v12024_v52 = vld [vmem:[%s17214_s8 + $0x3e0] ss:$16 sps:$4 sm:$0xff]   ;;  %v2120_v53 = vmax.f32 %v11344_v48, 0.0 }
 0x327   :  { %2961 = vmatprep.subr.bf16.mxu0 %v11948_v54  ;;  %3043 = vmatprep.subr.bf16.mxu1 %v11951_v56  ;;  %v12032_v54 = vld [vmem:[%s17216_s10 + $0x4] ss:$16 sps:$4 sm:$0xff]   ;;  %v12035_v56 = vld [vmem:[%s17216_s10 + $0xc] ss:$16 sps:$4 sm:$0xff]  }
 0x328   :  { %v12110_v48 = vld [vmem:[%s17216_s10 + $0x1a4] ss:$16 sps:$4 sm:$0xff]  }
 0x32a   :  { %2962 = vmatpush1.bf16.msra.mxu0 %v11946_v57  ;;  %3044 = vmatpush1.bf16.msra.mxu1 %v11949_v58  ;;  %v12030_v57 = vld [vmem:[%s17216_s10] ss:$16 sps:$4 sm:$0xff]   ;;  %v12033_v58 = vld [vmem:[%s17216_s10 + $0x8] ss:$16 sps:$4 sm:$0xff]  }
 0x32b   :  { %2963 = vmatprep.subr.bf16.mxu0 %v11954_v59  ;;  %3045 = vmatprep.subr.bf16.mxu1 %v11957_v60  ;;  %v2124_v59 = vpack.c.bf16 %v2120_v53, %v2120_v53  ;;  %v12038_v60 = vld [vmem:[%s17216_s10 + $0x24] ss:$16 sps:$4 sm:$0xff]   ;;  %v12119_v53 = vld [vmem:[%s17216_s10 + $0x1cc] ss:$16 sps:$4 sm:$0xff]  }
 0x32e   :  { %2964 = vmatpush1.bf16.msra.mxu0 %v11952_v61  ;;  %3046 = vmatpush1.bf16.msra.mxu1 %v11955_v62  ;;  %v12041_v61 = vld [vmem:[%s17216_s10 + $0x2c] ss:$16 sps:$4 sm:$0xff]   ;;  %v12036_v62 = vld [vmem:[%s17216_s10 + $0x20] ss:$16 sps:$4 sm:$0xff]  }
 0x32f   :  { %2965 = vmatprep.subr.bf16.mxu0 %v11960_v63  ;;  %3047 = vmatprep.subr.bf16.mxu1 %v11963_v0  ;;  %v12039_v63 = vld [vmem:[%s17216_s10 + $0x28] ss:$16 sps:$4 sm:$0xff]   ;;  %v12044_v0 = vld [vmem:[%s17216_s10 + $0x44] ss:$16 sps:$4 sm:$0xff]  }
 0x332   :  { %2966 = vmatpush1.bf16.msra.mxu0 %v11958_v2  ;;  %3048 = vmatpush1.bf16.msra.mxu1 %v11961_v3  ;;  %v12047_v2 = vld [vmem:[%s17216_s10 + $0x4c] ss:$16 sps:$4 sm:$0xff]   ;;  %v12042_v3 = vld [vmem:[%s17216_s10 + $0x40] ss:$16 sps:$4 sm:$0xff]  }
 0x333   :  { %2967 = vmatprep.subr.bf16.mxu0 %v11966_v4  ;;  %3049 = vmatprep.subr.bf16.mxu1 %v11969_v5  ;;  %v12045_v4 = vld [vmem:[%s17216_s10 + $0x48] ss:$16 sps:$4 sm:$0xff]   ;;  %v12050_v5 = vld [vmem:[%s17216_s10 + $0x64] ss:$16 sps:$4 sm:$0xff]  }
 0x336   :  { %2968 = vmatpush1.bf16.msra.mxu0 %v11964_v6  ;;  %3050 = vmatpush1.bf16.msra.mxu1 %v11967_v7  ;;  %v12053_v6 = vld [vmem:[%s17216_s10 + $0x6c] ss:$16 sps:$4 sm:$0xff]   ;;  %v12048_v7 = vld [vmem:[%s17216_s10 + $0x60] ss:$16 sps:$4 sm:$0xff]  }
 0x337   :  { %2969 = vmatprep.subr.bf16.mxu0 %v11972_v8  ;;  %3051 = vmatprep.subr.bf16.mxu1 %v11975_v50  ;;  %v12051_v8 = vld [vmem:[%s17216_s10 + $0x68] ss:$16 sps:$4 sm:$0xff]   ;;  %v12056_v50 = vld [vmem:[%s17216_s10 + $0x84] ss:$16 sps:$4 sm:$0xff]  }
 0x33a   :  { %2970 = vmatpush1.bf16.msra.mxu0 %v11970_v9  ;;  %3052 = vmatpush1.bf16.msra.mxu1 %v11973_v10  ;;  %v12059_v9 = vld [vmem:[%s17216_s10 + $0x8c] ss:$16 sps:$4 sm:$0xff]   ;;  %v12054_v10 = vld [vmem:[%s17216_s10 + $0x80] ss:$16 sps:$4 sm:$0xff]  }
 0x33b   :  { %2971 = vmatprep.subr.bf16.mxu0 %v11978_v16  ;;  %3053 = vmatprep.subr.bf16.mxu1 %v11981_v17  ;;  %v12057_v16 = vld [vmem:[%s17216_s10 + $0x88] ss:$16 sps:$4 sm:$0xff]   ;;  %v12062_v17 = vld [vmem:[%s17216_s10 + $0xa4] ss:$16 sps:$4 sm:$0xff]  }
 0x33e   :  { %2972 = vmatpush1.bf16.msra.mxu0 %v11976_v55  ;;  %3054 = vmatpush1.bf16.msra.mxu1 %v11979_v18  ;;  %v12065_v55 = vld [vmem:[%s17216_s10 + $0xac] ss:$16 sps:$4 sm:$0xff]   ;;  %v12060_v18 = vld [vmem:[%s17216_s10 + $0xa0] ss:$16 sps:$4 sm:$0xff]  }
 0x33f   :  { %2973 = vmatprep.subr.bf16.mxu0 %v11984_v19  ;;  %3055 = vmatprep.subr.bf16.mxu1 %v11987_v20  ;;  %v12063_v19 = vld [vmem:[%s17216_s10 + $0xa8] ss:$16 sps:$4 sm:$0xff]   ;;  %v12068_v20 = vld [vmem:[%s17216_s10 + $0xc4] ss:$16 sps:$4 sm:$0xff]  }
 0x342   :  { %2974 = vmatpush1.bf16.msra.mxu0 %v11982_v21  ;;  %3056 = vmatpush1.bf16.msra.mxu1 %v11985_v22  ;;  %v12071_v21 = vld [vmem:[%s17216_s10 + $0xcc] ss:$16 sps:$4 sm:$0xff]   ;;  %v12066_v22 = vld [vmem:[%s17216_s10 + $0xc0] ss:$16 sps:$4 sm:$0xff]  }
 0x343   :  { %2975 = vmatprep.subr.bf16.mxu0 %v11990_v23  ;;  %3057 = vmatprep.subr.bf16.mxu1 %v11993_v25  ;;  %v12069_v23 = vld [vmem:[%s17216_s10 + $0xc8] ss:$16 sps:$4 sm:$0xff]   ;;  %v12074_v25 = vld [vmem:[%s17216_s10 + $0xe4] ss:$16 sps:$4 sm:$0xff]  }
 0x346   :  { %2976 = vmatpush1.bf16.msra.mxu0 %v11988_v26  ;;  %3058 = vmatpush1.bf16.msra.mxu1 %v11991_v27  ;;  %v12077_v26 = vld [vmem:[%s17216_s10 + $0xec] ss:$16 sps:$4 sm:$0xff]   ;;  %v12072_v27 = vld [vmem:[%s17216_s10 + $0xe0] ss:$16 sps:$4 sm:$0xff]  }
 0x347   :  { %2977 = vmatprep.subr.bf16.mxu0 %v11996_v30  ;;  %3059 = vmatprep.subr.bf16.mxu1 %v11999_v31  ;;  %v12075_v30 = vld [vmem:[%s17216_s10 + $0xe8] ss:$16 sps:$4 sm:$0xff]   ;;  %v12080_v31 = vld [vmem:[%s17216_s10 + $0x104] ss:$16 sps:$4 sm:$0xff]  }
 0x34a   :  { %2978 = vmatpush1.bf16.msra.mxu0 %v11994_v32  ;;  %3060 = vmatpush1.bf16.msra.mxu1 %v11997_v33  ;;  %v12083_v32 = vld [vmem:[%s17216_s10 + $0x10c] ss:$16 sps:$4 sm:$0xff]   ;;  %v12078_v33 = vld [vmem:[%s17216_s10 + $0x100] ss:$16 sps:$4 sm:$0xff]  }
 0x34b   :  { %2979 = vmatprep.subr.bf16.mxu0 %v12002_v34  ;;  %3061 = vmatprep.subr.bf16.mxu1 %v12005_v35  ;;  %v12081_v34 = vld [vmem:[%s17216_s10 + $0x108] ss:$16 sps:$4 sm:$0xff]   ;;  %v12086_v35 = vld [vmem:[%s17216_s10 + $0x124] ss:$16 sps:$4 sm:$0xff]  }
 0x34e   :  { %2980 = vmatpush1.bf16.msra.mxu0 %v12000_v36  ;;  %3062 = vmatpush1.bf16.msra.mxu1 %v12003_v13  ;;  %v12089_v36 = vld [vmem:[%s17216_s10 + $0x12c] ss:$16 sps:$4 sm:$0xff]   ;;  %v12084_v13 = vld [vmem:[%s17216_s10 + $0x120] ss:$16 sps:$4 sm:$0xff]  }
 0x34f   :  { %2981 = vmatprep.subr.bf16.mxu0 %v12008_v37  ;;  %3063 = vmatprep.subr.bf16.mxu1 %v12011_v38  ;;  %v12087_v37 = vld [vmem:[%s17216_s10 + $0x128] ss:$16 sps:$4 sm:$0xff]   ;;  %v12092_v38 = vld [vmem:[%s17216_s10 + $0x144] ss:$16 sps:$4 sm:$0xff]  }
 0x352   :  { %2982 = vmatpush1.bf16.msra.mxu0 %v12006_v39  ;;  %3064 = vmatpush1.bf16.msra.mxu1 %v12009_v40  ;;  %v12095_v39 = vld [vmem:[%s17216_s10 + $0x14c] ss:$16 sps:$4 sm:$0xff]   ;;  %v12090_v40 = vld [vmem:[%s17216_s10 + $0x140] ss:$16 sps:$4 sm:$0xff]  }
 0x353   :  { %2983 = vmatprep.subr.bf16.mxu0 %v12014_v24  ;;  %3065 = vmatprep.subr.bf16.mxu1 %v12017_v41  ;;  %v12093_v24 = vld [vmem:[%s17216_s10 + $0x148] ss:$16 sps:$4 sm:$0xff]   ;;  %v12098_v41 = vld [vmem:[%s17216_s10 + $0x164] ss:$16 sps:$4 sm:$0xff]  }
 0x356   :  { %2984 = vmatpush1.bf16.msra.mxu0 %v12012_v42  ;;  %3066 = vmatpush1.bf16.msra.mxu1 %v12015_v43  ;;  %v12101_v42 = vld [vmem:[%s17216_s10 + $0x16c] ss:$16 sps:$4 sm:$0xff]   ;;  %v12096_v43 = vld [vmem:[%s17216_s10 + $0x160] ss:$16 sps:$4 sm:$0xff]  }
 0x357   :  { %2985 = vmatprep.subr.bf16.mxu0 %v12020_v45  ;;  %3067 = vmatprep.subr.bf16.mxu1 %v12023_v46  ;;  %v12104_v45 = vld [vmem:[%s17216_s10 + $0x184] ss:$16 sps:$4 sm:$0xff]   ;;  %v12107_v46 = vld [vmem:[%s17216_s10 + $0x18c] ss:$16 sps:$4 sm:$0xff]  }
 0x35a   :  { %2986 = vmatpush1.bf16.msra.mxu0 %v12018_v47  ;;  %3068 = vmatpush1.bf16.msra.mxu1 %v12021_v28  ;;  %v12102_v47 = vld [vmem:[%s17216_s10 + $0x180] ss:$16 sps:$4 sm:$0xff]   ;;  %v12105_v28 = vld [vmem:[%s17216_s10 + $0x188] ss:$16 sps:$4 sm:$0xff]  }
 0x35b   :  { %2987 = vmatprep.subr.bf16.mxu0 %v12026_v49  ;;  %3069 = vmatprep.subr.bf16.mxu1 %v12029_v51  ;;  %v12113_v49 = vld [vmem:[%s17216_s10 + $0x1ac] ss:$16 sps:$4 sm:$0xff]   ;;  %v12108_v51 = vld [vmem:[%s17216_s10 + $0x1a0] ss:$16 sps:$4 sm:$0xff]  }
 0x35e   :  { %2988 = vmatpush1.bf16.msra.mxu0 %v12024_v52  ;;  %3070 = vmatpush1.bf16.msra.mxu1 %v12027_v11  ;;  %v12111_v52 = vld [vmem:[%s17216_s10 + $0x1a8] ss:$16 sps:$4 sm:$0xff]   ;;  %v12116_v11 = vld [vmem:[%s17216_s10 + $0x1c4] ss:$16 sps:$4 sm:$0xff]  }
 0x35f   :  { %3879 = vmatprep.subr.bf16.mxu0 %v12032_v54  ;;  %3961 = vmatprep.subr.bf16.mxu1 %v12035_v56  ;;  %v12114_v54 = vld [vmem:[%s17216_s10 + $0x1c0] ss:$16 sps:$4 sm:$0xff]   ;;  %v12117_v56 = vld [vmem:[%s17216_s10 + $0x1c8] ss:$16 sps:$4 sm:$0xff]  }
 0x361   :  { %2990 = vmatmul.mubr.bf16.vlgmr.msra.gmra.mrb[12].mxu0 %v2124_v59  ;;  %3072 = vmatmul.mubr.bf16.vlgmr.msra.gmra.mrb[12].mxu1 %v2124_v59  ;;  %v12120_v59 = vld [vmem:[%s17216_s10 + $0x1e0] ss:$16 sps:$4 sm:$0xff]  }
 0x362   :  { %3880 = vmatpush1.bf16.msra.mxu0 %v12030_v57  ;;  %3962 = vmatpush1.bf16.msra.mxu1 %v12033_v58  ;;  %v12122_v57 = vld [vmem:[%s17216_s10 + $0x1e4] ss:$16 sps:$4 sm:$0xff]   ;;  %v12125_v58 = vld [vmem:[%s17216_s10 + $0x1ec] ss:$16 sps:$4 sm:$0xff]  }
 0x363   :  { %3881 = vmatprep.subr.bf16.mxu0 %v12038_v60  ;;  %3963 = vmatprep.subr.bf16.mxu1 %v12041_v61  ;;  %v12123_v60 = vld [vmem:[%s17216_s10 + $0x1e8] ss:$16 sps:$4 sm:$0xff]   ;;  %v12128_v61 = vld [vmem:[%s17216_s10 + $0x204] ss:$16 sps:$4 sm:$0xff]  }
 0x366   :  { %3882 = vmatpush1.bf16.msra.mxu0 %v12036_v62  ;;  %3964 = vmatpush1.bf16.msra.mxu1 %v12039_v63  ;;  %v12131_v62 = vld [vmem:[%s17216_s10 + $0x20c] ss:$16 sps:$4 sm:$0xff]   ;;  %v14776_v63 = vld [vmem:[%s17219_s9] sm:$0xf] }
 0x367   :  { %3883 = vmatprep.subr.bf16.mxu0 %v12044_v0  ;;  %3965 = vmatprep.subr.bf16.mxu1 %v12047_v2  ;;  %v2259_v0 = vrot.slane %v14776_v63, %v13562_v12  ;;  %v2263_v2 = vrot.slane %v14776_v63, %v13570_v14 }
 0x36a   :  { %3884 = vmatpush1.bf16.msra.mxu0 %v12042_v3  ;;  %3966 = vmatpush1.bf16.msra.mxu1 %v12045_v4  ;;  %v2271_v3 = vrot.slane %v14776_v63, %v13573_v15 }
 0x36b   :  { %3885 = vmatprep.subr.bf16.mxu0 %v12050_v5  ;;  %3967 = vmatprep.subr.bf16.mxu1 %v12053_v6 }
 0x36e   :  { %3886 = vmatpush1.bf16.msra.mxu0 %v12048_v7  ;;  %3968 = vmatpush1.bf16.msra.mxu1 %v12051_v8 }
 0x36f   :  { %3887 = vmatprep.subr.bf16.mxu0 %v12056_v50  ;;  %3969 = vmatprep.subr.bf16.mxu1 %v12059_v9 }
 0x372   :  { %3888 = vmatpush1.bf16.msra.mxu0 %v12054_v10  ;;  %3970 = vmatpush1.bf16.msra.mxu1 %v12057_v16 }
 0x373   :  { %3889 = vmatprep.subr.bf16.mxu0 %v12062_v17  ;;  %3971 = vmatprep.subr.bf16.mxu1 %v12065_v55 }
 0x376   :  { %3890 = vmatpush1.bf16.msra.mxu0 %v12060_v18  ;;  %3972 = vmatpush1.bf16.msra.mxu1 %v12063_v19 }
 0x377   :  { %3891 = vmatprep.subr.bf16.mxu0 %v12068_v20  ;;  %3973 = vmatprep.subr.bf16.mxu1 %v12071_v21  ;;  %v12126_v20 = vld [vmem:[%s17216_s10 + $0x200] ss:$16 sps:$4 sm:$0xff]   ;;  %v12129_v21 = vld [vmem:[%s17216_s10 + $0x208] ss:$16 sps:$4 sm:$0xff]  }
 0x37a   :  { %3892 = vmatpush1.bf16.msra.mxu0 %v12066_v22  ;;  %3974 = vmatpush1.bf16.msra.mxu1 %v12069_v23 }
 0x37b   :  { %3893 = vmatprep.subr.bf16.mxu0 %v12074_v25  ;;  %3975 = vmatprep.subr.bf16.mxu1 %v12077_v26  ;;  %v12134_v25 = vld [vmem:[%s17216_s10 + $0x224] ss:$16 sps:$4 sm:$0xff]   ;;  %v12137_v26 = vld [vmem:[%s17216_s10 + $0x22c] ss:$16 sps:$4 sm:$0xff]  }
 0x37e   :  { %3894 = vmatpush1.bf16.msra.mxu0 %v12072_v27  ;;  %3976 = vmatpush1.bf16.msra.mxu1 %v12075_v30  ;;  %v12132_v30 = vld [vmem:[%s17216_s10 + $0x220] ss:$16 sps:$4 sm:$0xff]  }
 0x37f   :  { %3895 = vmatprep.subr.bf16.mxu0 %v12080_v31  ;;  %3977 = vmatprep.subr.bf16.mxu1 %v12083_v32  ;;  %v12135_v31 = vld [vmem:[%s17216_s10 + $0x228] ss:$16 sps:$4 sm:$0xff]  }
 0x382   :  { %3896 = vmatpush1.bf16.msra.mxu0 %v12078_v33  ;;  %3978 = vmatpush1.bf16.msra.mxu1 %v12081_v34  ;;  %v12140_v33 = vld [vmem:[%s17216_s10 + $0x244] ss:$16 sps:$4 sm:$0xff]   ;;  %v12143_v34 = vld [vmem:[%s17216_s10 + $0x24c] ss:$16 sps:$4 sm:$0xff]  }
 0x383   :  { %3897 = vmatprep.subr.bf16.mxu0 %v12086_v35  ;;  %3979 = vmatprep.subr.bf16.mxu1 %v12089_v36  ;;  %v12138_v35 = vld [vmem:[%s17216_s10 + $0x240] ss:$16 sps:$4 sm:$0xff]   ;;  %v12141_v36 = vld [vmem:[%s17216_s10 + $0x248] ss:$16 sps:$4 sm:$0xff]  }
 0x386   :  { %3898 = vmatpush1.bf16.msra.mxu0 %v12084_v13  ;;  %3980 = vmatpush1.bf16.msra.mxu1 %v12087_v37  ;;  %v12146_v13 = vld [vmem:[%s17216_s10 + $0x264] ss:$16 sps:$4 sm:$0xff]   ;;  %v12149_v37 = vld [vmem:[%s17216_s10 + $0x26c] ss:$16 sps:$4 sm:$0xff]  }
 0x387   :  { %3899 = vmatprep.subr.bf16.mxu0 %v12092_v38  ;;  %3981 = vmatprep.subr.bf16.mxu1 %v12095_v39  ;;  %v12144_v38 = vld [vmem:[%s17216_s10 + $0x260] ss:$16 sps:$4 sm:$0xff]   ;;  %v12147_v39 = vld [vmem:[%s17216_s10 + $0x268] ss:$16 sps:$4 sm:$0xff]  }
 0x38a   :  { %3900 = vmatpush1.bf16.msra.mxu0 %v12090_v40  ;;  %3982 = vmatpush1.bf16.msra.mxu1 %v12093_v24  ;;  %v12152_v40 = vld [vmem:[%s17216_s10 + $0x284] ss:$16 sps:$4 sm:$0xff]   ;;  %v12155_v24 = vld [vmem:[%s17216_s10 + $0x28c] ss:$16 sps:$4 sm:$0xff]  }
 0x38b   :  { %3901 = vmatprep.subr.bf16.mxu0 %v12098_v41  ;;  %3983 = vmatprep.subr.bf16.mxu1 %v12101_v42  ;;  %v12150_v41 = vld [vmem:[%s17216_s10 + $0x280] ss:$16 sps:$4 sm:$0xff]   ;;  %v12153_v42 = vld [vmem:[%s17216_s10 + $0x288] ss:$16 sps:$4 sm:$0xff]  }
 0x38e   :  { %3902 = vmatpush1.bf16.msra.mxu0 %v12096_v43  ;;  %3984 = vmatpush1.bf16.msra.mxu1 %v12099_v44  ;;  %v12158_v43 = vld [vmem:[%s17216_s10 + $0x2a4] ss:$16 sps:$4 sm:$0xff]   ;;  %v12161_v44 = vld [vmem:[%s17216_s10 + $0x2ac] ss:$16 sps:$4 sm:$0xff]  }
 0x38f   :  { %3903 = vmatprep.subr.bf16.mxu0 %v12104_v45  ;;  %3985 = vmatprep.subr.bf16.mxu1 %v12107_v46  ;;  %v12156_v45 = vld [vmem:[%s17216_s10 + $0x2a0] ss:$16 sps:$4 sm:$0xff]   ;;  %v12159_v46 = vld [vmem:[%s17216_s10 + $0x2a8] ss:$16 sps:$4 sm:$0xff]  }
 0x392   :  { %3904 = vmatpush1.bf16.msra.mxu0 %v12102_v47  ;;  %3986 = vmatpush1.bf16.msra.mxu1 %v12105_v28  ;;  %v12164_v47 = vld [vmem:[%s17216_s10 + $0x2c4] ss:$16 sps:$4 sm:$0xff]   ;;  %v12167_v28 = vld [vmem:[%s17216_s10 + $0x2cc] ss:$16 sps:$4 sm:$0xff]  }
 0x393   :  { %3905 = vmatprep.subr.bf16.mxu0 %v12110_v48  ;;  %3987 = vmatprep.subr.bf16.mxu1 %v12113_v49  ;;  %v12162_v48 = vld [vmem:[%s17216_s10 + $0x2c0] ss:$16 sps:$4 sm:$0xff]   ;;  %v12165_v49 = vld [vmem:[%s17216_s10 + $0x2c8] ss:$16 sps:$4 sm:$0xff]  }
 0x396   :  { %3906 = vmatpush1.bf16.msra.mxu0 %v12108_v51  ;;  %3988 = vmatpush1.bf16.msra.mxu1 %v12111_v52  ;;  %v12170_v51 = vld [vmem:[%s17216_s10 + $0x2e4] ss:$16 sps:$4 sm:$0xff]   ;;  %v12173_v52 = vld [vmem:[%s17216_s10 + $0x2ec] ss:$16 sps:$4 sm:$0xff]  }
 0x397   :  { %3907 = vmatprep.subr.bf16.mxu0 %v12116_v11  ;;  %3989 = vmatprep.subr.bf16.mxu1 %v12119_v53  ;;  %v12168_v11 = vld [vmem:[%s17216_s10 + $0x2e0] ss:$16 sps:$4 sm:$0xff]   ;;  %v12171_v53 = vld [vmem:[%s17216_s10 + $0x2e8] ss:$16 sps:$4 sm:$0xff]  }
 0x39a   :  { %3908 = vmatpush1.bf16.msra.mxu0 %v12114_v54  ;;  %3990 = vmatpush1.bf16.msra.mxu1 %v12117_v56  ;;  %v12176_v54 = vld [vmem:[%s17216_s10 + $0x304] ss:$16 sps:$4 sm:$0xff]   ;;  %v12179_v56 = vld [vmem:[%s17216_s10 + $0x30c] ss:$16 sps:$4 sm:$0xff]  }
 0x39b   :  { %3909 = vmatprep.subr.bf16.mxu0 %v12122_v57  ;;  %3991 = vmatprep.subr.bf16.mxu1 %v12125_v58  ;;  %v12174_v57 = vld [vmem:[%s17216_s10 + $0x300] ss:$16 sps:$4 sm:$0xff]   ;;  %v12177_v58 = vld [vmem:[%s17216_s10 + $0x308] ss:$16 sps:$4 sm:$0xff]  }
 0x39e   :  { %3910 = vmatpush1.bf16.msra.mxu0 %v12120_v59  ;;  %3992 = vmatpush1.bf16.msra.mxu1 %v12123_v60  ;;  %v12182_v59 = vld [vmem:[%s17216_s10 + $0x324] ss:$16 sps:$4 sm:$0xff]   ;;  %v12185_v60 = vld [vmem:[%s17216_s10 + $0x32c] ss:$16 sps:$4 sm:$0xff]  }
 0x39f   :  { %3920 = vmatprep.subr.bf16.mxu0 %v12128_v61  ;;  %4002 = vmatprep.subr.bf16.mxu1 %v12131_v62  ;;  %v12180_v61 = vld [vmem:[%s17216_s10 + $0x320] ss:$16 sps:$4 sm:$0xff]   ;;  %v12183_v62 = vld [vmem:[%s17216_s10 + $0x328] ss:$16 sps:$4 sm:$0xff]  }
 0x434   :  { %v2991_v4 = vpop.f32.mrb[12].mxu0  ;;  %v14784_v5 = vpop.f32.mrb[12].mxu1 }
 0x435   :  { %v11346_v6 = vadd.f32 %v2991_v4, %v2259_v0  ;;  %v2993_v7 = vpop.f32.mrb[13].mxu0  ;;  %v3075_v8 = vpop.f32.mrb[13].mxu1  ;;  %v12188_v0 = vld [vmem:[%s17216_s10 + $0x344] ss:$16 sps:$4 sm:$0xff]   ;;  %v12189_v4 = vld [vmem:[%s17216_s10 + $0x348] ss:$16 sps:$4 sm:$0xff]  }
 0x436   :  { %v11347_v50 = vadd.f32 %v2993_v7, %v2263_v2  ;;  %v11349_v9 = vadd.f32 %v3075_v8, %v2271_v3  ;;  %v2995_v10 = vpop.f32.mrb[14].mxu0  ;;  %v3077_v16 = vpop.f32.mrb[14].mxu1  ;;  %v12191_v2 = vld [vmem:[%s17216_s10 + $0x34c] ss:$16 sps:$4 sm:$0xff]   ;;  %v12186_v3 = vld [vmem:[%s17216_s10 + $0x340] ss:$16 sps:$4 sm:$0xff]  }
 0x437   :  { %v3080_v17 = vmax.f32 %v11346_v6, 0.0  ;;  %v2996_v55 = vpop.f32.mrb[15].mxu0  ;;  %v3078_v18 = vpop.f32.mrb[15].mxu1  ;;  %v12194_v6 = vld [vmem:[%s17216_s10 + $0x364] ss:$16 sps:$4 sm:$0xff]  }
 0x438   :  { %v3081_v19 = vmax.f32 %v11347_v50, 0.0  ;;  %v3083_v22 = vmax.f32 %v11349_v9, 0.0  ;;  %v12197_v7 = vld [vmem:[%s17216_s10 + $0x36c] ss:$16 sps:$4 sm:$0xff]   ;;  %v12192_v8 = vld [vmem:[%s17216_s10 + $0x360] ss:$16 sps:$4 sm:$0xff]  }
 0x439   :  { %v14800_v27 = vpack.c.bf16 %v3080_v17, %v3080_v17  ;;  %v12195_v50 = vld [vmem:[%s17216_s10 + $0x368] ss:$16 sps:$4 sm:$0xff]   ;;  %v12200_v9 = vld [vmem:[%s17216_s10 + $0x384] ss:$16 sps:$4 sm:$0xff]   ;;  %v12203_v10 = vld [vmem:[%s17216_s10 + $0x38c] ss:$16 sps:$4 sm:$0xff]  }
 0x43a   :  { %v14792_v23 = vpack.c.bf16 %v3081_v19, %v3081_v19  ;;  %v14810_v32 = vpack.c.bf16 %v3083_v22, %v3083_v22  ;;  %v12198_v16 = vld [vmem:[%s17216_s10 + $0x380] ss:$16 sps:$4 sm:$0xff]   ;;  %v12201_v17 = vld [vmem:[%s17216_s10 + $0x388] ss:$16 sps:$4 sm:$0xff]   ;;  %v12206_v55 = vld [vmem:[%s17216_s10 + $0x3a4] ss:$16 sps:$4 sm:$0xff]  }
 0x43b   :  { %v12209_v18 = vld [vmem:[%s17216_s10 + $0x3ac] ss:$16 sps:$4 sm:$0xff]   ;;  %v12204_v19 = vld [vmem:[%s17216_s10 + $0x3a0] ss:$16 sps:$4 sm:$0xff]   ;;  %v12212_v22 = vld [vmem:[%s17216_s10 + $0x3c4] ss:$16 sps:$4 sm:$0xff]  }
 0x43c   :  { %3911 = vmatprep.mubr.bf16.mxu0 %v14792_v23  ;;  %3993 = vmatprep.mubr.bf16.mxu1 %v14792_v23 }
 0x43d   :  { %3912 = vmatmul.mubr.bf16.vlgmr.msra.gmra.mrb[16].mxu0 %v14800_v27  ;;  %3994 = vmatmul.mubr.bf16.vlgmr.msra.gmra.mrb[16].mxu1 %v14800_v27 }
 0x43e   :  { %3921 = vmatpush1.bf16.msra.mxu0 %v12126_v20  ;;  %4003 = vmatpush1.bf16.msra.mxu1 %v12129_v21  ;;  %v12207_v20 = vld [vmem:[%s17216_s10 + $0x3a8] ss:$16 sps:$4 sm:$0xff]   ;;  %v2267_v21 = vrot.slane %v14776_v63, %v13734_v29 }
 0x43f   :  { %3952 = vmatprep.mubr.bf16.mxu0 %v14810_v32  ;;  %4034 = vmatprep.mubr.bf16.mxu1 %v14810_v32  ;;  %v12213_v63 = vld [vmem:[%s17216_s10 + $0x3c8] ss:$16 sps:$4 sm:$0xff]  }
 0x440   :  { %3922 = vmatprep.subr.bf16.mxu0 %v12134_v25  ;;  %4004 = vmatprep.subr.bf16.mxu1 %v12137_v26  ;;  %v12215_v25 = vld [vmem:[%s17216_s10 + $0x3cc] ss:$16 sps:$4 sm:$0xff]   ;;  %v12210_v26 = vld [vmem:[%s17216_s10 + $0x3c0] ss:$16 sps:$4 sm:$0xff]  }
 0x442   :  { %3923 = vmatpush1.bf16.msra.mxu0 %v12132_v30  ;;  %4005 = vmatpush1.bf16.msra.mxu1 %v12135_v31  ;;  %v11348_v30 = vadd.f32 %v14784_v5, %v2267_v21  ;;  %v12218_v31 = vld [vmem:[%s17216_s10 + $0x3e4] ss:$16 sps:$4 sm:$0xff]   ;;  %v12219_v5 = vld [vmem:[%s17216_s10 + $0x3e8] ss:$16 sps:$4 sm:$0xff]  }
 0x443   :  { %3924 = vmatprep.subr.bf16.mxu0 %v12140_v33  ;;  %4006 = vmatprep.subr.bf16.mxu1 %v12143_v34  ;;  %v12221_v33 = vld [vmem:[%s17216_s10 + $0x3ec] ss:$16 sps:$4 sm:$0xff]   ;;  %v12216_v34 = vld [vmem:[%s17216_s10 + $0x3e0] ss:$16 sps:$4 sm:$0xff]   ;;  %v12290_v21 = vld [vmem:[%s17218_s12 + $0x164] ss:$16 sps:$4 sm:$0xff]  }
 0x446   :  { %3925 = vmatpush1.bf16.msra.mxu0 %v12138_v35  ;;  %4007 = vmatpush1.bf16.msra.mxu1 %v12141_v36  ;;  %v3082_v35 = vmax.f32 %v11348_v30, 0.0  ;;  %v12224_v36 = vld [vmem:[%s17218_s12 + $0x4] ss:$16 sps:$4 sm:$0xff]   ;;  %v12299_v30 = vld [vmem:[%s17218_s12 + $0x18c] ss:$16 sps:$4 sm:$0xff]  }
 0x447   :  { %3926 = vmatprep.subr.bf16.mxu0 %v12146_v13  ;;  %4008 = vmatprep.subr.bf16.mxu1 %v12149_v37  ;;  %v12227_v13 = vld [vmem:[%s17218_s12 + $0xc] ss:$16 sps:$4 sm:$0xff]   ;;  %v12222_v37 = vld [vmem:[%s17218_s12] ss:$16 sps:$4 sm:$0xff]  }
 0x44a   :  { %3927 = vmatpush1.bf16.msra.mxu0 %v12144_v38  ;;  %4009 = vmatpush1.bf16.msra.mxu1 %v12147_v39  ;;  %v12225_v38 = vld [vmem:[%s17218_s12 + $0x8] ss:$16 sps:$4 sm:$0xff]   ;;  %v14999_v39 = vpack.c.bf16 %v3082_v35, %v3082_v35  ;;  %v12300_v35 = vld [vmem:[%s17218_s12 + $0x1a0] ss:$16 sps:$4 sm:$0xff]  }
 0x44b   :  { %3928 = vmatprep.subr.bf16.mxu0 %v12152_v40  ;;  %4010 = vmatprep.subr.bf16.mxu1 %v12155_v24  ;;  %v12230_v40 = vld [vmem:[%s17218_s12 + $0x24] ss:$16 sps:$4 sm:$0xff]   ;;  %v12233_v24 = vld [vmem:[%s17218_s12 + $0x2c] ss:$16 sps:$4 sm:$0xff]  }
 0x44e   :  { %3929 = vmatpush1.bf16.msra.mxu0 %v12150_v41  ;;  %4011 = vmatpush1.bf16.msra.mxu1 %v12153_v42  ;;  %v12228_v41 = vld [vmem:[%s17218_s12 + $0x20] ss:$16 sps:$4 sm:$0xff]   ;;  %v12231_v42 = vld [vmem:[%s17218_s12 + $0x28] ss:$16 sps:$4 sm:$0xff]  }
 0x44f   :  { %3930 = vmatprep.subr.bf16.mxu0 %v12158_v43  ;;  %4012 = vmatprep.subr.bf16.mxu1 %v12161_v44  ;;  %v12236_v43 = vld [vmem:[%s17218_s12 + $0x44] ss:$16 sps:$4 sm:$0xff]   ;;  %v12239_v44 = vld [vmem:[%s17218_s12 + $0x4c] ss:$16 sps:$4 sm:$0xff]  }
 0x452   :  { %3931 = vmatpush1.bf16.msra.mxu0 %v12156_v45  ;;  %4013 = vmatpush1.bf16.msra.mxu1 %v12159_v46  ;;  %v12234_v45 = vld [vmem:[%s17218_s12 + $0x40] ss:$16 sps:$4 sm:$0xff]   ;;  %v12237_v46 = vld [vmem:[%s17218_s12 + $0x48] ss:$16 sps:$4 sm:$0xff]  }
 0x453   :  { %3932 = vmatprep.subr.bf16.mxu0 %v12164_v47  ;;  %4014 = vmatprep.subr.bf16.mxu1 %v12167_v28  ;;  %v12242_v47 = vld [vmem:[%s17218_s12 + $0x64] ss:$16 sps:$4 sm:$0xff]   ;;  %v12245_v28 = vld [vmem:[%s17218_s12 + $0x6c] ss:$16 sps:$4 sm:$0xff]  }
 0x456   :  { %3933 = vmatpush1.bf16.msra.mxu0 %v12162_v48  ;;  %4015 = vmatpush1.bf16.msra.mxu1 %v12165_v49  ;;  %v12240_v48 = vld [vmem:[%s17218_s12 + $0x60] ss:$16 sps:$4 sm:$0xff]   ;;  %v12243_v49 = vld [vmem:[%s17218_s12 + $0x68] ss:$16 sps:$4 sm:$0xff]  }
 0x457   :  { %3934 = vmatprep.subr.bf16.mxu0 %v12170_v51  ;;  %4016 = vmatprep.subr.bf16.mxu1 %v12173_v52  ;;  %v12248_v51 = vld [vmem:[%s17218_s12 + $0x84] ss:$16 sps:$4 sm:$0xff]   ;;  %v12251_v52 = vld [vmem:[%s17218_s12 + $0x8c] ss:$16 sps:$4 sm:$0xff]  }
 0x45a   :  { %3935 = vmatpush1.bf16.msra.mxu0 %v12168_v11  ;;  %4017 = vmatpush1.bf16.msra.mxu1 %v12171_v53  ;;  %v12246_v11 = vld [vmem:[%s17218_s12 + $0x80] ss:$16 sps:$4 sm:$0xff]   ;;  %v12249_v53 = vld [vmem:[%s17218_s12 + $0x88] ss:$16 sps:$4 sm:$0xff]  }
 0x45b   :  { %3936 = vmatprep.subr.bf16.mxu0 %v12176_v54  ;;  %4018 = vmatprep.subr.bf16.mxu1 %v12179_v56  ;;  %v12254_v54 = vld [vmem:[%s17218_s12 + $0xa4] ss:$16 sps:$4 sm:$0xff]   ;;  %v12257_v56 = vld [vmem:[%s17218_s12 + $0xac] ss:$16 sps:$4 sm:$0xff]  }
 0x45e   :  { %3937 = vmatpush1.bf16.msra.mxu0 %v12174_v57  ;;  %4019 = vmatpush1.bf16.msra.mxu1 %v12177_v58  ;;  %v12252_v57 = vld [vmem:[%s17218_s12 + $0xa0] ss:$16 sps:$4 sm:$0xff]   ;;  %v12255_v58 = vld [vmem:[%s17218_s12 + $0xa8] ss:$16 sps:$4 sm:$0xff]  }
 0x45f   :  { %3938 = vmatprep.subr.bf16.mxu0 %v12182_v59  ;;  %4020 = vmatprep.subr.bf16.mxu1 %v12185_v60  ;;  %v12260_v59 = vld [vmem:[%s17218_s12 + $0xc4] ss:$16 sps:$4 sm:$0xff]   ;;  %v12263_v60 = vld [vmem:[%s17218_s12 + $0xcc] ss:$16 sps:$4 sm:$0xff]  }
 0x462   :  { %3939 = vmatpush1.bf16.msra.mxu0 %v12180_v61  ;;  %4021 = vmatpush1.bf16.msra.mxu1 %v12183_v62  ;;  %v12258_v61 = vld [vmem:[%s17218_s12 + $0xc0] ss:$16 sps:$4 sm:$0xff]   ;;  %v12261_v62 = vld [vmem:[%s17218_s12 + $0xc8] ss:$16 sps:$4 sm:$0xff]  }
 0x463   :  { %3940 = vmatprep.subr.bf16.mxu0 %v12188_v0  ;;  %4022 = vmatprep.subr.bf16.mxu1 %v12191_v2  ;;  %v12266_v0 = vld [vmem:[%s17218_s12 + $0xe4] ss:$16 sps:$4 sm:$0xff]   ;;  %v12269_v2 = vld [vmem:[%s17218_s12 + $0xec] ss:$16 sps:$4 sm:$0xff]  }
 0x466   :  { %3941 = vmatpush1.bf16.msra.mxu0 %v12186_v3  ;;  %4023 = vmatpush1.bf16.msra.mxu1 %v12189_v4  ;;  %v12264_v3 = vld [vmem:[%s17218_s12 + $0xe0] ss:$16 sps:$4 sm:$0xff]   ;;  %v12267_v4 = vld [vmem:[%s17218_s12 + $0xe8] ss:$16 sps:$4 sm:$0xff]  }
 0x467   :  { %3942 = vmatprep.subr.bf16.mxu0 %v12194_v6  ;;  %4024 = vmatprep.subr.bf16.mxu1 %v12197_v7  ;;  %v12272_v6 = vld [vmem:[%s17218_s12 + $0x104] ss:$16 sps:$4 sm:$0xff]   ;;  %v12275_v7 = vld [vmem:[%s17218_s12 + $0x10c] ss:$16 sps:$4 sm:$0xff]  }
 0x46a   :  { %3943 = vmatpush1.bf16.msra.mxu0 %v12192_v8  ;;  %4025 = vmatpush1.bf16.msra.mxu1 %v12195_v50  ;;  %v12270_v8 = vld [vmem:[%s17218_s12 + $0x100] ss:$16 sps:$4 sm:$0xff]   ;;  %v12273_v50 = vld [vmem:[%s17218_s12 + $0x108] ss:$16 sps:$4 sm:$0xff]  }
 0x46b   :  { %3944 = vmatprep.subr.bf16.mxu0 %v12200_v9  ;;  %4026 = vmatprep.subr.bf16.mxu1 %v12203_v10  ;;  %v12278_v9 = vld [vmem:[%s17218_s12 + $0x124] ss:$16 sps:$4 sm:$0xff]   ;;  %v12281_v10 = vld [vmem:[%s17218_s12 + $0x12c] ss:$16 sps:$4 sm:$0xff]  }
 0x46e   :  { %3945 = vmatpush1.bf16.msra.mxu0 %v12198_v16  ;;  %4027 = vmatpush1.bf16.msra.mxu1 %v12201_v17  ;;  %v12276_v16 = vld [vmem:[%s17218_s12 + $0x120] ss:$16 sps:$4 sm:$0xff]   ;;  %v12279_v17 = vld [vmem:[%s17218_s12 + $0x128] ss:$16 sps:$4 sm:$0xff]  }
 0x46f   :  { %3946 = vmatprep.subr.bf16.mxu0 %v12206_v55  ;;  %4028 = vmatprep.subr.bf16.mxu1 %v12209_v18  ;;  %v12284_v55 = vld [vmem:[%s17218_s12 + $0x144] ss:$16 sps:$4 sm:$0xff]   ;;  %v12287_v18 = vld [vmem:[%s17218_s12 + $0x14c] ss:$16 sps:$4 sm:$0xff]  }
 0x472   :  { %3947 = vmatpush1.bf16.msra.mxu0 %v12204_v19  ;;  %4029 = vmatpush1.bf16.msra.mxu1 %v12207_v20  ;;  %v12282_v19 = vld [vmem:[%s17218_s12 + $0x140] ss:$16 sps:$4 sm:$0xff]   ;;  %v12285_v20 = vld [vmem:[%s17218_s12 + $0x148] ss:$16 sps:$4 sm:$0xff]  }
 0x473   :  { %3948 = vmatprep.subr.bf16.mxu0 %v12212_v22  ;;  %4030 = vmatprep.subr.bf16.mxu1 %v12215_v25  ;;  %v12293_v22 = vld [vmem:[%s17218_s12 + $0x16c] ss:$16 sps:$4 sm:$0xff]   ;;  %v12288_v25 = vld [vmem:[%s17218_s12 + $0x160] ss:$16 sps:$4 sm:$0xff]  }
 0x476   :  { %3949 = vmatpush1.bf16.msra.mxu0 %v12210_v26  ;;  %4031 = vmatpush1.bf16.msra.mxu1 %v12213_v63  ;;  %v12291_v26 = vld [vmem:[%s17218_s12 + $0x168] ss:$16 sps:$4 sm:$0xff]   ;;  %v12296_v63 = vld [vmem:[%s17218_s12 + $0x184] ss:$16 sps:$4 sm:$0xff]  }
 0x477   :  { %3950 = vmatprep.subr.bf16.mxu0 %v12218_v31  ;;  %4032 = vmatprep.subr.bf16.mxu1 %v12221_v33  ;;  %v12294_v31 = vld [vmem:[%s17218_s12 + $0x180] ss:$16 sps:$4 sm:$0xff]   ;;  %v12297_v33 = vld [vmem:[%s17218_s12 + $0x188] ss:$16 sps:$4 sm:$0xff]  }
 0x47a   :  { %3951 = vmatpush1.bf16.msra.mxu0 %v12216_v34  ;;  %4033 = vmatpush1.bf16.msra.mxu1 %v12219_v5  ;;  %v12302_v34 = vld [vmem:[%s17218_s12 + $0x1a4] ss:$16 sps:$4 sm:$0xff]   ;;  %v12305_v5 = vld [vmem:[%s17218_s12 + $0x1ac] ss:$16 sps:$4 sm:$0xff]  }
 0x47b   :  { %4841 = vmatprep.subr.bf16.mxu0 %v12224_v36  ;;  %4923 = vmatprep.subr.bf16.mxu1 %v12227_v13  ;;  %v12303_v36 = vld [vmem:[%s17218_s12 + $0x1a8] ss:$16 sps:$4 sm:$0xff]   ;;  %v12308_v13 = vld [vmem:[%s17218_s12 + $0x1c4] ss:$16 sps:$4 sm:$0xff]  }
 0x47d   :  { %3953 = vmatmul.mubr.bf16.vlgmr.msra.gmra.mrb[16].mxu0 %v14999_v39  ;;  %4035 = vmatmul.mubr.bf16.vlgmr.msra.gmra.mrb[16].mxu1 %v14999_v39 }
 0x47e   :  { %4842 = vmatpush1.bf16.msra.mxu0 %v12222_v37  ;;  %4924 = vmatpush1.bf16.msra.mxu1 %v12225_v38  ;;  %v12311_v37 = vld [vmem:[%s17218_s12 + $0x1cc] ss:$16 sps:$4 sm:$0xff]   ;;  %v12306_v38 = vld [vmem:[%s17218_s12 + $0x1c0] ss:$16 sps:$4 sm:$0xff]  }
 0x47f   :  { %4843 = vmatprep.subr.bf16.mxu0 %v12230_v40  ;;  %4925 = vmatprep.subr.bf16.mxu1 %v12233_v24  ;;  %v12309_v40 = vld [vmem:[%s17218_s12 + $0x1c8] ss:$16 sps:$4 sm:$0xff]   ;;  %v12314_v24 = vld [vmem:[%s17218_s12 + $0x1e4] ss:$16 sps:$4 sm:$0xff]  }
 0x482   :  { %4844 = vmatpush1.bf16.msra.mxu0 %v12228_v41  ;;  %4926 = vmatpush1.bf16.msra.mxu1 %v12231_v42  ;;  %v12317_v41 = vld [vmem:[%s17218_s12 + $0x1ec] ss:$16 sps:$4 sm:$0xff]   ;;  %v12312_v42 = vld [vmem:[%s17218_s12 + $0x1e0] ss:$16 sps:$4 sm:$0xff]  }
 0x483   :  { %4845 = vmatprep.subr.bf16.mxu0 %v12236_v43  ;;  %4927 = vmatprep.subr.bf16.mxu1 %v12239_v44  ;;  %v12315_v43 = vld [vmem:[%s17218_s12 + $0x1e8] ss:$16 sps:$4 sm:$0xff]   ;;  %v12320_v44 = vld [vmem:[%s17218_s12 + $0x204] ss:$16 sps:$4 sm:$0xff]  }
 0x486   :  { %4846 = vmatpush1.bf16.msra.mxu0 %v12234_v45  ;;  %4928 = vmatpush1.bf16.msra.mxu1 %v12237_v46  ;;  %v12323_v45 = vld [vmem:[%s17218_s12 + $0x20c] ss:$16 sps:$4 sm:$0xff]   ;;  %v15192_v46 = vld [vmem:[%s17221_s11] sm:$0xf] }
 0x487   :  { %4847 = vmatprep.subr.bf16.mxu0 %v12242_v47  ;;  %4929 = vmatprep.subr.bf16.mxu1 %v12245_v28  ;;  %v3222_v47 = vrot.slane %v15192_v46, %v13562_v12  ;;  %v3226_v28 = vrot.slane %v15192_v46, %v13570_v14 }
 0x48a   :  { %4848 = vmatpush1.bf16.msra.mxu0 %v12240_v48  ;;  %4930 = vmatpush1.bf16.msra.mxu1 %v12243_v49  ;;  %v3234_v48 = vrot.slane %v15192_v46, %v13573_v15 }
 0x48b   :  { %4849 = vmatprep.subr.bf16.mxu0 %v12248_v51  ;;  %4931 = vmatprep.subr.bf16.mxu1 %v12251_v52 }
 0x48e   :  { %4850 = vmatpush1.bf16.msra.mxu0 %v12246_v11  ;;  %4932 = vmatpush1.bf16.msra.mxu1 %v12249_v53 }
 0x48f   :  { %4851 = vmatprep.subr.bf16.mxu0 %v12254_v54  ;;  %4933 = vmatprep.subr.bf16.mxu1 %v12257_v56 }
 0x492   :  { %4852 = vmatpush1.bf16.msra.mxu0 %v12252_v57  ;;  %4934 = vmatpush1.bf16.msra.mxu1 %v12255_v58 }
 0x493   :  { %4853 = vmatprep.subr.bf16.mxu0 %v12260_v59  ;;  %4935 = vmatprep.subr.bf16.mxu1 %v12263_v60 }
 0x496   :  { %4854 = vmatpush1.bf16.msra.mxu0 %v12258_v61  ;;  %4936 = vmatpush1.bf16.msra.mxu1 %v12261_v62 }
 0x497   :  { %4855 = vmatprep.subr.bf16.mxu0 %v12266_v0  ;;  %4937 = vmatprep.subr.bf16.mxu1 %v12269_v2  ;;  %v12318_v0 = vld [vmem:[%s17218_s12 + $0x200] ss:$16 sps:$4 sm:$0xff]   ;;  %v12321_v2 = vld [vmem:[%s17218_s12 + $0x208] ss:$16 sps:$4 sm:$0xff]  }
 0x49a   :  { %4856 = vmatpush1.bf16.msra.mxu0 %v12264_v3  ;;  %4938 = vmatpush1.bf16.msra.mxu1 %v12267_v4 }
 0x49b   :  { %4857 = vmatprep.subr.bf16.mxu0 %v12272_v6  ;;  %4939 = vmatprep.subr.bf16.mxu1 %v12275_v7  ;;  %v12326_v6 = vld [vmem:[%s17218_s12 + $0x224] ss:$16 sps:$4 sm:$0xff]   ;;  %v12329_v7 = vld [vmem:[%s17218_s12 + $0x22c] ss:$16 sps:$4 sm:$0xff]  }
 0x49e   :  { %4858 = vmatpush1.bf16.msra.mxu0 %v12270_v8  ;;  %4940 = vmatpush1.bf16.msra.mxu1 %v12273_v50  ;;  %v12324_v50 = vld [vmem:[%s17218_s12 + $0x220] ss:$16 sps:$4 sm:$0xff]  }
 0x49f   :  { %4859 = vmatprep.subr.bf16.mxu0 %v12278_v9  ;;  %4941 = vmatprep.subr.bf16.mxu1 %v12281_v10  ;;  %v12327_v9 = vld [vmem:[%s17218_s12 + $0x228] ss:$16 sps:$4 sm:$0xff]  }
 0x4a2   :  { %4860 = vmatpush1.bf16.msra.mxu0 %v12276_v16  ;;  %4942 = vmatpush1.bf16.msra.mxu1 %v12279_v17  ;;  %v12332_v16 = vld [vmem:[%s17218_s12 + $0x244] ss:$16 sps:$4 sm:$0xff]   ;;  %v12335_v17 = vld [vmem:[%s17218_s12 + $0x24c] ss:$16 sps:$4 sm:$0xff]  }
 0x4a3   :  { %4861 = vmatprep.subr.bf16.mxu0 %v12284_v55  ;;  %4943 = vmatprep.subr.bf16.mxu1 %v12287_v18  ;;  %v12330_v55 = vld [vmem:[%s17218_s12 + $0x240] ss:$16 sps:$4 sm:$0xff]   ;;  %v12333_v18 = vld [vmem:[%s17218_s12 + $0x248] ss:$16 sps:$4 sm:$0xff]  }
 0x4a6   :  { %4862 = vmatpush1.bf16.msra.mxu0 %v12282_v19  ;;  %4944 = vmatpush1.bf16.msra.mxu1 %v12285_v20  ;;  %v12338_v19 = vld [vmem:[%s17218_s12 + $0x264] ss:$16 sps:$4 sm:$0xff]   ;;  %v12341_v20 = vld [vmem:[%s17218_s12 + $0x26c] ss:$16 sps:$4 sm:$0xff]  }
 0x4a7   :  { %4863 = vmatprep.subr.bf16.mxu0 %v12290_v21  ;;  %4945 = vmatprep.subr.bf16.mxu1 %v12293_v22  ;;  %v12336_v21 = vld [vmem:[%s17218_s12 + $0x260] ss:$16 sps:$4 sm:$0xff]   ;;  %v12339_v22 = vld [vmem:[%s17218_s12 + $0x268] ss:$16 sps:$4 sm:$0xff]  }
 0x4aa   :  { %4864 = vmatpush1.bf16.msra.mxu0 %v12288_v25  ;;  %4946 = vmatpush1.bf16.msra.mxu1 %v12291_v26  ;;  %v12344_v25 = vld [vmem:[%s17218_s12 + $0x284] ss:$16 sps:$4 sm:$0xff]   ;;  %v12347_v26 = vld [vmem:[%s17218_s12 + $0x28c] ss:$16 sps:$4 sm:$0xff]  }
 0x4ab   :  { %4865 = vmatprep.subr.bf16.mxu0 %v12296_v63  ;;  %4947 = vmatprep.subr.bf16.mxu1 %v12299_v30  ;;  %v12342_v63 = vld [vmem:[%s17218_s12 + $0x280] ss:$16 sps:$4 sm:$0xff]   ;;  %v12345_v30 = vld [vmem:[%s17218_s12 + $0x288] ss:$16 sps:$4 sm:$0xff]  }
 0x4ae   :  { %4866 = vmatpush1.bf16.msra.mxu0 %v12294_v31  ;;  %4948 = vmatpush1.bf16.msra.mxu1 %v12297_v33  ;;  %v12350_v31 = vld [vmem:[%s17218_s12 + $0x2a4] ss:$16 sps:$4 sm:$0xff]   ;;  %v12353_v33 = vld [vmem:[%s17218_s12 + $0x2ac] ss:$16 sps:$4 sm:$0xff]  }
 0x4af   :  { %4867 = vmatprep.subr.bf16.mxu0 %v12302_v34  ;;  %4949 = vmatprep.subr.bf16.mxu1 %v12305_v5  ;;  %v12348_v34 = vld [vmem:[%s17218_s12 + $0x2a0] ss:$16 sps:$4 sm:$0xff]   ;;  %v12351_v5 = vld [vmem:[%s17218_s12 + $0x2a8] ss:$16 sps:$4 sm:$0xff]  }
 0x4b2   :  { %4868 = vmatpush1.bf16.msra.mxu0 %v12300_v35  ;;  %4950 = vmatpush1.bf16.msra.mxu1 %v12303_v36  ;;  %v12356_v35 = vld [vmem:[%s17218_s12 + $0x2c4] ss:$16 sps:$4 sm:$0xff]   ;;  %v12359_v36 = vld [vmem:[%s17218_s12 + $0x2cc] ss:$16 sps:$4 sm:$0xff]  }
 0x4b3   :  { %4869 = vmatprep.subr.bf16.mxu0 %v12308_v13  ;;  %4951 = vmatprep.subr.bf16.mxu1 %v12311_v37  ;;  %v12354_v13 = vld [vmem:[%s17218_s12 + $0x2c0] ss:$16 sps:$4 sm:$0xff]   ;;  %v12357_v37 = vld [vmem:[%s17218_s12 + $0x2c8] ss:$16 sps:$4 sm:$0xff]  }
 0x4b6   :  { %4870 = vmatpush1.bf16.msra.mxu0 %v12306_v38  ;;  %4952 = vmatpush1.bf16.msra.mxu1 %v12309_v40  ;;  %v12362_v38 = vld [vmem:[%s17218_s12 + $0x2e4] ss:$16 sps:$4 sm:$0xff]   ;;  %v12365_v40 = vld [vmem:[%s17218_s12 + $0x2ec] ss:$16 sps:$4 sm:$0xff]  }
 0x4b7   :  { %4871 = vmatprep.subr.bf16.mxu0 %v12314_v24  ;;  %4953 = vmatprep.subr.bf16.mxu1 %v12317_v41  ;;  %v12360_v24 = vld [vmem:[%s17218_s12 + $0x2e0] ss:$16 sps:$4 sm:$0xff]   ;;  %v12363_v41 = vld [vmem:[%s17218_s12 + $0x2e8] ss:$16 sps:$4 sm:$0xff]  }
 0x4ba   :  { %4872 = vmatpush1.bf16.msra.mxu0 %v12312_v42  ;;  %4954 = vmatpush1.bf16.msra.mxu1 %v12315_v43  ;;  %v12368_v42 = vld [vmem:[%s17218_s12 + $0x304] ss:$16 sps:$4 sm:$0xff]   ;;  %v12371_v43 = vld [vmem:[%s17218_s12 + $0x30c] ss:$16 sps:$4 sm:$0xff]  }
 0x4bb   :  { %4882 = vmatprep.subr.bf16.mxu0 %v12320_v44  ;;  %4964 = vmatprep.subr.bf16.mxu1 %v12323_v45  ;;  %v12366_v44 = vld [vmem:[%s17218_s12 + $0x300] ss:$16 sps:$4 sm:$0xff]   ;;  %v12369_v45 = vld [vmem:[%s17218_s12 + $0x308] ss:$16 sps:$4 sm:$0xff]  }
 0x550   :  { %v3954_v49 = vpop.f32.mrb[16].mxu0  ;;  %v15200_v51 = vpop.f32.mrb[16].mxu1 }
 0x551   :  { %v11350_v52 = vadd.f32 %v3954_v49, %v3222_v47  ;;  %v3956_v11 = vpop.f32.mrb[17].mxu0  ;;  %v4038_v53 = vpop.f32.mrb[17].mxu1  ;;  %v12374_v47 = vld [vmem:[%s17218_s12 + $0x324] ss:$16 sps:$4 sm:$0xff]   ;;  %v12375_v49 = vld [vmem:[%s17218_s12 + $0x328] ss:$16 sps:$4 sm:$0xff]  }
 0x552   :  { %v11351_v54 = vadd.f32 %v3956_v11, %v3226_v28  ;;  %v11353_v56 = vadd.f32 %v4038_v53, %v3234_v48  ;;  %v3958_v57 = vpop.f32.mrb[18].mxu0  ;;  %v4040_v58 = vpop.f32.mrb[18].mxu1  ;;  %v12377_v28 = vld [vmem:[%s17218_s12 + $0x32c] ss:$16 sps:$4 sm:$0xff]   ;;  %v12372_v48 = vld [vmem:[%s17218_s12 + $0x320] ss:$16 sps:$4 sm:$0xff]  }
 0x553   :  { %v4043_v59 = vmax.f32 %v11350_v52, 0.0  ;;  %v3959_v60 = vpop.f32.mrb[19].mxu0  ;;  %v4041_v61 = vpop.f32.mrb[19].mxu1  ;;  %v12380_v52 = vld [vmem:[%s17218_s12 + $0x344] ss:$16 sps:$4 sm:$0xff]  }
 0x554   :  { %v4044_v62 = vmax.f32 %v11351_v54, 0.0  ;;  %v4046_v3 = vmax.f32 %v11353_v56, 0.0  ;;  %v12383_v11 = vld [vmem:[%s17218_s12 + $0x34c] ss:$16 sps:$4 sm:$0xff]   ;;  %v12378_v53 = vld [vmem:[%s17218_s12 + $0x340] ss:$16 sps:$4 sm:$0xff]  }
 0x555   :  { %v4047_v8 = vpack.c.bf16 %v4043_v59, %v4043_v59  ;;  %v12381_v54 = vld [vmem:[%s17218_s12 + $0x348] ss:$16 sps:$4 sm:$0xff]   ;;  %v12386_v56 = vld [vmem:[%s17218_s12 + $0x364] ss:$16 sps:$4 sm:$0xff]   ;;  %v12389_v57 = vld [vmem:[%s17218_s12 + $0x36c] ss:$16 sps:$4 sm:$0xff]  }
 0x556   :  { %v4048_v4 = vpack.c.bf16 %v4044_v62, %v4044_v62  ;;  %v4050_v10 = vpack.c.bf16 %v4046_v3, %v4046_v3  ;;  %v12384_v58 = vld [vmem:[%s17218_s12 + $0x360] ss:$16 sps:$4 sm:$0xff]   ;;  %v12387_v59 = vld [vmem:[%s17218_s12 + $0x368] ss:$16 sps:$4 sm:$0xff]   ;;  %v12392_v60 = vld [vmem:[%s17218_s12 + $0x384] ss:$16 sps:$4 sm:$0xff]  }
 0x557   :  { %v12395_v61 = vld [vmem:[%s17218_s12 + $0x38c] ss:$16 sps:$4 sm:$0xff]   ;;  %v12390_v62 = vld [vmem:[%s17218_s12 + $0x380] ss:$16 sps:$4 sm:$0xff]  }
 0x558   :  { %4873 = vmatprep.mubr.bf16.mxu0 %v4048_v4  ;;  %4955 = vmatprep.mubr.bf16.mxu1 %v4048_v4  ;;  %v12401_v3 = vld [vmem:[%s17218_s12 + $0x3ac] ss:$16 sps:$4 sm:$0xff]   ;;  %v12396_v4 = vld [vmem:[%s17218_s12 + $0x3a0] ss:$16 sps:$4 sm:$0xff]  }
 0x559   :  { %4874 = vmatmul.mubr.bf16.vlgmr.msra.gmra.mrb[20].mxu0 %v4047_v8  ;;  %4956 = vmatmul.mubr.bf16.vlgmr.msra.gmra.mrb[20].mxu1 %v4047_v8  ;;  %v12404_v8 = vld [vmem:[%s17218_s12 + $0x3c4] ss:$16 sps:$4 sm:$0xff]  }
 0x55a   :  { %4883 = vmatpush1.bf16.msra.mxu0 %v12318_v0  ;;  %4965 = vmatpush1.bf16.msra.mxu1 %v12321_v2  ;;  %v12393_v0 = vld [vmem:[%s17218_s12 + $0x388] ss:$16 sps:$4 sm:$0xff]   ;;  %v12398_v2 = vld [vmem:[%s17218_s12 + $0x3a4] ss:$16 sps:$4 sm:$0xff]  }
 0x55b   :  { %4914 = vmatprep.mubr.bf16.mxu0 %v4050_v10  ;;  %4996 = vmatprep.mubr.bf16.mxu1 %v4050_v10 }
 0x55c   :  { %4884 = vmatprep.subr.bf16.mxu0 %v12326_v6  ;;  %4966 = vmatprep.subr.bf16.mxu1 %v12329_v7  ;;  %v12399_v6 = vld [vmem:[%s17218_s12 + $0x3a8] ss:$16 sps:$4 sm:$0xff]   ;;  %v3230_v7 = vrot.slane %v15192_v46, %v13734_v29 }
 0x55d   :  { %v12405_v46 = vld [vmem:[%s17218_s12 + $0x3c8] ss:$16 sps:$4 sm:$0xff]  }
 0x55e   :  { %4885 = vmatpush1.bf16.msra.mxu0 %v12324_v50  ;;  %4967 = vmatpush1.bf16.msra.mxu1 %v12327_v9  ;;  %v12407_v50 = vld [vmem:[%s17218_s12 + $0x3cc] ss:$16 sps:$4 sm:$0xff]   ;;  %v12402_v9 = vld [vmem:[%s17218_s12 + $0x3c0] ss:$16 sps:$4 sm:$0xff]   ;;  %v11352_v10 = vadd.f32 %v15200_v51, %v3230_v7  ;;  %v12411_v51 = vld [vmem:[%s17218_s12 + $0x3e8] ss:$16 sps:$4 sm:$0xff]  }
 0x55f   :  { %4886 = vmatprep.subr.bf16.mxu0 %v12332_v16  ;;  %4968 = vmatprep.subr.bf16.mxu1 %v12335_v17  ;;  %v12410_v16 = vld [vmem:[%s17218_s12 + $0x3e4] ss:$16 sps:$4 sm:$0xff]   ;;  %v12413_v17 = vld [vmem:[%s17218_s12 + $0x3ec] ss:$16 sps:$4 sm:$0xff]   ;;  %v12477_v7 = vld [vmem:[%s17220_s14 + $0x148] ss:$16 sps:$4 sm:$0xff]  }
 0x562   :  { %4887 = vmatpush1.bf16.msra.mxu0 %v12330_v55  ;;  %4969 = vmatpush1.bf16.msra.mxu1 %v12333_v18  ;;  %v12408_v55 = vld [vmem:[%s17218_s12 + $0x3e0] ss:$16 sps:$4 sm:$0xff]   ;;  %v4045_v18 = vmax.f32 %v11352_v10, 0.0  ;;  %v12488_v10 = vld [vmem:[%s17220_s14 + $0x184] ss:$16 sps:$4 sm:$0xff]  }
 0x563   :  { %4888 = vmatprep.subr.bf16.mxu0 %v12338_v19  ;;  %4970 = vmatprep.subr.bf16.mxu1 %v12341_v20  ;;  %v12416_v19 = vld [vmem:[%s17220_s14 + $0x4] ss:$16 sps:$4 sm:$0xff]   ;;  %v12419_v20 = vld [vmem:[%s17220_s14 + $0xc] ss:$16 sps:$4 sm:$0xff]  }
 0x566   :  { %4889 = vmatpush1.bf16.msra.mxu0 %v12336_v21  ;;  %4971 = vmatpush1.bf16.msra.mxu1 %v12339_v22  ;;  %v12414_v21 = vld [vmem:[%s17220_s14] ss:$16 sps:$4 sm:$0xff]   ;;  %v12417_v22 = vld [vmem:[%s17220_s14 + $0x8] ss:$16 sps:$4 sm:$0xff]  }
 0x567   :  { %4890 = vmatprep.subr.bf16.mxu0 %v12344_v25  ;;  %4972 = vmatprep.subr.bf16.mxu1 %v12347_v26  ;;  %v4049_v25 = vpack.c.bf16 %v4045_v18, %v4045_v18  ;;  %v12422_v26 = vld [vmem:[%s17220_s14 + $0x24] ss:$16 sps:$4 sm:$0xff]   ;;  %v12497_v18 = vld [vmem:[%s17220_s14 + $0x1ac] ss:$16 sps:$4 sm:$0xff]  }
 0x56a   :  { %4891 = vmatpush1.bf16.msra.mxu0 %v12342_v63  ;;  %4973 = vmatpush1.bf16.msra.mxu1 %v12345_v30  ;;  %v12425_v63 = vld [vmem:[%s17220_s14 + $0x2c] ss:$16 sps:$4 sm:$0xff]   ;;  %v12420_v30 = vld [vmem:[%s17220_s14 + $0x20] ss:$16 sps:$4 sm:$0xff]  }
 0x56b   :  { %4892 = vmatprep.subr.bf16.mxu0 %v12350_v31  ;;  %4974 = vmatprep.subr.bf16.mxu1 %v12353_v33  ;;  %v12423_v31 = vld [vmem:[%s17220_s14 + $0x28] ss:$16 sps:$4 sm:$0xff]   ;;  %v12428_v33 = vld [vmem:[%s17220_s14 + $0x44] ss:$16 sps:$4 sm:$0xff]  }
 0x56e   :  { %4893 = vmatpush1.bf16.msra.mxu0 %v12348_v34  ;;  %4975 = vmatpush1.bf16.msra.mxu1 %v12351_v5  ;;  %v12431_v34 = vld [vmem:[%s17220_s14 + $0x4c] ss:$16 sps:$4 sm:$0xff]   ;;  %v12426_v5 = vld [vmem:[%s17220_s14 + $0x40] ss:$16 sps:$4 sm:$0xff]  }
 0x56f   :  { %4894 = vmatprep.subr.bf16.mxu0 %v12356_v35  ;;  %4976 = vmatprep.subr.bf16.mxu1 %v12359_v36  ;;  %v12429_v35 = vld [vmem:[%s17220_s14 + $0x48] ss:$16 sps:$4 sm:$0xff]   ;;  %v12434_v36 = vld [vmem:[%s17220_s14 + $0x64] ss:$16 sps:$4 sm:$0xff]  }
 0x572   :  { %4895 = vmatpush1.bf16.msra.mxu0 %v12354_v13  ;;  %4977 = vmatpush1.bf16.msra.mxu1 %v12357_v37  ;;  %v12437_v13 = vld [vmem:[%s17220_s14 + $0x6c] ss:$16 sps:$4 sm:$0xff]   ;;  %v12432_v37 = vld [vmem:[%s17220_s14 + $0x60] ss:$16 sps:$4 sm:$0xff]  }
 0x573   :  { %4896 = vmatprep.subr.bf16.mxu0 %v12362_v38  ;;  %4978 = vmatprep.subr.bf16.mxu1 %v12365_v40  ;;  %v12435_v38 = vld [vmem:[%s17220_s14 + $0x68] ss:$16 sps:$4 sm:$0xff]   ;;  %v12440_v40 = vld [vmem:[%s17220_s14 + $0x84] ss:$16 sps:$4 sm:$0xff]  }
 0x576   :  { %4897 = vmatpush1.bf16.msra.mxu0 %v12360_v24  ;;  %4979 = vmatpush1.bf16.msra.mxu1 %v12363_v41  ;;  %v12443_v24 = vld [vmem:[%s17220_s14 + $0x8c] ss:$16 sps:$4 sm:$0xff]   ;;  %v12438_v41 = vld [vmem:[%s17220_s14 + $0x80] ss:$16 sps:$4 sm:$0xff]  }
 0x577   :  { %4898 = vmatprep.subr.bf16.mxu0 %v12368_v42  ;;  %4980 = vmatprep.subr.bf16.mxu1 %v12371_v43  ;;  %v12441_v42 = vld [vmem:[%s17220_s14 + $0x88] ss:$16 sps:$4 sm:$0xff]   ;;  %v12446_v43 = vld [vmem:[%s17220_s14 + $0xa4] ss:$16 sps:$4 sm:$0xff]  }
 0x57a   :  { %4899 = vmatpush1.bf16.msra.mxu0 %v12366_v44  ;;  %4981 = vmatpush1.bf16.msra.mxu1 %v12369_v45  ;;  %v12449_v44 = vld [vmem:[%s17220_s14 + $0xac] ss:$16 sps:$4 sm:$0xff]   ;;  %v12444_v45 = vld [vmem:[%s17220_s14 + $0xa0] ss:$16 sps:$4 sm:$0xff]  }
 0x57b   :  { %4900 = vmatprep.subr.bf16.mxu0 %v12374_v47  ;;  %4982 = vmatprep.subr.bf16.mxu1 %v12377_v28  ;;  %v12447_v47 = vld [vmem:[%s17220_s14 + $0xa8] ss:$16 sps:$4 sm:$0xff]   ;;  %v12452_v28 = vld [vmem:[%s17220_s14 + $0xc4] ss:$16 sps:$4 sm:$0xff]  }
 0x57e   :  { %4901 = vmatpush1.bf16.msra.mxu0 %v12372_v48  ;;  %4983 = vmatpush1.bf16.msra.mxu1 %v12375_v49  ;;  %v12455_v48 = vld [vmem:[%s17220_s14 + $0xcc] ss:$16 sps:$4 sm:$0xff]   ;;  %v12450_v49 = vld [vmem:[%s17220_s14 + $0xc0] ss:$16 sps:$4 sm:$0xff]  }
 0x57f   :  { %4902 = vmatprep.subr.bf16.mxu0 %v12380_v52  ;;  %4984 = vmatprep.subr.bf16.mxu1 %v12383_v11  ;;  %v12453_v52 = vld [vmem:[%s17220_s14 + $0xc8] ss:$16 sps:$4 sm:$0xff]   ;;  %v12458_v11 = vld [vmem:[%s17220_s14 + $0xe4] ss:$16 sps:$4 sm:$0xff]  }
 0x582   :  { %4903 = vmatpush1.bf16.msra.mxu0 %v12378_v53  ;;  %4985 = vmatpush1.bf16.msra.mxu1 %v12381_v54  ;;  %v12461_v53 = vld [vmem:[%s17220_s14 + $0xec] ss:$16 sps:$4 sm:$0xff]   ;;  %v12456_v54 = vld [vmem:[%s17220_s14 + $0xe0] ss:$16 sps:$4 sm:$0xff]  }
 0x583   :  { %4904 = vmatprep.subr.bf16.mxu0 %v12386_v56  ;;  %4986 = vmatprep.subr.bf16.mxu1 %v12389_v57  ;;  %v12459_v56 = vld [vmem:[%s17220_s14 + $0xe8] ss:$16 sps:$4 sm:$0xff]   ;;  %v12464_v57 = vld [vmem:[%s17220_s14 + $0x104] ss:$16 sps:$4 sm:$0xff]  }
 0x586   :  { %4905 = vmatpush1.bf16.msra.mxu0 %v12384_v58  ;;  %4987 = vmatpush1.bf16.msra.mxu1 %v12387_v59  ;;  %v12467_v58 = vld [vmem:[%s17220_s14 + $0x10c] ss:$16 sps:$4 sm:$0xff]   ;;  %v12462_v59 = vld [vmem:[%s17220_s14 + $0x100] ss:$16 sps:$4 sm:$0xff]  }
 0x587   :  { %4906 = vmatprep.subr.bf16.mxu0 %v12392_v60  ;;  %4988 = vmatprep.subr.bf16.mxu1 %v12395_v61  ;;  %v12465_v60 = vld [vmem:[%s17220_s14 + $0x108] ss:$16 sps:$4 sm:$0xff]   ;;  %v12470_v61 = vld [vmem:[%s17220_s14 + $0x124] ss:$16 sps:$4 sm:$0xff]  }
 0x58a   :  { %4907 = vmatpush1.bf16.msra.mxu0 %v12390_v62  ;;  %4989 = vmatpush1.bf16.msra.mxu1 %v12393_v0  ;;  %v12473_v62 = vld [vmem:[%s17220_s14 + $0x12c] ss:$16 sps:$4 sm:$0xff]   ;;  %v12468_v0 = vld [vmem:[%s17220_s14 + $0x120] ss:$16 sps:$4 sm:$0xff]  }
 0x58b   :  { %4908 = vmatprep.subr.bf16.mxu0 %v12398_v2  ;;  %4990 = vmatprep.subr.bf16.mxu1 %v12401_v3  ;;  %v12471_v2 = vld [vmem:[%s17220_s14 + $0x128] ss:$16 sps:$4 sm:$0xff]   ;;  %v12476_v3 = vld [vmem:[%s17220_s14 + $0x144] ss:$16 sps:$4 sm:$0xff]  }
 0x58e   :  { %4909 = vmatpush1.bf16.msra.mxu0 %v12396_v4  ;;  %4991 = vmatpush1.bf16.msra.mxu1 %v12399_v6  ;;  %v12479_v4 = vld [vmem:[%s17220_s14 + $0x14c] ss:$16 sps:$4 sm:$0xff]   ;;  %v12474_v6 = vld [vmem:[%s17220_s14 + $0x140] ss:$16 sps:$4 sm:$0xff]  }
 0x58f   :  { %4910 = vmatprep.subr.bf16.mxu0 %v12404_v8  ;;  %4992 = vmatprep.subr.bf16.mxu1 %v12407_v50  ;;  %v12482_v8 = vld [vmem:[%s17220_s14 + $0x164] ss:$16 sps:$4 sm:$0xff]   ;;  %v12485_v50 = vld [vmem:[%s17220_s14 + $0x16c] ss:$16 sps:$4 sm:$0xff]  }
 0x592   :  { %4911 = vmatpush1.bf16.msra.mxu0 %v12402_v9  ;;  %4993 = vmatpush1.bf16.msra.mxu1 %v12405_v46  ;;  %v12480_v9 = vld [vmem:[%s17220_s14 + $0x160] ss:$16 sps:$4 sm:$0xff]   ;;  %v12483_v46 = vld [vmem:[%s17220_s14 + $0x168] ss:$16 sps:$4 sm:$0xff]  }
 0x593   :  { %4912 = vmatprep.subr.bf16.mxu0 %v12410_v16  ;;  %4994 = vmatprep.subr.bf16.mxu1 %v12413_v17  ;;  %v12491_v16 = vld [vmem:[%s17220_s14 + $0x18c] ss:$16 sps:$4 sm:$0xff]   ;;  %v12486_v17 = vld [vmem:[%s17220_s14 + $0x180] ss:$16 sps:$4 sm:$0xff]  }
 0x596   :  { %4913 = vmatpush1.bf16.msra.mxu0 %v12408_v55  ;;  %4995 = vmatpush1.bf16.msra.mxu1 %v12411_v51  ;;  %v12489_v55 = vld [vmem:[%s17220_s14 + $0x188] ss:$16 sps:$4 sm:$0xff]   ;;  %v12494_v51 = vld [vmem:[%s17220_s14 + $0x1a4] ss:$16 sps:$4 sm:$0xff]  }
 0x597   :  { %5803 = vmatprep.subr.bf16.mxu0 %v12416_v19  ;;  %5885 = vmatprep.subr.bf16.mxu1 %v12419_v20  ;;  %v12492_v19 = vld [vmem:[%s17220_s14 + $0x1a0] ss:$16 sps:$4 sm:$0xff]   ;;  %v12495_v20 = vld [vmem:[%s17220_s14 + $0x1a8] ss:$16 sps:$4 sm:$0xff]  }
 0x599   :  { %4915 = vmatmul.mubr.bf16.vlgmr.msra.gmra.mrb[20].mxu0 %v4049_v25  ;;  %4997 = vmatmul.mubr.bf16.vlgmr.msra.gmra.mrb[20].mxu1 %v4049_v25  ;;  %v12498_v25 = vld [vmem:[%s17220_s14 + $0x1c0] ss:$16 sps:$4 sm:$0xff]  }
 0x59a   :  { %5804 = vmatpush1.bf16.msra.mxu0 %v12414_v21  ;;  %5886 = vmatpush1.bf16.msra.mxu1 %v12417_v22  ;;  %v12500_v21 = vld [vmem:[%s17220_s14 + $0x1c4] ss:$16 sps:$4 sm:$0xff]   ;;  %v12503_v22 = vld [vmem:[%s17220_s14 + $0x1cc] ss:$16 sps:$4 sm:$0xff]  }
 0x59b   :  { %5805 = vmatprep.subr.bf16.mxu0 %v12422_v26  ;;  %5887 = vmatprep.subr.bf16.mxu1 %v12425_v63  ;;  %v12501_v26 = vld [vmem:[%s17220_s14 + $0x1c8] ss:$16 sps:$4 sm:$0xff]   ;;  %v12506_v63 = vld [vmem:[%s17220_s14 + $0x1e4] ss:$16 sps:$4 sm:$0xff]  }
 0x59e   :  { %5806 = vmatpush1.bf16.msra.mxu0 %v12420_v30  ;;  %5888 = vmatpush1.bf16.msra.mxu1 %v12423_v31  ;;  %v12509_v30 = vld [vmem:[%s17220_s14 + $0x1ec] ss:$16 sps:$4 sm:$0xff]   ;;  %v12504_v31 = vld [vmem:[%s17220_s14 + $0x1e0] ss:$16 sps:$4 sm:$0xff]  }
 0x59f   :  { %5807 = vmatprep.subr.bf16.mxu0 %v12428_v33  ;;  %5889 = vmatprep.subr.bf16.mxu1 %v12431_v34  ;;  %v12507_v33 = vld [vmem:[%s17220_s14 + $0x1e8] ss:$16 sps:$4 sm:$0xff]   ;;  %v12512_v34 = vld [vmem:[%s17220_s14 + $0x204] ss:$16 sps:$4 sm:$0xff]  }
 0x5a2   :  { %5808 = vmatpush1.bf16.msra.mxu0 %v12426_v5  ;;  %5890 = vmatpush1.bf16.msra.mxu1 %v12429_v35  ;;  %v12515_v5 = vld [vmem:[%s17220_s14 + $0x20c] ss:$16 sps:$4 sm:$0xff]   ;;  %v15592_v35 = vld [vmem:[%s17223_s13] sm:$0xf] }
 0x5a3   :  { %5809 = vmatprep.subr.bf16.mxu0 %v12434_v36  ;;  %5891 = vmatprep.subr.bf16.mxu1 %v12437_v13  ;;  %v4184_v36 = vrot.slane %v15592_v35, %v13562_v12  ;;  %v4188_v13 = vrot.slane %v15592_v35, %v13570_v14 }
 0x5a6   :  { %5810 = vmatpush1.bf16.msra.mxu0 %v12432_v37  ;;  %5892 = vmatpush1.bf16.msra.mxu1 %v12435_v38  ;;  %v4196_v37 = vrot.slane %v15592_v35, %v13573_v15 }
 0x5a7   :  { %5811 = vmatprep.subr.bf16.mxu0 %v12440_v40  ;;  %5893 = vmatprep.subr.bf16.mxu1 %v12443_v24 }
 0x5aa   :  { %5812 = vmatpush1.bf16.msra.mxu0 %v12438_v41  ;;  %5894 = vmatpush1.bf16.msra.mxu1 %v12441_v42 }
 0x5ab   :  { %5813 = vmatprep.subr.bf16.mxu0 %v12446_v43  ;;  %5895 = vmatprep.subr.bf16.mxu1 %v12449_v44 }
 0x5ae   :  { %5814 = vmatpush1.bf16.msra.mxu0 %v12444_v45  ;;  %5896 = vmatpush1.bf16.msra.mxu1 %v12447_v47 }
 0x5af   :  { %5815 = vmatprep.subr.bf16.mxu0 %v12452_v28  ;;  %5897 = vmatprep.subr.bf16.mxu1 %v12455_v48 }
 0x5b2   :  { %5816 = vmatpush1.bf16.msra.mxu0 %v12450_v49  ;;  %5898 = vmatpush1.bf16.msra.mxu1 %v12453_v52 }
 0x5b3   :  { %5817 = vmatprep.subr.bf16.mxu0 %v12458_v11  ;;  %5899 = vmatprep.subr.bf16.mxu1 %v12461_v53 }
 0x5b6   :  { %5818 = vmatpush1.bf16.msra.mxu0 %v12456_v54  ;;  %5900 = vmatpush1.bf16.msra.mxu1 %v12459_v56  ;;  %v12510_v54 = vld [vmem:[%s17220_s14 + $0x200] ss:$16 sps:$4 sm:$0xff]   ;;  %v12513_v56 = vld [vmem:[%s17220_s14 + $0x208] ss:$16 sps:$4 sm:$0xff]  }
 0x5b7   :  { %5819 = vmatprep.subr.bf16.mxu0 %v12464_v57  ;;  %5901 = vmatprep.subr.bf16.mxu1 %v12467_v58  ;;  %v12518_v58 = vld [vmem:[%s17220_s14 + $0x224] ss:$16 sps:$4 sm:$0xff]  }
 0x5ba   :  { %5820 = vmatpush1.bf16.msra.mxu0 %v12462_v59  ;;  %5902 = vmatpush1.bf16.msra.mxu1 %v12465_v60  ;;  %v12521_v59 = vld [vmem:[%s17220_s14 + $0x22c] ss:$16 sps:$4 sm:$0xff]  }
 0x5bb   :  { %5821 = vmatprep.subr.bf16.mxu0 %v12470_v61  ;;  %5903 = vmatprep.subr.bf16.mxu1 %v12473_v62  ;;  %v12516_v61 = vld [vmem:[%s17220_s14 + $0x220] ss:$16 sps:$4 sm:$0xff]   ;;  %v12519_v62 = vld [vmem:[%s17220_s14 + $0x228] ss:$16 sps:$4 sm:$0xff]  }
 0x5be   :  { %5822 = vmatpush1.bf16.msra.mxu0 %v12468_v0  ;;  %5904 = vmatpush1.bf16.msra.mxu1 %v12471_v2  ;;  %v12524_v0 = vld [vmem:[%s17220_s14 + $0x244] ss:$16 sps:$4 sm:$0xff]   ;;  %v12527_v2 = vld [vmem:[%s17220_s14 + $0x24c] ss:$16 sps:$4 sm:$0xff]  }
 0x5bf   :  { %5823 = vmatprep.subr.bf16.mxu0 %v12476_v3  ;;  %5905 = vmatprep.subr.bf16.mxu1 %v12479_v4  ;;  %v12522_v3 = vld [vmem:[%s17220_s14 + $0x240] ss:$16 sps:$4 sm:$0xff]   ;;  %v12525_v4 = vld [vmem:[%s17220_s14 + $0x248] ss:$16 sps:$4 sm:$0xff]  }
 0x5c2   :  { %5824 = vmatpush1.bf16.msra.mxu0 %v12474_v6  ;;  %5906 = vmatpush1.bf16.msra.mxu1 %v12477_v7  ;;  %v12530_v6 = vld [vmem:[%s17220_s14 + $0x264] ss:$16 sps:$4 sm:$0xff]   ;;  %v12533_v7 = vld [vmem:[%s17220_s14 + $0x26c] ss:$16 sps:$4 sm:$0xff]  }
 0x5c3   :  { %5825 = vmatprep.subr.bf16.mxu0 %v12482_v8  ;;  %5907 = vmatprep.subr.bf16.mxu1 %v12485_v50  ;;  %v12528_v8 = vld [vmem:[%s17220_s14 + $0x260] ss:$16 sps:$4 sm:$0xff]   ;;  %v12531_v50 = vld [vmem:[%s17220_s14 + $0x268] ss:$16 sps:$4 sm:$0xff]  }
 0x5c6   :  { %5826 = vmatpush1.bf16.msra.mxu0 %v12480_v9  ;;  %5908 = vmatpush1.bf16.msra.mxu1 %v12483_v46  ;;  %v12536_v9 = vld [vmem:[%s17220_s14 + $0x284] ss:$16 sps:$4 sm:$0xff]   ;;  %v12539_v46 = vld [vmem:[%s17220_s14 + $0x28c] ss:$16 sps:$4 sm:$0xff]  }
 0x5c7   :  { %5827 = vmatprep.subr.bf16.mxu0 %v12488_v10  ;;  %5909 = vmatprep.subr.bf16.mxu1 %v12491_v16  ;;  %v12534_v10 = vld [vmem:[%s17220_s14 + $0x280] ss:$16 sps:$4 sm:$0xff]   ;;  %v12537_v16 = vld [vmem:[%s17220_s14 + $0x288] ss:$16 sps:$4 sm:$0xff]  }
 0x5ca   :  { %5828 = vmatpush1.bf16.msra.mxu0 %v12486_v17  ;;  %5910 = vmatpush1.bf16.msra.mxu1 %v12489_v55  ;;  %v12542_v17 = vld [vmem:[%s17220_s14 + $0x2a4] ss:$16 sps:$4 sm:$0xff]   ;;  %v12545_v55 = vld [vmem:[%s17220_s14 + $0x2ac] ss:$16 sps:$4 sm:$0xff]  }
 0x5cb   :  { %5829 = vmatprep.subr.bf16.mxu0 %v12494_v51  ;;  %5911 = vmatprep.subr.bf16.mxu1 %v12497_v18  ;;  %v12540_v51 = vld [vmem:[%s17220_s14 + $0x2a0] ss:$16 sps:$4 sm:$0xff]   ;;  %v12543_v18 = vld [vmem:[%s17220_s14 + $0x2a8] ss:$16 sps:$4 sm:$0xff]  }
 0x5ce   :  { %5830 = vmatpush1.bf16.msra.mxu0 %v12492_v19  ;;  %5912 = vmatpush1.bf16.msra.mxu1 %v12495_v20  ;;  %v12548_v19 = vld [vmem:[%s17220_s14 + $0x2c4] ss:$16 sps:$4 sm:$0xff]   ;;  %v12551_v20 = vld [vmem:[%s17220_s14 + $0x2cc] ss:$16 sps:$4 sm:$0xff]  }
 0x5cf   :  { %5831 = vmatprep.subr.bf16.mxu0 %v12500_v21  ;;  %5913 = vmatprep.subr.bf16.mxu1 %v12503_v22  ;;  %v12546_v21 = vld [vmem:[%s17220_s14 + $0x2c0] ss:$16 sps:$4 sm:$0xff]   ;;  %v12549_v22 = vld [vmem:[%s17220_s14 + $0x2c8] ss:$16 sps:$4 sm:$0xff]  }
 0x5d2   :  { %5832 = vmatpush1.bf16.msra.mxu0 %v12498_v25  ;;  %5914 = vmatpush1.bf16.msra.mxu1 %v12501_v26  ;;  %v12554_v25 = vld [vmem:[%s17220_s14 + $0x2e4] ss:$16 sps:$4 sm:$0xff]   ;;  %v12557_v26 = vld [vmem:[%s17220_s14 + $0x2ec] ss:$16 sps:$4 sm:$0xff]  }
 0x5d3   :  { %5833 = vmatprep.subr.bf16.mxu0 %v12506_v63  ;;  %5915 = vmatprep.subr.bf16.mxu1 %v12509_v30  ;;  %v12552_v63 = vld [vmem:[%s17220_s14 + $0x2e0] ss:$16 sps:$4 sm:$0xff]   ;;  %v12555_v30 = vld [vmem:[%s17220_s14 + $0x2e8] ss:$16 sps:$4 sm:$0xff]  }
 0x5d6   :  { %5834 = vmatpush1.bf16.msra.mxu0 %v12504_v31  ;;  %5916 = vmatpush1.bf16.msra.mxu1 %v12507_v33  ;;  %v12560_v31 = vld [vmem:[%s17220_s14 + $0x304] ss:$16 sps:$4 sm:$0xff]   ;;  %v12563_v33 = vld [vmem:[%s17220_s14 + $0x30c] ss:$16 sps:$4 sm:$0xff]  }
 0x5d7   :  { %5844 = vmatprep.subr.bf16.mxu0 %v12512_v34  ;;  %5926 = vmatprep.subr.bf16.mxu1 %v12515_v5  ;;  %v12558_v34 = vld [vmem:[%s17220_s14 + $0x300] ss:$16 sps:$4 sm:$0xff]   ;;  %v12561_v5 = vld [vmem:[%s17220_s14 + $0x308] ss:$16 sps:$4 sm:$0xff]  }
 0x66c   :  { %v4916_v38 = vpop.f32.mrb[20].mxu0  ;;  %v15600_v40 = vpop.f32.mrb[20].mxu1 }
 0x66d   :  { %v11354_v24 = vadd.f32 %v4916_v38, %v4184_v36  ;;  %v4918_v41 = vpop.f32.mrb[21].mxu0  ;;  %v5000_v42 = vpop.f32.mrb[21].mxu1  ;;  %v12566_v36 = vld [vmem:[%s17220_s14 + $0x324] ss:$16 sps:$4 sm:$0xff]   ;;  %v12567_v38 = vld [vmem:[%s17220_s14 + $0x328] ss:$16 sps:$4 sm:$0xff]  }
 0x66e   :  { %v11355_v43 = vadd.f32 %v4918_v41, %v4188_v13  ;;  %v11357_v44 = vadd.f32 %v5000_v42, %v4196_v37  ;;  %v4920_v45 = vpop.f32.mrb[22].mxu0  ;;  %v5002_v47 = vpop.f32.mrb[22].mxu1  ;;  %v12569_v13 = vld [vmem:[%s17220_s14 + $0x32c] ss:$16 sps:$4 sm:$0xff]   ;;  %v12564_v37 = vld [vmem:[%s17220_s14 + $0x320] ss:$16 sps:$4 sm:$0xff]  }
 0x66f   :  { %v5005_v28 = vmax.f32 %v11354_v24, 0.0  ;;  %v4921_v48 = vpop.f32.mrb[23].mxu0  ;;  %v5003_v49 = vpop.f32.mrb[23].mxu1  ;;  %v12572_v24 = vld [vmem:[%s17220_s14 + $0x344] ss:$16 sps:$4 sm:$0xff]  }
 0x670   :  { %v5006_v52 = vmax.f32 %v11355_v43, 0.0  ;;  %v5008_v11 = vmax.f32 %v11357_v44, 0.0  ;;  %v12575_v41 = vld [vmem:[%s17220_s14 + $0x34c] ss:$16 sps:$4 sm:$0xff]   ;;  %v12570_v42 = vld [vmem:[%s17220_s14 + $0x340] ss:$16 sps:$4 sm:$0xff]  }
 0x671   :  { %v5009_v57 = vpack.c.bf16 %v5005_v28, %v5005_v28  ;;  %v12573_v43 = vld [vmem:[%s17220_s14 + $0x348] ss:$16 sps:$4 sm:$0xff]   ;;  %v12578_v44 = vld [vmem:[%s17220_s14 + $0x364] ss:$16 sps:$4 sm:$0xff]   ;;  %v12581_v45 = vld [vmem:[%s17220_s14 + $0x36c] ss:$16 sps:$4 sm:$0xff]  }
 0x672   :  { %v5010_v53 = vpack.c.bf16 %v5006_v52, %v5006_v52  ;;  %v5012_v60 = vpack.c.bf16 %v5008_v11, %v5008_v11  ;;  %v12576_v47 = vld [vmem:[%s17220_s14 + $0x360] ss:$16 sps:$4 sm:$0xff]   ;;  %v12579_v28 = vld [vmem:[%s17220_s14 + $0x368] ss:$16 sps:$4 sm:$0xff]   ;;  %v12584_v48 = vld [vmem:[%s17220_s14 + $0x384] ss:$16 sps:$4 sm:$0xff]  }
 0x673   :  { %v12587_v49 = vld [vmem:[%s17220_s14 + $0x38c] ss:$16 sps:$4 sm:$0xff]   ;;  %v12582_v52 = vld [vmem:[%s17220_s14 + $0x380] ss:$16 sps:$4 sm:$0xff]   ;;  %v12585_v11 = vld [vmem:[%s17220_s14 + $0x388] ss:$16 sps:$4 sm:$0xff]  }
 0x674   :  { %5835 = vmatprep.mubr.bf16.mxu0 %v5010_v53  ;;  %5917 = vmatprep.mubr.bf16.mxu1 %v5010_v53  ;;  %v12590_v53 = vld [vmem:[%s17220_s14 + $0x3a4] ss:$16 sps:$4 sm:$0xff]  }
 0x675   :  { %5836 = vmatmul.mubr.bf16.vlgmr.msra.gmra.mrb[24].mxu0 %v5009_v57  ;;  %5918 = vmatmul.mubr.bf16.vlgmr.msra.gmra.mrb[24].mxu1 %v5009_v57  ;;  %v12591_v57 = vld [vmem:[%s17220_s14 + $0x3a8] ss:$16 sps:$4 sm:$0xff]  }
 0x676   :  { %5845 = vmatpush1.bf16.msra.mxu0 %v12510_v54  ;;  %5927 = vmatpush1.bf16.msra.mxu1 %v12513_v56  ;;  %v12593_v54 = vld [vmem:[%s17220_s14 + $0x3ac] ss:$16 sps:$4 sm:$0xff]   ;;  %v12588_v56 = vld [vmem:[%s17220_s14 + $0x3a0] ss:$16 sps:$4 sm:$0xff]  }
 0x677   :  { %5876 = vmatprep.mubr.bf16.mxu0 %v5012_v60  ;;  %5958 = vmatprep.mubr.bf16.mxu1 %v5012_v60  ;;  %v12599_v60 = vld [vmem:[%s17220_s14 + $0x3cc] ss:$16 sps:$4 sm:$0xff]  }
 0x678   :  { %5846 = vmatprep.subr.bf16.mxu0 %v12518_v58  ;;  %5928 = vmatprep.subr.bf16.mxu1 %v12521_v59  ;;  %v4192_v58 = vrot.slane %v15592_v35, %v13734_v29  ;;  %v12596_v59 = vld [vmem:[%s17220_s14 + $0x3c4] ss:$16 sps:$4 sm:$0xff]   ;;  %v12597_v35 = vld [vmem:[%s17220_s14 + $0x3c8] ss:$16 sps:$4 sm:$0xff]  }
 0x67a   :  { %5847 = vmatpush1.bf16.msra.mxu0 %v12516_v61  ;;  %5929 = vmatpush1.bf16.msra.mxu1 %v12519_v62  ;;  %v12594_v61 = vld [vmem:[%s17220_s14 + $0x3c0] ss:$16 sps:$4 sm:$0xff]   ;;  %v11356_v62 = vadd.f32 %v15600_v40, %v4192_v58  ;;  %v12603_v40 = vld [vmem:[%s17220_s14 + $0x3e8] ss:$16 sps:$4 sm:$0xff]  }
 0x67b   :  { %5848 = vmatprep.subr.bf16.mxu0 %v12524_v0  ;;  %5930 = vmatprep.subr.bf16.mxu1 %v12527_v2  ;;  %v12602_v0 = vld [vmem:[%s17220_s14 + $0x3e4] ss:$16 sps:$4 sm:$0xff]   ;;  %v12605_v2 = vld [vmem:[%s17220_s14 + $0x3ec] ss:$16 sps:$4 sm:$0xff]  }
 0x67e   :  { %5849 = vmatpush1.bf16.msra.mxu0 %v12522_v3  ;;  %5931 = vmatpush1.bf16.msra.mxu1 %v12525_v4  ;;  %v12600_v3 = vld [vmem:[%s17220_s14 + $0x3e0] ss:$16 sps:$4 sm:$0xff]   ;;  %v5007_v4 = vmax.f32 %v11356_v62, 0.0 }
 0x67f   :  { %5850 = vmatprep.subr.bf16.mxu0 %v12530_v6  ;;  %5932 = vmatprep.subr.bf16.mxu1 %v12533_v7  ;;  %v12606_v6 = vld [vmem:[%s17222_s16 + $0x40] sm:$0xff]  }
 0x680   :  { %v12607_v7 = vld [vmem:[%s17222_s16 + $0xc0] sm:$0xff]  }
 0x682   :  { %5851 = vmatpush1.bf16.msra.mxu0 %v12528_v8  ;;  %5933 = vmatpush1.bf16.msra.mxu1 %v12531_v50  ;;  %v12608_v8 = vld [vmem:[%s17222_s16] sm:$0xff]  }
 0x683   :  { %5852 = vmatprep.subr.bf16.mxu0 %v12536_v9  ;;  %5934 = vmatprep.subr.bf16.mxu1 %v12539_v46  ;;  %v12609_v50 = vld [vmem:[%s17222_s16 + $0x80] sm:$0xff]   ;;  %v5011_v9 = vpack.c.bf16 %v5007_v4, %v5007_v4  ;;  %v12610_v46 = vld [vmem:[%s17222_s16 + $0x48] sm:$0xff]  }
 0x686   :  { %5853 = vmatpush1.bf16.msra.mxu0 %v12534_v10  ;;  %5935 = vmatpush1.bf16.msra.mxu1 %v12537_v16  ;;  %v12611_v10 = vld [vmem:[%s17222_s16 + $0xc8] sm:$0xff]  }
 0x687   :  { %5854 = vmatprep.subr.bf16.mxu0 %v12542_v17  ;;  %5936 = vmatprep.subr.bf16.mxu1 %v12545_v55  ;;  %v12612_v16 = vld [vmem:[%s17222_s16 + $0x8] sm:$0xff]   ;;  %v12614_v55 = vld [vmem:[%s17222_s16 + $0x50] sm:$0xff]  }
 0x688   :  { %v12613_v17 = vld [vmem:[%s17222_s16 + $0x88] sm:$0xff]  }
 0x68a   :  { %5855 = vmatpush1.bf16.msra.mxu0 %v12540_v51  ;;  %5937 = vmatpush1.bf16.msra.mxu1 %v12543_v18  ;;  %v12615_v51 = vld [vmem:[%s17222_s16 + $0xd0] sm:$0xff]  }
 0x68b   :  { %5856 = vmatprep.subr.bf16.mxu0 %v12548_v19  ;;  %5938 = vmatprep.subr.bf16.mxu1 %v12551_v20  ;;  %v12616_v18 = vld [vmem:[%s17222_s16 + $0x10] sm:$0xff]   ;;  %v12618_v20 = vld [vmem:[%s17222_s16 + $0x58] sm:$0xff]  }
 0x68c   :  { %v12617_v19 = vld [vmem:[%s17222_s16 + $0x90] sm:$0xff]  }
 0x68e   :  { %5857 = vmatpush1.bf16.msra.mxu0 %v12546_v21  ;;  %5939 = vmatpush1.bf16.msra.mxu1 %v12549_v22  ;;  %v12619_v21 = vld [vmem:[%s17222_s16 + $0xd8] sm:$0xff]  }
 0x68f   :  { %5858 = vmatprep.subr.bf16.mxu0 %v12554_v25  ;;  %5940 = vmatprep.subr.bf16.mxu1 %v12557_v26  ;;  %v12620_v22 = vld [vmem:[%s17222_s16 + $0x18] sm:$0xff]   ;;  %v12622_v26 = vld [vmem:[%s17222_s16 + $0x60] sm:$0xff]  }
 0x690   :  { %v12621_v25 = vld [vmem:[%s17222_s16 + $0x98] sm:$0xff]  }
 0x692   :  { %5859 = vmatpush1.bf16.msra.mxu0 %v12552_v63  ;;  %5941 = vmatpush1.bf16.msra.mxu1 %v12555_v30  ;;  %v12623_v63 = vld [vmem:[%s17222_s16 + $0xe0] sm:$0xff]  }
 0x693   :  { %5860 = vmatprep.subr.bf16.mxu0 %v12560_v31  ;;  %5942 = vmatprep.subr.bf16.mxu1 %v12563_v33  ;;  %v12624_v30 = vld [vmem:[%s17222_s16 + $0x20] sm:$0xff]   ;;  %v12626_v33 = vld [vmem:[%s17222_s16 + $0x68] sm:$0xff]  }
 0x694   :  { %v12625_v31 = vld [vmem:[%s17222_s16 + $0xa0] sm:$0xff]  }
 0x696   :  { %5861 = vmatpush1.bf16.msra.mxu0 %v12558_v34  ;;  %5943 = vmatpush1.bf16.msra.mxu1 %v12561_v5  ;;  %v12627_v34 = vld [vmem:[%s17222_s16 + $0xe8] sm:$0xff]  }
 0x697   :  { %5862 = vmatprep.subr.bf16.mxu0 %v12566_v36  ;;  %5944 = vmatprep.subr.bf16.mxu1 %v12569_v13  ;;  %v12628_v5 = vld [vmem:[%s17222_s16 + $0x28] sm:$0xff]   ;;  %v12630_v13 = vld [vmem:[%s17222_s16 + $0x70] sm:$0xff]  }
 0x698   :  { %v12629_v36 = vld [vmem:[%s17222_s16 + $0xa8] sm:$0xff]  }
 0x69a   :  { %5863 = vmatpush1.bf16.msra.mxu0 %v12564_v37  ;;  %5945 = vmatpush1.bf16.msra.mxu1 %v12567_v38  ;;  %v12631_v37 = vld [vmem:[%s17222_s16 + $0xf0] sm:$0xff]  }
 0x69b   :  { %5864 = vmatprep.subr.bf16.mxu0 %v12572_v24  ;;  %5946 = vmatprep.subr.bf16.mxu1 %v12575_v41  ;;  %v12632_v38 = vld [vmem:[%s17222_s16 + $0x30] sm:$0xff]   ;;  %v12634_v41 = vld [vmem:[%s17222_s16 + $0x78] sm:$0xff]  }
 0x69c   :  { %v12633_v24 = vld [vmem:[%s17222_s16 + $0xb0] sm:$0xff]  }
 0x69e   :  { %5865 = vmatpush1.bf16.msra.mxu0 %v12570_v42  ;;  %5947 = vmatpush1.bf16.msra.mxu1 %v12573_v43  ;;  %v12635_v42 = vld [vmem:[%s17222_s16 + $0xf8] sm:$0xff]  }
 0x69f   :  { %5866 = vmatprep.subr.bf16.mxu0 %v12578_v44  ;;  %5948 = vmatprep.subr.bf16.mxu1 %v12581_v45  ;;  %v12636_v43 = vld [vmem:[%s17222_s16 + $0x38] sm:$0xff]   ;;  %v12640_v45 = vld [vmem:[%s17216_s10 + $0x404] ss:$16 sps:$4 sm:$0xff]  }
 0x6a0   :  { %v12637_v44 = vld [vmem:[%s17222_s16 + $0xb8] sm:$0xff]  }
 0x6a2   :  { %5867 = vmatpush1.bf16.msra.mxu0 %v12576_v47  ;;  %5949 = vmatpush1.bf16.msra.mxu1 %v12579_v28  ;;  %v12643_v47 = vld [vmem:[%s17216_s10 + $0x40c] ss:$16 sps:$4 sm:$0xff]   ;;  %v3088_v28 = vld [vmem:[%s17224_s1] sm:$0xff] }
 0x6a3   :  { %5868 = vmatprep.subr.bf16.mxu0 %v12584_v48  ;;  %5950 = vmatprep.subr.bf16.mxu1 %v12587_v49  ;;  %vm6318_vm1 = vcmp.eq.s32.totalorder %v3088_v28, 0  ;;  %v5141_v49 = vld [vmem:[%s17225_s15] sm:$0xf]  ;;  %v12683_v28 = vld [vmem:[%s17216_s10 + $0x4e8] ss:$16 sps:$4 sm:$0xff]  }
 0x6a4   :  { %v6319_v48 = vsel %vm6318_vm1, 1, %v13247_v1 }
 0x6a5   :  { %6321 = vperm.xlu0 %11447, %v6319_v48   ;;  %v12688_v48 = vld [vmem:[%s17216_s10 + $0x504] ss:$16 sps:$4 sm:$0xff]  }
 0x6a6   :  { %5869 = vmatpush1.bf16.msra.mxu0 %v12582_v52  ;;  %5951 = vmatpush1.bf16.msra.mxu1 %v12585_v11  ;;  %v5146_v52 = vrot.slane %v5141_v49, %v13562_v12  ;;  %v5154_v11 = vrot.slane %v5141_v49, %v13734_v29 }
 0x6a7   :  { %5870 = vmatprep.subr.bf16.mxu0 %v12590_v53  ;;  %5952 = vmatprep.subr.bf16.mxu1 %v12593_v54  ;;  %v5150_v53 = vrot.slane %v5141_v49, %v13570_v14  ;;  %v5158_v54 = vrot.slane %v5141_v49, %v13573_v15  ;;  %v12691_v49 = vld [vmem:[%s17216_s10 + $0x50c] ss:$16 sps:$4 sm:$0xff]  }
 0x6aa   :  { %5871 = vmatpush1.bf16.msra.mxu0 %v12588_v56  ;;  %5953 = vmatpush1.bf16.msra.mxu1 %v12591_v57 }
 0x6ab   :  { %5872 = vmatprep.subr.bf16.mxu0 %v12596_v59  ;;  %5954 = vmatprep.subr.bf16.mxu1 %v12599_v60 }
 0x6ae   :  { %5873 = vmatpush1.bf16.msra.mxu0 %v12594_v61  ;;  %5955 = vmatpush1.bf16.msra.mxu1 %v12597_v35 }
 0x6af   :  { %5874 = vmatprep.subr.bf16.mxu0 %v12602_v0  ;;  %5956 = vmatprep.subr.bf16.mxu1 %v12605_v2 }
 0x6b2   :  { %5875 = vmatpush1.bf16.msra.mxu0 %v12600_v3  ;;  %5957 = vmatpush1.bf16.msra.mxu1 %v12603_v40 }
 0x6b3   :  { %11250 = vmatprep.subr.bf16.mxu0 %v12606_v6  ;;  %11272 = vmatprep.subr.bf16.mxu1 %v12607_v7 }
 0x6b5   :  { %5877 = vmatmul.mubr.bf16.vlgmr.msra.gmra.mrb[24].mxu0 %v5011_v9  ;;  %5959 = vmatmul.mubr.bf16.vlgmr.msra.gmra.mrb[24].mxu1 %v5011_v9 }
 0x6b6   :  { %11251 = vmatpush3.bf16.msra.mxu0 %v12608_v8  ;;  %11273 = vmatpush3.bf16.msra.mxu1 %v12609_v50 }
 0x6b7   :  { %11252 = vmatprep.subr.bf16.mxu0 %v12610_v46  ;;  %11274 = vmatprep.subr.bf16.mxu1 %v12611_v10  ;;  %v12638_v46 = vld [vmem:[%s17216_s10 + $0x400] ss:$16 sps:$4 sm:$0xff]   ;;  %v12641_v10 = vld [vmem:[%s17216_s10 + $0x408] ss:$16 sps:$4 sm:$0xff]  }
 0x6ba   :  { %11253 = vmatpush3.bf16.msra.mxu0 %v12612_v16  ;;  %11275 = vmatpush3.bf16.msra.mxu1 %v12613_v17 }
 0x6bb   :  { %11254 = vmatprep.subr.bf16.mxu0 %v12614_v55  ;;  %11276 = vmatprep.subr.bf16.mxu1 %v12615_v51  ;;  %v12646_v55 = vld [vmem:[%s17216_s10 + $0x424] ss:$16 sps:$4 sm:$0xff]   ;;  %v12649_v51 = vld [vmem:[%s17216_s10 + $0x42c] ss:$16 sps:$4 sm:$0xff]  }
 0x6be   :  { %11255 = vmatpush3.bf16.msra.mxu0 %v12616_v18  ;;  %11277 = vmatpush3.bf16.msra.mxu1 %v12617_v19  ;;  %v12644_v18 = vld [vmem:[%s17216_s10 + $0x420] ss:$16 sps:$4 sm:$0xff]   ;;  %v12647_v19 = vld [vmem:[%s17216_s10 + $0x428] ss:$16 sps:$4 sm:$0xff]  }
 0x6bf   :  { %11256 = vmatprep.subr.bf16.mxu0 %v12618_v20  ;;  %11278 = vmatprep.subr.bf16.mxu1 %v12619_v21  ;;  %v12652_v20 = vld [vmem:[%s17216_s10 + $0x444] ss:$16 sps:$4 sm:$0xff]   ;;  %v12655_v21 = vld [vmem:[%s17216_s10 + $0x44c] ss:$16 sps:$4 sm:$0xff]  }
 0x6c2   :  { %11257 = vmatpush3.bf16.msra.mxu0 %v12620_v22  ;;  %11279 = vmatpush3.bf16.msra.mxu1 %v12621_v25  ;;  %v12650_v22 = vld [vmem:[%s17216_s10 + $0x440] ss:$16 sps:$4 sm:$0xff]   ;;  %v12658_v25 = vld [vmem:[%s17216_s10 + $0x464] ss:$16 sps:$4 sm:$0xff]  }
 0x6c3   :  { %11258 = vmatprep.subr.bf16.mxu0 %v12622_v26  ;;  %11280 = vmatprep.subr.bf16.mxu1 %v12623_v63  ;;  %v12661_v26 = vld [vmem:[%s17216_s10 + $0x46c] ss:$16 sps:$4 sm:$0xff]   ;;  %v12656_v63 = vld [vmem:[%s17216_s10 + $0x460] ss:$16 sps:$4 sm:$0xff]  }
 0x6c6   :  { %11259 = vmatpush3.bf16.msra.mxu0 %v12624_v30  ;;  %11281 = vmatpush3.bf16.msra.mxu1 %v12625_v31  ;;  %v12659_v30 = vld [vmem:[%s17216_s10 + $0x468] ss:$16 sps:$4 sm:$0xff]   ;;  %v12664_v31 = vld [vmem:[%s17216_s10 + $0x484] ss:$16 sps:$4 sm:$0xff]  }
 0x6c7   :  { %11260 = vmatprep.subr.bf16.mxu0 %v12626_v33  ;;  %11282 = vmatprep.subr.bf16.mxu1 %v12627_v34  ;;  %v12667_v33 = vld [vmem:[%s17216_s10 + $0x48c] ss:$16 sps:$4 sm:$0xff]   ;;  %v12662_v34 = vld [vmem:[%s17216_s10 + $0x480] ss:$16 sps:$4 sm:$0xff]  }
 0x6ca   :  { %11261 = vmatpush3.bf16.msra.mxu0 %v12628_v5  ;;  %11283 = vmatpush3.bf16.msra.mxu1 %v12629_v36  ;;  %v12665_v5 = vld [vmem:[%s17216_s10 + $0x488] ss:$16 sps:$4 sm:$0xff]   ;;  %v12670_v36 = vld [vmem:[%s17216_s10 + $0x4a4] ss:$16 sps:$4 sm:$0xff]  }
 0x6cb   :  { %11262 = vmatprep.subr.bf16.mxu0 %v12630_v13  ;;  %11284 = vmatprep.subr.bf16.mxu1 %v12631_v37  ;;  %v12673_v13 = vld [vmem:[%s17216_s10 + $0x4ac] ss:$16 sps:$4 sm:$0xff]   ;;  %v12668_v37 = vld [vmem:[%s17216_s10 + $0x4a0] ss:$16 sps:$4 sm:$0xff]  }
 0x6ce   :  { %11263 = vmatpush3.bf16.msra.mxu0 %v12632_v38  ;;  %11285 = vmatpush3.bf16.msra.mxu1 %v12633_v24  ;;  %v12671_v38 = vld [vmem:[%s17216_s10 + $0x4a8] ss:$16 sps:$4 sm:$0xff]   ;;  %v12676_v24 = vld [vmem:[%s17216_s10 + $0x4c4] ss:$16 sps:$4 sm:$0xff]  }
 0x6cf   :  { %11264 = vmatprep.subr.bf16.mxu0 %v12634_v41  ;;  %11286 = vmatprep.subr.bf16.mxu1 %v12635_v42  ;;  %v12679_v41 = vld [vmem:[%s17216_s10 + $0x4cc] ss:$16 sps:$4 sm:$0xff]   ;;  %v12674_v42 = vld [vmem:[%s17216_s10 + $0x4c0] ss:$16 sps:$4 sm:$0xff]  }
 0x6d2   :  { %11265 = vmatpush3.bf16.msra.mxu0 %v12636_v43  ;;  %11287 = vmatpush3.bf16.msra.mxu1 %v12637_v44  ;;  %v12677_v43 = vld [vmem:[%s17216_s10 + $0x4c8] ss:$16 sps:$4 sm:$0xff]   ;;  %v12682_v44 = vld [vmem:[%s17216_s10 + $0x4e4] ss:$16 sps:$4 sm:$0xff]  }
 0x6d3   :  { %7117 = vmatprep.subr.bf16.mxu0 %v12640_v45  ;;  %7199 = vmatprep.subr.bf16.mxu1 %v12643_v47  ;;  %v12685_v45 = vld [vmem:[%s17216_s10 + $0x4ec] ss:$16 sps:$4 sm:$0xff]   ;;  %v12680_v47 = vld [vmem:[%s17216_s10 + $0x4e0] ss:$16 sps:$4 sm:$0xff]  }
 0x788   :  { %v5878_v56 = vpop.f32.mrb[24].mxu0  ;;  %v5960_v57 = vpop.f32.mrb[24].mxu1 }
 0x789   :  { %v11358_v58 = vadd.f32 %v5878_v56, %v5146_v52  ;;  %v11360_v59 = vadd.f32 %v5960_v57, %v5154_v11  ;;  %v5880_v60 = vpop.f32.mrb[25].mxu0  ;;  %v5962_v61 = vpop.f32.mrb[25].mxu1  ;;  %v12686_v52 = vld [vmem:[%s17216_s10 + $0x500] ss:$16 sps:$4 sm:$0xff]   ;;  %v12689_v11 = vld [vmem:[%s17216_s10 + $0x508] ss:$16 sps:$4 sm:$0xff]  }
 0x78a   :  { %v11359_v35 = vadd.f32 %v5880_v60, %v5150_v53  ;;  %v11361_v62 = vadd.f32 %v5962_v61, %v5158_v54  ;;  %v5882_v0 = vpop.f32.mrb[26].mxu0  ;;  %v5964_v2 = vpop.f32.mrb[26].mxu1  ;;  %v12694_v53 = vld [vmem:[%s17216_s10 + $0x524] ss:$16 sps:$4 sm:$0xff]   ;;  %v12697_v54 = vld [vmem:[%s17216_s10 + $0x52c] ss:$16 sps:$4 sm:$0xff]  }
 0x78b   :  { %v5967_v3 = vmax.f32 %v11358_v58, 0.0  ;;  %v5969_v40 = vmax.f32 %v11360_v59, 0.0  ;;  %v5883_v4 = vpop.f32.mrb[27].mxu0  ;;  %v5965_v6 = vpop.f32.mrb[27].mxu1  ;;  %v12692_v56 = vld [vmem:[%s17216_s10 + $0x520] ss:$16 sps:$4 sm:$0xff]  }
 0x78c   :  { %v5968_v7 = vmax.f32 %v11359_v35, 0.0  ;;  %v5970_v8 = vmax.f32 %v11361_v62, 0.0  ;;  %v12695_v57 = vld [vmem:[%s17216_s10 + $0x528] ss:$16 sps:$4 sm:$0xff]   ;;  %v12700_v58 = vld [vmem:[%s17216_s10 + $0x544] ss:$16 sps:$4 sm:$0xff]  }
 0x78d   :  { %v5971_v16 = vpack.c.bf16 %v5967_v3, %v5967_v3  ;;  %v5973_v17 = vpack.c.bf16 %v5969_v40, %v5969_v40  ;;  %v12703_v59 = vld [vmem:[%s17216_s10 + $0x54c] ss:$16 sps:$4 sm:$0xff]   ;;  %v12698_v60 = vld [vmem:[%s17216_s10 + $0x540] ss:$16 sps:$4 sm:$0xff]   ;;  %v12701_v61 = vld [vmem:[%s17216_s10 + $0x548] ss:$16 sps:$4 sm:$0xff]  }
 0x78e   :  { %v5972_v50 = vpack.c.bf16 %v5968_v7, %v5968_v7  ;;  %v5974_v9 = vpack.c.bf16 %v5970_v8, %v5970_v8  ;;  %v12706_v35 = vld [vmem:[%s17216_s10 + $0x564] ss:$16 sps:$4 sm:$0xff]   ;;  %v12709_v62 = vld [vmem:[%s17216_s10 + $0x56c] ss:$16 sps:$4 sm:$0xff]   ;;  %v12704_v0 = vld [vmem:[%s17216_s10 + $0x560] ss:$16 sps:$4 sm:$0xff]  }
 0x78f   :  { %v12707_v2 = vld [vmem:[%s17216_s10 + $0x568] ss:$16 sps:$4 sm:$0xff]   ;;  %v12712_v3 = vld [vmem:[%s17216_s10 + $0x584] ss:$16 sps:$4 sm:$0xff]   ;;  %v12715_v40 = vld [vmem:[%s17216_s10 + $0x58c] ss:$16 sps:$4 sm:$0xff]  }
 0x790   :  { %6270 = vmatprep.mubr.bf16.mxu0 %v5972_v50  ;;  %6310 = vmatprep.mubr.bf16.mxu1 %v5974_v9  ;;  %v12710_v4 = vld [vmem:[%s17216_s10 + $0x580] ss:$16 sps:$4 sm:$0xff]   ;;  %v12713_v6 = vld [vmem:[%s17216_s10 + $0x588] ss:$16 sps:$4 sm:$0xff]   ;;  %v12718_v7 = vld [vmem:[%s17216_s10 + $0x5a4] ss:$16 sps:$4 sm:$0xff]  }
 0x791   :  { %6271 = vmatmul.mubr.bf16.vlgmr.msra.gmra.mrb[28].mxu0 %v5971_v16  ;;  %6311 = vmatmul.mubr.bf16.vlgmr.msra.gmra.mrb[28].mxu1 %v5973_v17  ;;  %v12721_v8 = vld [vmem:[%s17216_s10 + $0x5ac] ss:$16 sps:$4 sm:$0xff]   ;;  %v12716_v50 = vld [vmem:[%s17216_s10 + $0x5a0] ss:$16 sps:$4 sm:$0xff]   ;;  %v12719_v9 = vld [vmem:[%s17216_s10 + $0x5a8] ss:$16 sps:$4 sm:$0xff]  }
 0x792   :  { %7118 = vmatpush1.bf16.msra.mxu0 %v12638_v46  ;;  %7200 = vmatpush1.bf16.msra.mxu1 %v12641_v10  ;;  %v12724_v46 = vld [vmem:[%s17216_s10 + $0x5c4] ss:$16 sps:$4 sm:$0xff]   ;;  %v12727_v10 = vld [vmem:[%s17216_s10 + $0x5cc] ss:$16 sps:$4 sm:$0xff]   ;;  %v12722_v16 = vld [vmem:[%s17216_s10 + $0x5c0] ss:$16 sps:$4 sm:$0xff]  }
 0x793   :  { %7149 = vmatprep.mubr.bf16.mxu0 %v14792_v23  ;;  %7231 = vmatprep.mubr.bf16.mxu1 %v14792_v23  ;;  %v12653_v23 = vld [vmem:[%s17216_s10 + $0x448] ss:$16 sps:$4 sm:$0xff]  }
 0x794   :  { %7119 = vmatprep.subr.bf16.mxu0 %v12646_v55  ;;  %7201 = vmatprep.subr.bf16.mxu1 %v12649_v51  ;;  %v12725_v17 = vld [vmem:[%s17216_s10 + $0x5c8] ss:$16 sps:$4 sm:$0xff]   ;;  %v12730_v55 = vld [vmem:[%s17216_s10 + $0x5e4] ss:$16 sps:$4 sm:$0xff]   ;;  %v12733_v51 = vld [vmem:[%s17216_s10 + $0x5ec] ss:$16 sps:$4 sm:$0xff]  }
 0x796   :  { %7120 = vmatpush1.bf16.msra.mxu0 %v12644_v18  ;;  %7202 = vmatpush1.bf16.msra.mxu1 %v12647_v19  ;;  %v12728_v18 = vld [vmem:[%s17216_s10 + $0x5e0] ss:$16 sps:$4 sm:$0xff]   ;;  %v12731_v19 = vld [vmem:[%s17216_s10 + $0x5e8] ss:$16 sps:$4 sm:$0xff]  }
 0x797   :  { %7121 = vmatprep.subr.bf16.mxu0 %v12652_v20  ;;  %7203 = vmatprep.subr.bf16.mxu1 %v12655_v21  ;;  %v12736_v20 = vld [vmem:[%s17216_s10 + $0x604] ss:$16 sps:$4 sm:$0xff]   ;;  %v12739_v21 = vld [vmem:[%s17216_s10 + $0x60c] ss:$16 sps:$4 sm:$0xff]  }
 0x79a   :  { %7122 = vmatpush1.bf16.msra.mxu0 %v12650_v22  ;;  %7204 = vmatpush1.bf16.msra.mxu1 %v12653_v23  ;;  %v12734_v22 = vld [vmem:[%s17216_s10 + $0x600] ss:$16 sps:$4 sm:$0xff]   ;;  %v12737_v23 = vld [vmem:[%s17216_s10 + $0x608] ss:$16 sps:$4 sm:$0xff]  }
 0x79b   :  { %7123 = vmatprep.subr.bf16.mxu0 %v12658_v25  ;;  %7205 = vmatprep.subr.bf16.mxu1 %v12661_v26  ;;  %v12742_v25 = vld [vmem:[%s17216_s10 + $0x624] ss:$16 sps:$4 sm:$0xff]   ;;  %v12745_v26 = vld [vmem:[%s17216_s10 + $0x62c] ss:$16 sps:$4 sm:$0xff]  }
 0x79e   :  { %7124 = vmatpush1.bf16.msra.mxu0 %v12656_v63  ;;  %7206 = vmatpush1.bf16.msra.mxu1 %v12659_v30  ;;  %v12740_v63 = vld [vmem:[%s17216_s10 + $0x620] ss:$16 sps:$4 sm:$0xff]   ;;  %v12743_v30 = vld [vmem:[%s17216_s10 + $0x628] ss:$16 sps:$4 sm:$0xff]  }
 0x79f   :  { %7125 = vmatprep.subr.bf16.mxu0 %v12664_v31  ;;  %7207 = vmatprep.subr.bf16.mxu1 %v12667_v33  ;;  %v12748_v31 = vld [vmem:[%s17216_s10 + $0x644] ss:$16 sps:$4 sm:$0xff]   ;;  %v12746_v33 = vld [vmem:[%s17216_s10 + $0x640] ss:$16 sps:$4 sm:$0xff]  }
 0x7a2   :  { %7126 = vmatpush1.bf16.msra.mxu0 %v12662_v34  ;;  %7208 = vmatpush1.bf16.msra.mxu1 %v12665_v5  ;;  %v12754_v34 = vld [vmem:[%s17216_s10 + $0x664] ss:$16 sps:$4 sm:$0xff]   ;;  %v12757_v5 = vld [vmem:[%s17216_s10 + $0x66c] ss:$16 sps:$4 sm:$0xff]  }
 0x7a3   :  { %7127 = vmatprep.subr.bf16.mxu0 %v12670_v36  ;;  %7209 = vmatprep.subr.bf16.mxu1 %v12673_v13  ;;  %v12752_v36 = vld [vmem:[%s17216_s10 + $0x660] ss:$16 sps:$4 sm:$0xff]   ;;  %v12755_v13 = vld [vmem:[%s17216_s10 + $0x668] ss:$16 sps:$4 sm:$0xff]  }
 0x7a6   :  { %7128 = vmatpush1.bf16.msra.mxu0 %v12668_v37  ;;  %7210 = vmatpush1.bf16.msra.mxu1 %v12671_v38  ;;  %v12760_v37 = vld [vmem:[%s17216_s10 + $0x684] ss:$16 sps:$4 sm:$0xff]   ;;  %v12763_v38 = vld [vmem:[%s17216_s10 + $0x68c] ss:$16 sps:$4 sm:$0xff]  }
 0x7a7   :  { %7129 = vmatprep.subr.bf16.mxu0 %v12676_v24  ;;  %7211 = vmatprep.subr.bf16.mxu1 %v12679_v41  ;;  %v12758_v24 = vld [vmem:[%s17216_s10 + $0x680] ss:$16 sps:$4 sm:$0xff]   ;;  %v12761_v41 = vld [vmem:[%s17216_s10 + $0x688] ss:$16 sps:$4 sm:$0xff]  }
 0x7aa   :  { %7130 = vmatpush1.bf16.msra.mxu0 %v12674_v42  ;;  %7212 = vmatpush1.bf16.msra.mxu1 %v12677_v43  ;;  %v12766_v42 = vld [vmem:[%s17216_s10 + $0x6a4] ss:$16 sps:$4 sm:$0xff]   ;;  %v12769_v43 = vld [vmem:[%s17216_s10 + $0x6ac] ss:$16 sps:$4 sm:$0xff]  }
 0x7ab   :  { %7131 = vmatprep.subr.bf16.mxu0 %v12682_v44  ;;  %7213 = vmatprep.subr.bf16.mxu1 %v12685_v45  ;;  %v12764_v44 = vld [vmem:[%s17216_s10 + $0x6a0] ss:$16 sps:$4 sm:$0xff]   ;;  %v12767_v45 = vld [vmem:[%s17216_s10 + $0x6a8] ss:$16 sps:$4 sm:$0xff]  }
 0x7ae   :  { %7132 = vmatpush1.bf16.msra.mxu0 %v12680_v47  ;;  %7214 = vmatpush1.bf16.msra.mxu1 %v12683_v28  ;;  %v12772_v47 = vld [vmem:[%s17216_s10 + $0x6c4] ss:$16 sps:$4 sm:$0xff]   ;;  %v12775_v28 = vld [vmem:[%s17216_s10 + $0x6cc] ss:$16 sps:$4 sm:$0xff]  }
 0x7af   :  { %7133 = vmatprep.subr.bf16.mxu0 %v12688_v48  ;;  %7215 = vmatprep.subr.bf16.mxu1 %v12691_v49  ;;  %v12770_v48 = vld [vmem:[%s17216_s10 + $0x6c0] ss:$16 sps:$4 sm:$0xff]   ;;  %v12773_v49 = vld [vmem:[%s17216_s10 + $0x6c8] ss:$16 sps:$4 sm:$0xff]  }
 0x7b2   :  { %7134 = vmatpush1.bf16.msra.mxu0 %v12686_v52  ;;  %7216 = vmatpush1.bf16.msra.mxu1 %v12689_v11  ;;  %v12778_v52 = vld [vmem:[%s17216_s10 + $0x6e4] ss:$16 sps:$4 sm:$0xff]   ;;  %v12781_v11 = vld [vmem:[%s17216_s10 + $0x6ec] ss:$16 sps:$4 sm:$0xff]  }
 0x7b3   :  { %7135 = vmatprep.subr.bf16.mxu0 %v12694_v53  ;;  %7217 = vmatprep.subr.bf16.mxu1 %v12697_v54  ;;  %v12776_v53 = vld [vmem:[%s17216_s10 + $0x6e0] ss:$16 sps:$4 sm:$0xff]   ;;  %v12779_v54 = vld [vmem:[%s17216_s10 + $0x6e8] ss:$16 sps:$4 sm:$0xff]  }
 0x7b6   :  { %7136 = vmatpush1.bf16.msra.mxu0 %v12692_v56  ;;  %7218 = vmatpush1.bf16.msra.mxu1 %v12695_v57  ;;  %v12784_v56 = vld [vmem:[%s17216_s10 + $0x704] ss:$16 sps:$4 sm:$0xff]   ;;  %v12787_v57 = vld [vmem:[%s17216_s10 + $0x70c] ss:$16 sps:$4 sm:$0xff]  }
 0x7b7   :  { %7137 = vmatprep.subr.bf16.mxu0 %v12700_v58  ;;  %7219 = vmatprep.subr.bf16.mxu1 %v12703_v59  ;;  %v12782_v58 = vld [vmem:[%s17216_s10 + $0x700] ss:$16 sps:$4 sm:$0xff]   ;;  %v12785_v59 = vld [vmem:[%s17216_s10 + $0x708] ss:$16 sps:$4 sm:$0xff]  }
 0x7ba   :  { %7138 = vmatpush1.bf16.msra.mxu0 %v12698_v60  ;;  %7220 = vmatpush1.bf16.msra.mxu1 %v12701_v61  ;;  %v12790_v60 = vld [vmem:[%s17216_s10 + $0x724] ss:$16 sps:$4 sm:$0xff]   ;;  %v12793_v61 = vld [vmem:[%s17216_s10 + $0x72c] ss:$16 sps:$4 sm:$0xff]  }
 0x7bb   :  { %7139 = vmatprep.subr.bf16.mxu0 %v12706_v35  ;;  %7221 = vmatprep.subr.bf16.mxu1 %v12709_v62  ;;  %v12788_v35 = vld [vmem:[%s17216_s10 + $0x720] ss:$16 sps:$4 sm:$0xff]   ;;  %v12791_v62 = vld [vmem:[%s17216_s10 + $0x728] ss:$16 sps:$4 sm:$0xff]  }
 0x7be   :  { %7140 = vmatpush1.bf16.msra.mxu0 %v12704_v0  ;;  %7222 = vmatpush1.bf16.msra.mxu1 %v12707_v2  ;;  %v12796_v0 = vld [vmem:[%s17216_s10 + $0x744] ss:$16 sps:$4 sm:$0xff]   ;;  %v12799_v2 = vld [vmem:[%s17216_s10 + $0x74c] ss:$16 sps:$4 sm:$0xff]  }
 0x7bf   :  { %7141 = vmatprep.subr.bf16.mxu0 %v12712_v3  ;;  %7223 = vmatprep.subr.bf16.mxu1 %v12715_v40  ;;  %v12794_v3 = vld [vmem:[%s17216_s10 + $0x740] ss:$16 sps:$4 sm:$0xff]   ;;  %v12797_v40 = vld [vmem:[%s17216_s10 + $0x748] ss:$16 sps:$4 sm:$0xff]  }
 0x7c2   :  { %7142 = vmatpush1.bf16.msra.mxu0 %v12710_v4  ;;  %7224 = vmatpush1.bf16.msra.mxu1 %v12713_v6  ;;  %v12802_v4 = vld [vmem:[%s17216_s10 + $0x764] ss:$16 sps:$4 sm:$0xff]   ;;  %v12805_v6 = vld [vmem:[%s17216_s10 + $0x76c] ss:$16 sps:$4 sm:$0xff]  }
 0x7c3   :  { %7143 = vmatprep.subr.bf16.mxu0 %v12718_v7  ;;  %7225 = vmatprep.subr.bf16.mxu1 %v12721_v8  ;;  %v12800_v7 = vld [vmem:[%s17216_s10 + $0x760] ss:$16 sps:$4 sm:$0xff]   ;;  %v12803_v8 = vld [vmem:[%s17216_s10 + $0x768] ss:$16 sps:$4 sm:$0xff]  }
 0x7c6   :  { %7144 = vmatpush1.bf16.msra.mxu0 %v12716_v50  ;;  %7226 = vmatpush1.bf16.msra.mxu1 %v12719_v9  ;;  %v12808_v50 = vld [vmem:[%s17216_s10 + $0x784] ss:$16 sps:$4 sm:$0xff]   ;;  %v12811_v9 = vld [vmem:[%s17216_s10 + $0x78c] ss:$16 sps:$4 sm:$0xff]  }
 0x7c7   :  { %7145 = vmatprep.subr.bf16.mxu0 %v12724_v46  ;;  %7227 = vmatprep.subr.bf16.mxu1 %v12727_v10  ;;  %v12806_v46 = vld [vmem:[%s17216_s10 + $0x780] ss:$16 sps:$4 sm:$0xff]   ;;  %v12809_v10 = vld [vmem:[%s17216_s10 + $0x788] ss:$16 sps:$4 sm:$0xff]  }
 0x7ca   :  { %7146 = vmatpush1.bf16.msra.mxu0 %v12722_v16  ;;  %7228 = vmatpush1.bf16.msra.mxu1 %v12725_v17  ;;  %v12814_v16 = vld [vmem:[%s17216_s10 + $0x7a4] ss:$16 sps:$4 sm:$0xff]   ;;  %v12817_v17 = vld [vmem:[%s17216_s10 + $0x7ac] ss:$16 sps:$4 sm:$0xff]  }
 0x7cb   :  { %7147 = vmatprep.subr.bf16.mxu0 %v12730_v55  ;;  %7229 = vmatprep.subr.bf16.mxu1 %v12733_v51  ;;  %v12812_v55 = vld [vmem:[%s17216_s10 + $0x7a0] ss:$16 sps:$4 sm:$0xff]   ;;  %v12815_v51 = vld [vmem:[%s17216_s10 + $0x7a8] ss:$16 sps:$4 sm:$0xff]  }
 0x7ce   :  { %7148 = vmatpush1.bf16.msra.mxu0 %v12728_v18  ;;  %7230 = vmatpush1.bf16.msra.mxu1 %v12731_v19  ;;  %v12820_v18 = vld [vmem:[%s17216_s10 + $0x7c4] ss:$16 sps:$4 sm:$0xff]   ;;  %v12823_v19 = vld [vmem:[%s17216_s10 + $0x7cc] ss:$16 sps:$4 sm:$0xff]  }
 0x7cf   :  { %7158 = vmatprep.subr.bf16.mxu0 %v12736_v20  ;;  %7240 = vmatprep.subr.bf16.mxu1 %v12739_v21  ;;  %v12818_v20 = vld [vmem:[%s17216_s10 + $0x7c0] ss:$16 sps:$4 sm:$0xff]   ;;  %v12821_v21 = vld [vmem:[%s17216_s10 + $0x7c8] ss:$16 sps:$4 sm:$0xff]  }
 0x7d1   :  { %7150 = vmatmul.mubr.bf16.vlgmr.msra.gmra.mrb[32].mxu0 %v14800_v27  ;;  %7232 = vmatmul.mubr.bf16.vlgmr.msra.gmra.mrb[32].mxu1 %v14800_v27  ;;  %v12751_v27 = vld [vmem:[%s17216_s10 + $0x64c] ss:$16 sps:$4 sm:$0xff]  }
 0x7d2   :  { %7159 = vmatpush1.bf16.msra.mxu0 %v12734_v22  ;;  %7190 = vmatprep.mubr.bf16.mxu0 %v14810_v32  ;;  %v12826_v22 = vld [vmem:[%s17216_s10 + $0x7e4] ss:$16 sps:$4 sm:$0xff]  }
 0x7d3   :  { %7241 = vmatpush1.bf16.msra.mxu1 %v12737_v23  ;;  %7272 = vmatprep.mubr.bf16.mxu1 %v14810_v32  ;;  %v12749_v32 = vld [vmem:[%s17216_s10 + $0x648] ss:$16 sps:$4 sm:$0xff]   ;;  %v12829_v23 = vld [vmem:[%s17216_s10 + $0x7ec] ss:$16 sps:$4 sm:$0xff]  }
 0x7d4   :  { %7160 = vmatprep.subr.bf16.mxu0 %v12742_v25  ;;  %7242 = vmatprep.subr.bf16.mxu1 %v12745_v26  ;;  %v12824_v25 = vld [vmem:[%s17216_s10 + $0x7e0] ss:$16 sps:$4 sm:$0xff]   ;;  %v12827_v26 = vld [vmem:[%s17216_s10 + $0x7e8] ss:$16 sps:$4 sm:$0xff]  }
 0x7d6   :  { %7161 = vmatpush1.bf16.msra.mxu0 %v12740_v63  ;;  %v12832_v63 = vld [vmem:[%s17218_s12 + $0x404] ss:$16 sps:$4 sm:$0xff]  }
 0x7d7   :  { %7243 = vmatpush1.bf16.msra.mxu1 %v12743_v30  ;;  %7162 = vmatprep.subr.bf16.mxu0 %v12748_v31  ;;  %v12835_v30 = vld [vmem:[%s17218_s12 + $0x40c] ss:$16 sps:$4 sm:$0xff]   ;;  %v12830_v31 = vld [vmem:[%s17218_s12 + $0x400] ss:$16 sps:$4 sm:$0xff]  }
 0x7d8   :  { %7244 = vmatprep.subr.bf16.mxu1 %v12751_v27  ;;  %v12833_v27 = vld [vmem:[%s17218_s12 + $0x408] ss:$16 sps:$4 sm:$0xff]  }
 0x7da   :  { %7163 = vmatpush1.bf16.msra.mxu0 %v12746_v33  ;;  %v12838_v33 = vld [vmem:[%s17218_s12 + $0x424] ss:$16 sps:$4 sm:$0xff]  }
 0x7db   :  { %7245 = vmatpush1.bf16.msra.mxu1 %v12749_v32  ;;  %7164 = vmatprep.subr.bf16.mxu0 %v12754_v34  ;;  %v12841_v32 = vld [vmem:[%s17218_s12 + $0x42c] ss:$16 sps:$4 sm:$0xff]   ;;  %v12836_v34 = vld [vmem:[%s17218_s12 + $0x420] ss:$16 sps:$4 sm:$0xff]  }
 0x7dc   :  { %7246 = vmatprep.subr.bf16.mxu1 %v12757_v5  ;;  %v12839_v5 = vld [vmem:[%s17218_s12 + $0x428] ss:$16 sps:$4 sm:$0xff]  }
 0x7de   :  { %7165 = vmatpush1.bf16.msra.mxu0 %v12752_v36  ;;  %v12844_v36 = vld [vmem:[%s17218_s12 + $0x444] ss:$16 sps:$4 sm:$0xff]  }
 0x7df   :  { %7247 = vmatpush1.bf16.msra.mxu1 %v12755_v13  ;;  %7166 = vmatprep.subr.bf16.mxu0 %v12760_v37  ;;  %v12842_v13 = vld [vmem:[%s17218_s12 + $0x440] ss:$16 sps:$4 sm:$0xff]   ;;  %v12845_v37 = vld [vmem:[%s17218_s12 + $0x448] ss:$16 sps:$4 sm:$0xff]  }
 0x7e0   :  { %7248 = vmatprep.subr.bf16.mxu1 %v12763_v38  ;;  %v12850_v38 = vld [vmem:[%s17218_s12 + $0x464] ss:$16 sps:$4 sm:$0xff]  }
 0x7e2   :  { %7167 = vmatpush1.bf16.msra.mxu0 %v12758_v24  ;;  %v12853_v24 = vld [vmem:[%s17218_s12 + $0x46c] ss:$16 sps:$4 sm:$0xff]  }
 0x7e3   :  { %7249 = vmatpush1.bf16.msra.mxu1 %v12761_v41  ;;  %7168 = vmatprep.subr.bf16.mxu0 %v12766_v42  ;;  %v12848_v41 = vld [vmem:[%s17218_s12 + $0x460] ss:$16 sps:$4 sm:$0xff]   ;;  %v12851_v42 = vld [vmem:[%s17218_s12 + $0x468] ss:$16 sps:$4 sm:$0xff]  }
 0x7e4   :  { %7250 = vmatprep.subr.bf16.mxu1 %v12769_v43  ;;  %v12856_v43 = vld [vmem:[%s17218_s12 + $0x484] ss:$16 sps:$4 sm:$0xff]  }
 0x7e6   :  { %7169 = vmatpush1.bf16.msra.mxu0 %v12764_v44  ;;  %v12859_v44 = vld [vmem:[%s17218_s12 + $0x48c] ss:$16 sps:$4 sm:$0xff]  }
 0x7e7   :  { %7251 = vmatpush1.bf16.msra.mxu1 %v12767_v45  ;;  %7170 = vmatprep.subr.bf16.mxu0 %v12772_v47  ;;  %v12854_v45 = vld [vmem:[%s17218_s12 + $0x480] ss:$16 sps:$4 sm:$0xff]   ;;  %v12857_v47 = vld [vmem:[%s17218_s12 + $0x488] ss:$16 sps:$4 sm:$0xff]  }
 0x7e8   :  { %7252 = vmatprep.subr.bf16.mxu1 %v12775_v28  ;;  %v12862_v28 = vld [vmem:[%s17218_s12 + $0x4a4] ss:$16 sps:$4 sm:$0xff]  }
 0x7ea   :  { %7171 = vmatpush1.bf16.msra.mxu0 %v12770_v48  ;;  %v12865_v48 = vld [vmem:[%s17218_s12 + $0x4ac] ss:$16 sps:$4 sm:$0xff]  }
 0x7eb   :  { %7253 = vmatpush1.bf16.msra.mxu1 %v12773_v49  ;;  %7172 = vmatprep.subr.bf16.mxu0 %v12778_v52  ;;  %v12860_v49 = vld [vmem:[%s17218_s12 + $0x4a0] ss:$16 sps:$4 sm:$0xff]   ;;  %v12863_v52 = vld [vmem:[%s17218_s12 + $0x4a8] ss:$16 sps:$4 sm:$0xff]  }
 0x7ec   :  { %7254 = vmatprep.subr.bf16.mxu1 %v12781_v11  ;;  %v12868_v11 = vld [vmem:[%s17218_s12 + $0x4c4] ss:$16 sps:$4 sm:$0xff]  }
 0x7ee   :  { %7173 = vmatpush1.bf16.msra.mxu0 %v12776_v53  ;;  %v12871_v53 = vld [vmem:[%s17218_s12 + $0x4cc] ss:$16 sps:$4 sm:$0xff]  }
 0x7ef   :  { %7255 = vmatpush1.bf16.msra.mxu1 %v12779_v54  ;;  %7174 = vmatprep.subr.bf16.mxu0 %v12784_v56  ;;  %v12866_v54 = vld [vmem:[%s17218_s12 + $0x4c0] ss:$16 sps:$4 sm:$0xff]   ;;  %v12869_v56 = vld [vmem:[%s17218_s12 + $0x4c8] ss:$16 sps:$4 sm:$0xff]  }
 0x7f0   :  { %7256 = vmatprep.subr.bf16.mxu1 %v12787_v57  ;;  %v12874_v57 = vld [vmem:[%s17218_s12 + $0x4e4] ss:$16 sps:$4 sm:$0xff]  }
 0x7f2   :  { %7175 = vmatpush1.bf16.msra.mxu0 %v12782_v58  ;;  %v12877_v58 = vld [vmem:[%s17218_s12 + $0x4ec] ss:$16 sps:$4 sm:$0xff]  }
 0x7f3   :  { %7257 = vmatpush1.bf16.msra.mxu1 %v12785_v59  ;;  %7176 = vmatprep.subr.bf16.mxu0 %v12790_v60  ;;  %v12872_v59 = vld [vmem:[%s17218_s12 + $0x4e0] ss:$16 sps:$4 sm:$0xff]   ;;  %v12875_v60 = vld [vmem:[%s17218_s12 + $0x4e8] ss:$16 sps:$4 sm:$0xff]  }
 0x7f4   :  { %7258 = vmatprep.subr.bf16.mxu1 %v12793_v61  ;;  %v12880_v61 = vld [vmem:[%s17218_s12 + $0x504] ss:$16 sps:$4 sm:$0xff]  }
 0x7f6   :  { %7177 = vmatpush1.bf16.msra.mxu0 %v12788_v35  ;;  %v12883_v35 = vld [vmem:[%s17218_s12 + $0x50c] ss:$16 sps:$4 sm:$0xff]  }
 0x7f7   :  { %7259 = vmatpush1.bf16.msra.mxu1 %v12791_v62  ;;  %7178 = vmatprep.subr.bf16.mxu0 %v12796_v0  ;;  %v12878_v62 = vld [vmem:[%s17218_s12 + $0x500] ss:$16 sps:$4 sm:$0xff]   ;;  %v12881_v0 = vld [vmem:[%s17218_s12 + $0x508] ss:$16 sps:$4 sm:$0xff]  }
 0x7f8   :  { %7260 = vmatprep.subr.bf16.mxu1 %v12799_v2  ;;  %v12886_v2 = vld [vmem:[%s17218_s12 + $0x524] ss:$16 sps:$4 sm:$0xff]  }
 0x7fa   :  { %7179 = vmatpush1.bf16.msra.mxu0 %v12794_v3  ;;  %v12889_v3 = vld [vmem:[%s17218_s12 + $0x52c] ss:$16 sps:$4 sm:$0xff]  }
 0x7fb   :  { %7261 = vmatpush1.bf16.msra.mxu1 %v12797_v40  ;;  %7180 = vmatprep.subr.bf16.mxu0 %v12802_v4  ;;  %v12884_v40 = vld [vmem:[%s17218_s12 + $0x520] ss:$16 sps:$4 sm:$0xff]   ;;  %v12887_v4 = vld [vmem:[%s17218_s12 + $0x528] ss:$16 sps:$4 sm:$0xff]  }
 0x7fc   :  { %7262 = vmatprep.subr.bf16.mxu1 %v12805_v6  ;;  %v12892_v6 = vld [vmem:[%s17218_s12 + $0x544] ss:$16 sps:$4 sm:$0xff]  }
 0x7fe   :  { %7181 = vmatpush1.bf16.msra.mxu0 %v12800_v7  ;;  %v12895_v7 = vld [vmem:[%s17218_s12 + $0x54c] ss:$16 sps:$4 sm:$0xff]  }
 0x7ff   :  { %7263 = vmatpush1.bf16.msra.mxu1 %v12803_v8  ;;  %7182 = vmatprep.subr.bf16.mxu0 %v12808_v50  ;;  %v12890_v8 = vld [vmem:[%s17218_s12 + $0x540] ss:$16 sps:$4 sm:$0xff]   ;;  %v12893_v50 = vld [vmem:[%s17218_s12 + $0x548] ss:$16 sps:$4 sm:$0xff]  }
 0x800   :  { %7264 = vmatprep.subr.bf16.mxu1 %v12811_v9  ;;  %v12898_v9 = vld [vmem:[%s17218_s12 + $0x564] ss:$16 sps:$4 sm:$0xff]  }
 0x802   :  { %7183 = vmatpush1.bf16.msra.mxu0 %v12806_v46  ;;  %v12901_v46 = vld [vmem:[%s17218_s12 + $0x56c] ss:$16 sps:$4 sm:$0xff]  }
 0x803   :  { %7265 = vmatpush1.bf16.msra.mxu1 %v12809_v10  ;;  %7184 = vmatprep.subr.bf16.mxu0 %v12814_v16  ;;  %v12896_v10 = vld [vmem:[%s17218_s12 + $0x560] ss:$16 sps:$4 sm:$0xff]   ;;  %v12899_v16 = vld [vmem:[%s17218_s12 + $0x568] ss:$16 sps:$4 sm:$0xff]  }
 0x804   :  { %7266 = vmatprep.subr.bf16.mxu1 %v12817_v17  ;;  %v12904_v17 = vld [vmem:[%s17218_s12 + $0x584] ss:$16 sps:$4 sm:$0xff]  }
 0x806   :  { %7185 = vmatpush1.bf16.msra.mxu0 %v12812_v55  ;;  %v12907_v55 = vld [vmem:[%s17218_s12 + $0x58c] ss:$16 sps:$4 sm:$0xff]  }
 0x807   :  { %7267 = vmatpush1.bf16.msra.mxu1 %v12815_v51  ;;  %7186 = vmatprep.subr.bf16.mxu0 %v12820_v18  ;;  %v12902_v51 = vld [vmem:[%s17218_s12 + $0x580] ss:$16 sps:$4 sm:$0xff]   ;;  %v12905_v18 = vld [vmem:[%s17218_s12 + $0x588] ss:$16 sps:$4 sm:$0xff]  }
 0x808   :  { %7268 = vmatprep.subr.bf16.mxu1 %v12823_v19  ;;  %v12910_v19 = vld [vmem:[%s17218_s12 + $0x5a4] ss:$16 sps:$4 sm:$0xff]  }
 0x80a   :  { %7187 = vmatpush1.bf16.msra.mxu0 %v12818_v20  ;;  %v12913_v20 = vld [vmem:[%s17218_s12 + $0x5ac] ss:$16 sps:$4 sm:$0xff]  }
 0x80b   :  { %7269 = vmatpush1.bf16.msra.mxu1 %v12821_v21  ;;  %7188 = vmatprep.subr.bf16.mxu0 %v12826_v22  ;;  %v12908_v21 = vld [vmem:[%s17218_s12 + $0x5a0] ss:$16 sps:$4 sm:$0xff]   ;;  %v12911_v22 = vld [vmem:[%s17218_s12 + $0x5a8] ss:$16 sps:$4 sm:$0xff]  }
 0x80c   :  { %7270 = vmatprep.subr.bf16.mxu1 %v12829_v23  ;;  %v12916_v23 = vld [vmem:[%s17218_s12 + $0x5c4] ss:$16 sps:$4 sm:$0xff]  }
 0x80e   :  { %7189 = vmatpush1.bf16.msra.mxu0 %v12824_v25  ;;  %v12919_v25 = vld [vmem:[%s17218_s12 + $0x5cc] ss:$16 sps:$4 sm:$0xff]  }
 0x80f   :  { %7271 = vmatpush1.bf16.msra.mxu1 %v12827_v26  ;;  %8081 = vmatprep.subr.bf16.mxu0 %v12832_v63 }
 0x810   :  { %8163 = vmatprep.subr.bf16.mxu1 %v12835_v30  ;;  %v12914_v30 = vld [vmem:[%s17218_s12 + $0x5c0] ss:$16 sps:$4 sm:$0xff]  }
 0x811   :  { %7191 = vmatmul.mubr.bf16.vlgmr.msra.gmra.mrb[32].mxu0 %v14999_v39 }
 0x812   :  { %7273 = vmatmul.mubr.bf16.vlgmr.msra.gmra.mrb[32].mxu1 %v14999_v39  ;;  %8082 = vmatpush1.bf16.msra.mxu0 %v12830_v31  ;;  %v12847_v39 = vld [vmem:[%s17218_s12 + $0x44c] ss:$16 sps:$4 sm:$0xff]   ;;  %v12917_v31 = vld [vmem:[%s17218_s12 + $0x5c8] ss:$16 sps:$4 sm:$0xff]  }
 0x813   :  { %8164 = vmatpush1.bf16.msra.mxu1 %v12833_v27  ;;  %8083 = vmatprep.subr.bf16.mxu0 %v12838_v33  ;;  %v10348_v27 = vld [vmem:[%s17226_s17] ss:$0 sm:$0xff] }
 0x814   :  { %8165 = vmatprep.subr.bf16.mxu1 %v12841_v32 }
 0x816   :  { %8084 = vmatpush1.bf16.msra.mxu0 %v12836_v34 }
 0x817   :  { %8166 = vmatpush1.bf16.msra.mxu1 %v12839_v5  ;;  %8085 = vmatprep.subr.bf16.mxu0 %v12844_v36 }
 0x818   :  { %8167 = vmatprep.subr.bf16.mxu1 %v12847_v39 }
 0x81a   :  { %8086 = vmatpush1.bf16.msra.mxu0 %v12842_v13 }
 0x81b   :  { %8168 = vmatpush1.bf16.msra.mxu1 %v12845_v37  ;;  %8087 = vmatprep.subr.bf16.mxu0 %v12850_v38  ;;  %v12922_v38 = vld [vmem:[%s17218_s12 + $0x5e4] ss:$16 sps:$4 sm:$0xff]  }
 0x81c   :  { %8169 = vmatprep.subr.bf16.mxu1 %v12853_v24  ;;  %v12925_v24 = vld [vmem:[%s17218_s12 + $0x5ec] ss:$16 sps:$4 sm:$0xff]  }
 0x81e   :  { %8088 = vmatpush1.bf16.msra.mxu0 %v12848_v41 }
 0x81f   :  { %8170 = vmatpush1.bf16.msra.mxu1 %v12851_v42  ;;  %8089 = vmatprep.subr.bf16.mxu0 %v12856_v43  ;;  %v12920_v42 = vld [vmem:[%s17218_s12 + $0x5e0] ss:$16 sps:$4 sm:$0xff]   ;;  %v12923_v43 = vld [vmem:[%s17218_s12 + $0x5e8] ss:$16 sps:$4 sm:$0xff]  }
 0x820   :  { %8171 = vmatprep.subr.bf16.mxu1 %v12859_v44 }
 0x822   :  { %8090 = vmatpush1.bf16.msra.mxu0 %v12854_v45  ;;  %v12928_v45 = vld [vmem:[%s17218_s12 + $0x604] ss:$16 sps:$4 sm:$0xff]  }
 0x823   :  { %8172 = vmatpush1.bf16.msra.mxu1 %v12857_v47  ;;  %8091 = vmatprep.subr.bf16.mxu0 %v12862_v28  ;;  %v12931_v47 = vld [vmem:[%s17218_s12 + $0x60c] ss:$16 sps:$4 sm:$0xff]   ;;  %v16496_v28 = vld [vmem:[%s17221_s11 + $0x4] sm:$0xf] }
 0x824   :  { %8173 = vmatprep.subr.bf16.mxu1 %v12865_v48  ;;  %v6460_v48 = vrot.slane %v16496_v28, %v13562_v12 }
 0x826   :  { %8092 = vmatpush1.bf16.msra.mxu0 %v12860_v49  ;;  %v6464_v49 = vrot.slane %v16496_v28, %v13570_v14 }
 0x827   :  { %8174 = vmatpush1.bf16.msra.mxu1 %v12863_v52  ;;  %8093 = vmatprep.subr.bf16.mxu0 %v12868_v11  ;;  %v6472_v52 = vrot.slane %v16496_v28, %v13573_v15 }
 0x828   :  { %8175 = vmatprep.subr.bf16.mxu1 %v12871_v53 }
 0x82a   :  { %8094 = vmatpush1.bf16.msra.mxu0 %v12866_v54 }
 0x82b   :  { %8176 = vmatpush1.bf16.msra.mxu1 %v12869_v56  ;;  %8095 = vmatprep.subr.bf16.mxu0 %v12874_v57 }
 0x82c   :  { %8177 = vmatprep.subr.bf16.mxu1 %v12877_v58 }
 0x82e   :  { %8096 = vmatpush1.bf16.msra.mxu0 %v12872_v59 }
 0x82f   :  { %8178 = vmatpush1.bf16.msra.mxu1 %v12875_v60  ;;  %8097 = vmatprep.subr.bf16.mxu0 %v12880_v61 }
 0x830   :  { %8179 = vmatprep.subr.bf16.mxu1 %v12883_v35 }
 0x832   :  { %8098 = vmatpush1.bf16.msra.mxu0 %v12878_v62 }
 0x833   :  { %8180 = vmatpush1.bf16.msra.mxu1 %v12881_v0  ;;  %8099 = vmatprep.subr.bf16.mxu0 %v12886_v2 }
 0x834   :  { %8181 = vmatprep.subr.bf16.mxu1 %v12889_v3 }
 0x836   :  { %8100 = vmatpush1.bf16.msra.mxu0 %v12884_v40 }
 0x837   :  { %8182 = vmatpush1.bf16.msra.mxu1 %v12887_v4  ;;  %8101 = vmatprep.subr.bf16.mxu0 %v12892_v6  ;;  %v12926_v4 = vld [vmem:[%s17218_s12 + $0x600] ss:$16 sps:$4 sm:$0xff]   ;;  %v12929_v6 = vld [vmem:[%s17218_s12 + $0x608] ss:$16 sps:$4 sm:$0xff]  }
 0x838   :  { %8183 = vmatprep.subr.bf16.mxu1 %v12895_v7 }
 0x83a   :  { %8102 = vmatpush1.bf16.msra.mxu0 %v12890_v8  ;;  %v12934_v8 = vld [vmem:[%s17218_s12 + $0x624] ss:$16 sps:$4 sm:$0xff]  }
 0x83b   :  { %8184 = vmatpush1.bf16.msra.mxu1 %v12893_v50  ;;  %8103 = vmatprep.subr.bf16.mxu0 %v12898_v9  ;;  %v12937_v50 = vld [vmem:[%s17218_s12 + $0x62c] ss:$16 sps:$4 sm:$0xff]  }
 0x83c   :  { %8185 = vmatprep.subr.bf16.mxu1 %v12901_v46  ;;  %v12932_v46 = vld [vmem:[%s17218_s12 + $0x620] ss:$16 sps:$4 sm:$0xff]  }
 0x83e   :  { %8104 = vmatpush1.bf16.msra.mxu0 %v12896_v10  ;;  %v12935_v10 = vld [vmem:[%s17218_s12 + $0x628] ss:$16 sps:$4 sm:$0xff]  }
 0x83f   :  { %8186 = vmatpush1.bf16.msra.mxu1 %v12899_v16  ;;  %8105 = vmatprep.subr.bf16.mxu0 %v12904_v17  ;;  %v12940_v16 = vld [vmem:[%s17218_s12 + $0x644] ss:$16 sps:$4 sm:$0xff]   ;;  %v12943_v17 = vld [vmem:[%s17218_s12 + $0x64c] ss:$16 sps:$4 sm:$0xff]  }
 0x840   :  { %8187 = vmatprep.subr.bf16.mxu1 %v12907_v55  ;;  %v12938_v55 = vld [vmem:[%s17218_s12 + $0x640] ss:$16 sps:$4 sm:$0xff]  }
 0x842   :  { %8106 = vmatpush1.bf16.msra.mxu0 %v12902_v51  ;;  %v12941_v51 = vld [vmem:[%s17218_s12 + $0x648] ss:$16 sps:$4 sm:$0xff]  }
 0x843   :  { %8188 = vmatpush1.bf16.msra.mxu1 %v12905_v18  ;;  %8107 = vmatprep.subr.bf16.mxu0 %v12910_v19  ;;  %v12946_v18 = vld [vmem:[%s17218_s12 + $0x664] ss:$16 sps:$4 sm:$0xff]   ;;  %v12949_v19 = vld [vmem:[%s17218_s12 + $0x66c] ss:$16 sps:$4 sm:$0xff]  }
 0x844   :  { %8189 = vmatprep.subr.bf16.mxu1 %v12913_v20  ;;  %v12944_v20 = vld [vmem:[%s17218_s12 + $0x660] ss:$16 sps:$4 sm:$0xff]  }
 0x846   :  { %8108 = vmatpush1.bf16.msra.mxu0 %v12908_v21  ;;  %v12947_v21 = vld [vmem:[%s17218_s12 + $0x668] ss:$16 sps:$4 sm:$0xff]  }
 0x847   :  { %8190 = vmatpush1.bf16.msra.mxu1 %v12911_v22  ;;  %8109 = vmatprep.subr.bf16.mxu0 %v12916_v23  ;;  %v12952_v22 = vld [vmem:[%s17218_s12 + $0x684] ss:$16 sps:$4 sm:$0xff]   ;;  %v12955_v23 = vld [vmem:[%s17218_s12 + $0x68c] ss:$16 sps:$4 sm:$0xff]  }
 0x848   :  { %8191 = vmatprep.subr.bf16.mxu1 %v12919_v25  ;;  %v12950_v25 = vld [vmem:[%s17218_s12 + $0x680] ss:$16 sps:$4 sm:$0xff]  }
 0x84a   :  { %8110 = vmatpush1.bf16.msra.mxu0 %v12914_v30  ;;  %v12961_v30 = vld [vmem:[%s17218_s12 + $0x6ac] ss:$16 sps:$4 sm:$0xff]  }
 0x84b   :  { %8192 = vmatpush1.bf16.msra.mxu1 %v12917_v31  ;;  %8111 = vmatprep.subr.bf16.mxu0 %v12922_v38  ;;  %v12956_v31 = vld [vmem:[%s17218_s12 + $0x6a0] ss:$16 sps:$4 sm:$0xff]   ;;  %v12976_v38 = vld [vmem:[%s17218_s12 + $0x704] ss:$16 sps:$4 sm:$0xff]  }
 0x84c   :  { %8193 = vmatprep.subr.bf16.mxu1 %v12925_v24  ;;  %v12979_v24 = vld [vmem:[%s17218_s12 + $0x70c] ss:$16 sps:$4 sm:$0xff]  }
 0x84e   :  { %8112 = vmatpush1.bf16.msra.mxu0 %v12920_v42  ;;  %v12977_v42 = vld [vmem:[%s17218_s12 + $0x708] ss:$16 sps:$4 sm:$0xff]  }
 0x84f   :  { %8194 = vmatpush1.bf16.msra.mxu1 %v12923_v43  ;;  %8122 = vmatprep.subr.bf16.mxu0 %v12928_v45  ;;  %v12982_v43 = vld [vmem:[%s17218_s12 + $0x724] ss:$16 sps:$4 sm:$0xff]   ;;  %v12985_v45 = vld [vmem:[%s17218_s12 + $0x72c] ss:$16 sps:$4 sm:$0xff]  }
 0x850   :  { %8204 = vmatprep.subr.bf16.mxu1 %v12931_v47  ;;  %v12980_v47 = vld [vmem:[%s17218_s12 + $0x720] ss:$16 sps:$4 sm:$0xff]  }
 0x864   :  { %v11266_v26 = vpop.f32.mrb[28].mxu0  ;;  %v11288_v63 = vpop.f32.mrb[28].mxu1 }
 0x865   :  { %v11267_v33 = vpop.f32.mrb[29].mxu0  ;;  %v11289_v32 = vpop.f32.mrb[29].mxu1 }
 0x866   :  { %v11268_v34 = vadd.f32 %v11267_v33, %v11266_v26  ;;  %v11290_v5 = vadd.f32 %v11289_v32, %v11288_v63  ;;  %v11269_v36 = vpop.f32.mrb[30].mxu0  ;;  %v11291_v39 = vpop.f32.mrb[30].mxu1  ;;  %v12953_v26 = vld [vmem:[%s17218_s12 + $0x688] ss:$16 sps:$4 sm:$0xff]   ;;  %v12958_v63 = vld [vmem:[%s17218_s12 + $0x6a4] ss:$16 sps:$4 sm:$0xff]  }
 0x867   :  { %v11270_v13 = vpop.f32.mrb[31].mxu0  ;;  %v11292_v37 = vpop.f32.mrb[31].mxu1  ;;  %v12964_v33 = vld [vmem:[%s17218_s12 + $0x6c4] ss:$16 sps:$4 sm:$0xff]   ;;  %v12967_v32 = vld [vmem:[%s17218_s12 + $0x6cc] ss:$16 sps:$4 sm:$0xff]  }
 0x868   :  { %v6273_v41 = vadd.f32 %v11268_v34, %v10348_v27  ;;  %v12959_v27 = vld [vmem:[%s17218_s12 + $0x6a8] ss:$16 sps:$4 sm:$0xff]   ;;  %v12962_v34 = vld [vmem:[%s17218_s12 + $0x6c0] ss:$16 sps:$4 sm:$0xff]   ;;  %v12970_v36 = vld [vmem:[%s17218_s12 + $0x6e4] ss:$16 sps:$4 sm:$0xff]  }
 0x869   :  { %v12973_v39 = vld [vmem:[%s17218_s12 + $0x6ec] ss:$16 sps:$4 sm:$0xff]   ;;  %v12968_v13 = vld [vmem:[%s17218_s12 + $0x6e0] ss:$16 sps:$4 sm:$0xff]   ;;  %v12971_v37 = vld [vmem:[%s17218_s12 + $0x6e8] ss:$16 sps:$4 sm:$0xff]  }
 0x86a   :  { %v16485_v44 = vadd.f32 %v11290_v5, %v6273_v41  ;;  %v12965_v5 = vld [vmem:[%s17218_s12 + $0x6c8] ss:$16 sps:$4 sm:$0xff]   ;;  %v12974_v41 = vld [vmem:[%s17218_s12 + $0x700] ss:$16 sps:$4 sm:$0xff]  }
 0x8e4   :  { %v7192_v11 = vpop.f32.mrb[32].mxu0 }
 0x8e5   :  { %v11362_v53 = vadd.f32 %v7192_v11, %v6460_v48  ;;  %v16504_v54 = vpop.f32.mrb[32].mxu1  ;;  %v7194_v56 = vpop.f32.mrb[33].mxu0  ;;  %v12983_v48 = vld [vmem:[%s17218_s12 + $0x728] ss:$16 sps:$4 sm:$0xff]   ;;  %v12986_v11 = vld [vmem:[%s17218_s12 + $0x740] ss:$16 sps:$4 sm:$0xff]  }
 0x8e6   :  { %v11363_v57 = vadd.f32 %v7194_v56, %v6464_v49  ;;  %v7276_v58 = vpop.f32.mrb[33].mxu1  ;;  %v7196_v59 = vpop.f32.mrb[34].mxu0  ;;  %v12988_v49 = vld [vmem:[%s17218_s12 + $0x744] ss:$16 sps:$4 sm:$0xff]  }
 0x8e7   :  { %v7281_v60 = vmax.f32 %v11362_v53, 0.0  ;;  %v11365_v61 = vadd.f32 %v7276_v58, %v6472_v52  ;;  %v7278_v35 = vpop.f32.mrb[34].mxu1  ;;  %v7197_v62 = vpop.f32.mrb[35].mxu0  ;;  %v12991_v52 = vld [vmem:[%s17218_s12 + $0x74c] ss:$16 sps:$4 sm:$0xff]  }
 0x8e8   :  { %v7282_v0 = vmax.f32 %v11363_v57, 0.0  ;;  %v7279_v2 = vpop.f32.mrb[35].mxu1  ;;  %v12989_v53 = vld [vmem:[%s17218_s12 + $0x748] ss:$16 sps:$4 sm:$0xff]   ;;  %v12994_v56 = vld [vmem:[%s17218_s12 + $0x764] ss:$16 sps:$4 sm:$0xff]  }
 0x8e9   :  { %v7284_v3 = vmax.f32 %v11365_v61, 0.0  ;;  %v7285_v7 = vpack.c.bf16 %v7281_v60, %v7281_v60  ;;  %v12997_v57 = vld [vmem:[%s17218_s12 + $0x76c] ss:$16 sps:$4 sm:$0xff]   ;;  %v12992_v58 = vld [vmem:[%s17218_s12 + $0x760] ss:$16 sps:$4 sm:$0xff]  }
 0x8ea   :  { %v7286_v40 = vpack.c.bf16 %v7282_v0, %v7282_v0  ;;  %v12995_v59 = vld [vmem:[%s17218_s12 + $0x768] ss:$16 sps:$4 sm:$0xff]   ;;  %v13000_v60 = vld [vmem:[%s17218_s12 + $0x784] ss:$16 sps:$4 sm:$0xff]   ;;  %v13003_v61 = vld [vmem:[%s17218_s12 + $0x78c] ss:$16 sps:$4 sm:$0xff]  }
 0x8eb   :  { %v7288_v9 = vpack.c.bf16 %v7284_v3, %v7284_v3  ;;  %v12998_v35 = vld [vmem:[%s17218_s12 + $0x780] ss:$16 sps:$4 sm:$0xff]   ;;  %v13001_v62 = vld [vmem:[%s17218_s12 + $0x788] ss:$16 sps:$4 sm:$0xff]   ;;  %v13006_v0 = vld [vmem:[%s17218_s12 + $0x7a4] ss:$16 sps:$4 sm:$0xff]  }
 0x8ec   :  { %8113 = vmatprep.mubr.bf16.mxu0 %v7286_v40  ;;  %8195 = vmatprep.mubr.bf16.mxu1 %v7286_v40  ;;  %v13009_v2 = vld [vmem:[%s17218_s12 + $0x7ac] ss:$16 sps:$4 sm:$0xff]   ;;  %v13004_v3 = vld [vmem:[%s17218_s12 + $0x7a0] ss:$16 sps:$4 sm:$0xff]   ;;  %v13007_v40 = vld [vmem:[%s17218_s12 + $0x7a8] ss:$16 sps:$4 sm:$0xff]  }
 0x8ed   :  { %8114 = vmatmul.mubr.bf16.vlgmr.msra.gmra.mrb[36].mxu0 %v7285_v7  ;;  %8196 = vmatmul.mubr.bf16.vlgmr.msra.gmra.mrb[36].mxu1 %v7285_v7  ;;  %v13015_v7 = vld [vmem:[%s17218_s12 + $0x7cc] ss:$16 sps:$4 sm:$0xff]  }
 0x8ee   :  { %8123 = vmatpush1.bf16.msra.mxu0 %v12926_v4  ;;  %8205 = vmatpush1.bf16.msra.mxu1 %v12929_v6  ;;  %v6468_v4 = vrot.slane %v16496_v28, %v13734_v29  ;;  %v13012_v6 = vld [vmem:[%s17218_s12 + $0x7c4] ss:$16 sps:$4 sm:$0xff]   ;;  %v13013_v28 = vld [vmem:[%s17218_s12 + $0x7c8] ss:$16 sps:$4 sm:$0xff]  }
 0x8ef   :  { %8154 = vmatprep.mubr.bf16.mxu0 %v7288_v9  ;;  %8236 = vmatprep.mubr.bf16.mxu1 %v7288_v9  ;;  %v13018_v9 = vld [vmem:[%s17218_s12 + $0x7e4] ss:$16 sps:$4 sm:$0xff]  }
 0x8f0   :  { %8124 = vmatprep.subr.bf16.mxu0 %v12934_v8  ;;  %8206 = vmatprep.subr.bf16.mxu1 %v12937_v50  ;;  %v13010_v8 = vld [vmem:[%s17218_s12 + $0x7c0] ss:$16 sps:$4 sm:$0xff]   ;;  %v11364_v50 = vadd.f32 %v16504_v54, %v6468_v4  ;;  %v13019_v54 = vld [vmem:[%s17218_s12 + $0x7e8] ss:$16 sps:$4 sm:$0xff]  }
 0x8f1   :  { %v13088_v4 = vld [vmem:[%s17220_s14 + $0x560] ss:$16 sps:$4 sm:$0xff]  }
 0x8f2   :  { %8125 = vmatpush1.bf16.msra.mxu0 %v12932_v46  ;;  %8207 = vmatpush1.bf16.msra.mxu1 %v12935_v10  ;;  %v13021_v46 = vld [vmem:[%s17218_s12 + $0x7ec] ss:$16 sps:$4 sm:$0xff]   ;;  %v13016_v10 = vld [vmem:[%s17218_s12 + $0x7e0] ss:$16 sps:$4 sm:$0xff]  }
 0x8f3   :  { %8126 = vmatprep.subr.bf16.mxu0 %v12940_v16  ;;  %8208 = vmatprep.subr.bf16.mxu1 %v12943_v17  ;;  %v7283_v16 = vmax.f32 %v11364_v50, 0.0  ;;  %v13024_v17 = vld [vmem:[%s17220_s14 + $0x404] ss:$16 sps:$4 sm:$0xff]   ;;  %v13097_v50 = vld [vmem:[%s17220_s14 + $0x588] ss:$16 sps:$4 sm:$0xff]  }
 0x8f6   :  { %8127 = vmatpush1.bf16.msra.mxu0 %v12938_v55  ;;  %8209 = vmatpush1.bf16.msra.mxu1 %v12941_v51  ;;  %v13027_v55 = vld [vmem:[%s17220_s14 + $0x40c] ss:$16 sps:$4 sm:$0xff]   ;;  %v13022_v51 = vld [vmem:[%s17220_s14 + $0x400] ss:$16 sps:$4 sm:$0xff]  }
 0x8f7   :  { %8128 = vmatprep.subr.bf16.mxu0 %v12946_v18  ;;  %8210 = vmatprep.subr.bf16.mxu1 %v12949_v19  ;;  %v13025_v18 = vld [vmem:[%s17220_s14 + $0x408] ss:$16 sps:$4 sm:$0xff]   ;;  %v7287_v19 = vpack.c.bf16 %v7283_v16, %v7283_v16  ;;  %v13108_v16 = vld [vmem:[%s17220_s14 + $0x5c4] ss:$16 sps:$4 sm:$0xff]  }
 0x8fa   :  { %8129 = vmatpush1.bf16.msra.mxu0 %v12944_v20  ;;  %8211 = vmatpush1.bf16.msra.mxu1 %v12947_v21  ;;  %v13030_v20 = vld [vmem:[%s17220_s14 + $0x424] ss:$16 sps:$4 sm:$0xff]   ;;  %v13033_v21 = vld [vmem:[%s17220_s14 + $0x42c] ss:$16 sps:$4 sm:$0xff]  }
 0x8fb   :  { %8130 = vmatprep.subr.bf16.mxu0 %v12952_v22  ;;  %8212 = vmatprep.subr.bf16.mxu1 %v12955_v23  ;;  %v13028_v22 = vld [vmem:[%s17220_s14 + $0x420] ss:$16 sps:$4 sm:$0xff]   ;;  %v13031_v23 = vld [vmem:[%s17220_s14 + $0x428] ss:$16 sps:$4 sm:$0xff]  }
 0x8fe   :  { %8131 = vmatpush1.bf16.msra.mxu0 %v12950_v25  ;;  %8213 = vmatpush1.bf16.msra.mxu1 %v12953_v26  ;;  %v13036_v25 = vld [vmem:[%s17220_s14 + $0x444] ss:$16 sps:$4 sm:$0xff]   ;;  %v13039_v26 = vld [vmem:[%s17220_s14 + $0x44c] ss:$16 sps:$4 sm:$0xff]  }
 0x8ff   :  { %8132 = vmatprep.subr.bf16.mxu0 %v12958_v63  ;;  %8214 = vmatprep.subr.bf16.mxu1 %v12961_v30  ;;  %v13034_v63 = vld [vmem:[%s17220_s14 + $0x440] ss:$16 sps:$4 sm:$0xff]   ;;  %v13037_v30 = vld [vmem:[%s17220_s14 + $0x448] ss:$16 sps:$4 sm:$0xff]  }
 0x902   :  { %8133 = vmatpush1.bf16.msra.mxu0 %v12956_v31  ;;  %8215 = vmatpush1.bf16.msra.mxu1 %v12959_v27  ;;  %v13042_v31 = vld [vmem:[%s17220_s14 + $0x464] ss:$16 sps:$4 sm:$0xff]   ;;  %v13045_v27 = vld [vmem:[%s17220_s14 + $0x46c] ss:$16 sps:$4 sm:$0xff]  }
 0x903   :  { %8134 = vmatprep.subr.bf16.mxu0 %v12964_v33  ;;  %8216 = vmatprep.subr.bf16.mxu1 %v12967_v32  ;;  %v13040_v33 = vld [vmem:[%s17220_s14 + $0x460] ss:$16 sps:$4 sm:$0xff]   ;;  %v13043_v32 = vld [vmem:[%s17220_s14 + $0x468] ss:$16 sps:$4 sm:$0xff]  }
 0x906   :  { %8135 = vmatpush1.bf16.msra.mxu0 %v12962_v34  ;;  %8217 = vmatpush1.bf16.msra.mxu1 %v12965_v5  ;;  %v13048_v34 = vld [vmem:[%s17220_s14 + $0x484] ss:$16 sps:$4 sm:$0xff]   ;;  %v13051_v5 = vld [vmem:[%s17220_s14 + $0x48c] ss:$16 sps:$4 sm:$0xff]  }
 0x907   :  { %8136 = vmatprep.subr.bf16.mxu0 %v12970_v36  ;;  %8218 = vmatprep.subr.bf16.mxu1 %v12973_v39  ;;  %v13046_v36 = vld [vmem:[%s17220_s14 + $0x480] ss:$16 sps:$4 sm:$0xff]   ;;  %v13049_v39 = vld [vmem:[%s17220_s14 + $0x488] ss:$16 sps:$4 sm:$0xff]  }
 0x90a   :  { %8137 = vmatpush1.bf16.msra.mxu0 %v12968_v13  ;;  %8219 = vmatpush1.bf16.msra.mxu1 %v12971_v37  ;;  %v13054_v13 = vld [vmem:[%s17220_s14 + $0x4a4] ss:$16 sps:$4 sm:$0xff]   ;;  %v13057_v37 = vld [vmem:[%s17220_s14 + $0x4ac] ss:$16 sps:$4 sm:$0xff]  }
 0x90b   :  { %8138 = vmatprep.subr.bf16.mxu0 %v12976_v38  ;;  %8220 = vmatprep.subr.bf16.mxu1 %v12979_v24  ;;  %v13052_v38 = vld [vmem:[%s17220_s14 + $0x4a0] ss:$16 sps:$4 sm:$0xff]   ;;  %v13055_v24 = vld [vmem:[%s17220_s14 + $0x4a8] ss:$16 sps:$4 sm:$0xff]  }
 0x90e   :  { %8139 = vmatpush1.bf16.msra.mxu0 %v12974_v41  ;;  %8221 = vmatpush1.bf16.msra.mxu1 %v12977_v42  ;;  %v13060_v41 = vld [vmem:[%s17220_s14 + $0x4c4] ss:$16 sps:$4 sm:$0xff]   ;;  %v13063_v42 = vld [vmem:[%s17220_s14 + $0x4cc] ss:$16 sps:$4 sm:$0xff]  }
 0x90f   :  { %8140 = vmatprep.subr.bf16.mxu0 %v12982_v43  ;;  %8222 = vmatprep.subr.bf16.mxu1 %v12985_v45  ;;  %v13058_v43 = vld [vmem:[%s17220_s14 + $0x4c0] ss:$16 sps:$4 sm:$0xff]   ;;  %v13061_v45 = vld [vmem:[%s17220_s14 + $0x4c8] ss:$16 sps:$4 sm:$0xff]  }
 0x912   :  { %8141 = vmatpush1.bf16.msra.mxu0 %v12980_v47  ;;  %8223 = vmatpush1.bf16.msra.mxu1 %v12983_v48  ;;  %v13066_v47 = vld [vmem:[%s17220_s14 + $0x4e4] ss:$16 sps:$4 sm:$0xff]   ;;  %v13069_v48 = vld [vmem:[%s17220_s14 + $0x4ec] ss:$16 sps:$4 sm:$0xff]  }
 0x913   :  { %8142 = vmatprep.subr.bf16.mxu0 %v12988_v49  ;;  %8224 = vmatprep.subr.bf16.mxu1 %v12991_v52  ;;  %v13064_v49 = vld [vmem:[%s17220_s14 + $0x4e0] ss:$16 sps:$4 sm:$0xff]   ;;  %v13067_v52 = vld [vmem:[%s17220_s14 + $0x4e8] ss:$16 sps:$4 sm:$0xff]  }
 0x916   :  { %8143 = vmatpush1.bf16.msra.mxu0 %v12986_v11  ;;  %8225 = vmatpush1.bf16.msra.mxu1 %v12989_v53  ;;  %v13072_v11 = vld [vmem:[%s17220_s14 + $0x504] ss:$16 sps:$4 sm:$0xff]   ;;  %v13075_v53 = vld [vmem:[%s17220_s14 + $0x50c] ss:$16 sps:$4 sm:$0xff]  }
 0x917   :  { %8144 = vmatprep.subr.bf16.mxu0 %v12994_v56  ;;  %8226 = vmatprep.subr.bf16.mxu1 %v12997_v57  ;;  %v13070_v56 = vld [vmem:[%s17220_s14 + $0x500] ss:$16 sps:$4 sm:$0xff]   ;;  %v13073_v57 = vld [vmem:[%s17220_s14 + $0x508] ss:$16 sps:$4 sm:$0xff]  }
 0x91a   :  { %8145 = vmatpush1.bf16.msra.mxu0 %v12992_v58  ;;  %8227 = vmatpush1.bf16.msra.mxu1 %v12995_v59  ;;  %v13078_v58 = vld [vmem:[%s17220_s14 + $0x524] ss:$16 sps:$4 sm:$0xff]   ;;  %v13081_v59 = vld [vmem:[%s17220_s14 + $0x52c] ss:$16 sps:$4 sm:$0xff]  }
 0x91b   :  { %8146 = vmatprep.subr.bf16.mxu0 %v13000_v60  ;;  %8228 = vmatprep.subr.bf16.mxu1 %v13003_v61  ;;  %v13076_v60 = vld [vmem:[%s17220_s14 + $0x520] ss:$16 sps:$4 sm:$0xff]   ;;  %v13079_v61 = vld [vmem:[%s17220_s14 + $0x528] ss:$16 sps:$4 sm:$0xff]  }
 0x91e   :  { %8147 = vmatpush1.bf16.msra.mxu0 %v12998_v35  ;;  %8229 = vmatpush1.bf16.msra.mxu1 %v13001_v62  ;;  %v13084_v35 = vld [vmem:[%s17220_s14 + $0x544] ss:$16 sps:$4 sm:$0xff]   ;;  %v13087_v62 = vld [vmem:[%s17220_s14 + $0x54c] ss:$16 sps:$4 sm:$0xff]  }
 0x91f   :  { %8148 = vmatprep.subr.bf16.mxu0 %v13006_v0  ;;  %8230 = vmatprep.subr.bf16.mxu1 %v13009_v2  ;;  %v13082_v0 = vld [vmem:[%s17220_s14 + $0x540] ss:$16 sps:$4 sm:$0xff]   ;;  %v13085_v2 = vld [vmem:[%s17220_s14 + $0x548] ss:$16 sps:$4 sm:$0xff]  }
 0x922   :  { %8149 = vmatpush1.bf16.msra.mxu0 %v13004_v3  ;;  %8231 = vmatpush1.bf16.msra.mxu1 %v13007_v40  ;;  %v13090_v3 = vld [vmem:[%s17220_s14 + $0x564] ss:$16 sps:$4 sm:$0xff]   ;;  %v13093_v40 = vld [vmem:[%s17220_s14 + $0x56c] ss:$16 sps:$4 sm:$0xff]  }
 0x923   :  { %8150 = vmatprep.subr.bf16.mxu0 %v13012_v6  ;;  %8232 = vmatprep.subr.bf16.mxu1 %v13015_v7  ;;  %v13091_v6 = vld [vmem:[%s17220_s14 + $0x568] ss:$16 sps:$4 sm:$0xff]   ;;  %v13096_v7 = vld [vmem:[%s17220_s14 + $0x584] ss:$16 sps:$4 sm:$0xff]  }
 0x926   :  { %8151 = vmatpush1.bf16.msra.mxu0 %v13010_v8  ;;  %8233 = vmatpush1.bf16.msra.mxu1 %v13013_v28  ;;  %v13099_v8 = vld [vmem:[%s17220_s14 + $0x58c] ss:$16 sps:$4 sm:$0xff]   ;;  %v13094_v28 = vld [vmem:[%s17220_s14 + $0x580] ss:$16 sps:$4 sm:$0xff]  }
 0x927   :  { %8152 = vmatprep.subr.bf16.mxu0 %v13018_v9  ;;  %8234 = vmatprep.subr.bf16.mxu1 %v13021_v46  ;;  %v13102_v9 = vld [vmem:[%s17220_s14 + $0x5a4] ss:$16 sps:$4 sm:$0xff]   ;;  %v13105_v46 = vld [vmem:[%s17220_s14 + $0x5ac] ss:$16 sps:$4 sm:$0xff]  }
 0x92a   :  { %8153 = vmatpush1.bf16.msra.mxu0 %v13016_v10  ;;  %8235 = vmatpush1.bf16.msra.mxu1 %v13019_v54  ;;  %v13100_v10 = vld [vmem:[%s17220_s14 + $0x5a0] ss:$16 sps:$4 sm:$0xff]   ;;  %v13103_v54 = vld [vmem:[%s17220_s14 + $0x5a8] ss:$16 sps:$4 sm:$0xff]  }
 0x92b   :  { %9045 = vmatprep.subr.bf16.mxu0 %v13024_v17  ;;  %9127 = vmatprep.subr.bf16.mxu1 %v13027_v55  ;;  %v13111_v17 = vld [vmem:[%s17220_s14 + $0x5cc] ss:$16 sps:$4 sm:$0xff]   ;;  %v13106_v55 = vld [vmem:[%s17220_s14 + $0x5c0] ss:$16 sps:$4 sm:$0xff]  }
 0x92d   :  { %8155 = vmatmul.mubr.bf16.vlgmr.msra.gmra.mrb[36].mxu0 %v7287_v19  ;;  %8237 = vmatmul.mubr.bf16.vlgmr.msra.gmra.mrb[36].mxu1 %v7287_v19  ;;  %v13117_v19 = vld [vmem:[%s17220_s14 + $0x5ec] ss:$16 sps:$4 sm:$0xff]  }
 0x92e   :  { %9046 = vmatpush1.bf16.msra.mxu0 %v13022_v51  ;;  %9128 = vmatpush1.bf16.msra.mxu1 %v13025_v18  ;;  %v13109_v51 = vld [vmem:[%s17220_s14 + $0x5c8] ss:$16 sps:$4 sm:$0xff]   ;;  %v13114_v18 = vld [vmem:[%s17220_s14 + $0x5e4] ss:$16 sps:$4 sm:$0xff]  }
 0x92f   :  { %9047 = vmatprep.subr.bf16.mxu0 %v13030_v20  ;;  %9129 = vmatprep.subr.bf16.mxu1 %v13033_v21  ;;  %v13112_v20 = vld [vmem:[%s17220_s14 + $0x5e0] ss:$16 sps:$4 sm:$0xff]   ;;  %v13115_v21 = vld [vmem:[%s17220_s14 + $0x5e8] ss:$16 sps:$4 sm:$0xff]  }
 0x932   :  { %9048 = vmatpush1.bf16.msra.mxu0 %v13028_v22  ;;  %9130 = vmatpush1.bf16.msra.mxu1 %v13031_v23  ;;  %v13120_v22 = vld [vmem:[%s17220_s14 + $0x604] ss:$16 sps:$4 sm:$0xff]   ;;  %v13123_v23 = vld [vmem:[%s17220_s14 + $0x60c] ss:$16 sps:$4 sm:$0xff]  }
 0x933   :  { %9049 = vmatprep.subr.bf16.mxu0 %v13036_v25  ;;  %9131 = vmatprep.subr.bf16.mxu1 %v13039_v26  ;;  %v16896_v25 = vld [vmem:[%s17223_s13 + $0x4] sm:$0xf] }
 0x934   :  { %v7424_v26 = vrot.slane %v16896_v25, %v13562_v12 }
 0x936   :  { %9050 = vmatpush1.bf16.msra.mxu0 %v13034_v63  ;;  %9132 = vmatpush1.bf16.msra.mxu1 %v13037_v30  ;;  %v7428_v63 = vrot.slane %v16896_v25, %v13570_v14  ;;  %v7436_v30 = vrot.slane %v16896_v25, %v13573_v15 }
 0x937   :  { %9051 = vmatprep.subr.bf16.mxu0 %v13042_v31  ;;  %9133 = vmatprep.subr.bf16.mxu1 %v13045_v27 }
 0x93a   :  { %9052 = vmatpush1.bf16.msra.mxu0 %v13040_v33  ;;  %9134 = vmatpush1.bf16.msra.mxu1 %v13043_v32 }
 0x93b   :  { %9053 = vmatprep.subr.bf16.mxu0 %v13048_v34  ;;  %9135 = vmatprep.subr.bf16.mxu1 %v13051_v5 }
 0x93e   :  { %9054 = vmatpush1.bf16.msra.mxu0 %v13046_v36  ;;  %9136 = vmatpush1.bf16.msra.mxu1 %v13049_v39 }
 0x93f   :  { %9055 = vmatprep.subr.bf16.mxu0 %v13054_v13  ;;  %9137 = vmatprep.subr.bf16.mxu1 %v13057_v37 }
 0x942   :  { %9056 = vmatpush1.bf16.msra.mxu0 %v13052_v38  ;;  %9138 = vmatpush1.bf16.msra.mxu1 %v13055_v24 }
 0x943   :  { %9057 = vmatprep.subr.bf16.mxu0 %v13060_v41  ;;  %9139 = vmatprep.subr.bf16.mxu1 %v13063_v42 }
 0x946   :  { %9058 = vmatpush1.bf16.msra.mxu0 %v13058_v43  ;;  %9140 = vmatpush1.bf16.msra.mxu1 %v13061_v45  ;;  %v13118_v45 = vld [vmem:[%s17220_s14 + $0x600] ss:$16 sps:$4 sm:$0xff]  }
 0x947   :  { %9059 = vmatprep.subr.bf16.mxu0 %v13066_v47  ;;  %9141 = vmatprep.subr.bf16.mxu1 %v13069_v48  ;;  %v13121_v47 = vld [vmem:[%s17220_s14 + $0x608] ss:$16 sps:$4 sm:$0xff]  }
 0x94a   :  { %9060 = vmatpush1.bf16.msra.mxu0 %v13064_v49  ;;  %9142 = vmatpush1.bf16.msra.mxu1 %v13067_v52  ;;  %v13126_v49 = vld [vmem:[%s17220_s14 + $0x624] ss:$16 sps:$4 sm:$0xff]   ;;  %v13129_v52 = vld [vmem:[%s17220_s14 + $0x62c] ss:$16 sps:$4 sm:$0xff]  }
 0x94b   :  { %9061 = vmatprep.subr.bf16.mxu0 %v13072_v11  ;;  %9143 = vmatprep.subr.bf16.mxu1 %v13075_v53  ;;  %v13124_v53 = vld [vmem:[%s17220_s14 + $0x620] ss:$16 sps:$4 sm:$0xff]  }
 0x94e   :  { %9062 = vmatpush1.bf16.msra.mxu0 %v13070_v56  ;;  %9144 = vmatpush1.bf16.msra.mxu1 %v13073_v57  ;;  %v13127_v56 = vld [vmem:[%s17220_s14 + $0x628] ss:$16 sps:$4 sm:$0xff]   ;;  %v13132_v57 = vld [vmem:[%s17220_s14 + $0x644] ss:$16 sps:$4 sm:$0xff]  }
 0x94f   :  { %9063 = vmatprep.subr.bf16.mxu0 %v13078_v58  ;;  %9145 = vmatprep.subr.bf16.mxu1 %v13081_v59  ;;  %v13135_v58 = vld [vmem:[%s17220_s14 + $0x64c] ss:$16 sps:$4 sm:$0xff]   ;;  %v13130_v59 = vld [vmem:[%s17220_s14 + $0x640] ss:$16 sps:$4 sm:$0xff]  }
 0x952   :  { %9064 = vmatpush1.bf16.msra.mxu0 %v13076_v60  ;;  %9146 = vmatpush1.bf16.msra.mxu1 %v13079_v61  ;;  %v13133_v60 = vld [vmem:[%s17220_s14 + $0x648] ss:$16 sps:$4 sm:$0xff]   ;;  %v13138_v61 = vld [vmem:[%s17220_s14 + $0x664] ss:$16 sps:$4 sm:$0xff]  }
 0x953   :  { %9065 = vmatprep.subr.bf16.mxu0 %v13084_v35  ;;  %9147 = vmatprep.subr.bf16.mxu1 %v13087_v62  ;;  %v13141_v35 = vld [vmem:[%s17220_s14 + $0x66c] ss:$16 sps:$4 sm:$0xff]   ;;  %v13136_v62 = vld [vmem:[%s17220_s14 + $0x660] ss:$16 sps:$4 sm:$0xff]  }
 0x956   :  { %9066 = vmatpush1.bf16.msra.mxu0 %v13082_v0  ;;  %9148 = vmatpush1.bf16.msra.mxu1 %v13085_v2  ;;  %v13139_v0 = vld [vmem:[%s17220_s14 + $0x668] ss:$16 sps:$4 sm:$0xff]   ;;  %v13144_v2 = vld [vmem:[%s17220_s14 + $0x684] ss:$16 sps:$4 sm:$0xff]  }
 0x957   :  { %9067 = vmatprep.subr.bf16.mxu0 %v13090_v3  ;;  %9149 = vmatprep.subr.bf16.mxu1 %v13093_v40  ;;  %v13147_v3 = vld [vmem:[%s17220_s14 + $0x68c] ss:$16 sps:$4 sm:$0xff]   ;;  %v13142_v40 = vld [vmem:[%s17220_s14 + $0x680] ss:$16 sps:$4 sm:$0xff]  }
 0x95a   :  { %9068 = vmatpush1.bf16.msra.mxu0 %v13088_v4  ;;  %9150 = vmatpush1.bf16.msra.mxu1 %v13091_v6  ;;  %v13145_v4 = vld [vmem:[%s17220_s14 + $0x688] ss:$16 sps:$4 sm:$0xff]   ;;  %v13150_v6 = vld [vmem:[%s17220_s14 + $0x6a4] ss:$16 sps:$4 sm:$0xff]  }
 0x95b   :  { %9069 = vmatprep.subr.bf16.mxu0 %v13096_v7  ;;  %9151 = vmatprep.subr.bf16.mxu1 %v13099_v8  ;;  %v13153_v7 = vld [vmem:[%s17220_s14 + $0x6ac] ss:$16 sps:$4 sm:$0xff]   ;;  %v13148_v8 = vld [vmem:[%s17220_s14 + $0x6a0] ss:$16 sps:$4 sm:$0xff]  }
 0x95e   :  { %9070 = vmatpush1.bf16.msra.mxu0 %v13094_v28  ;;  %9152 = vmatpush1.bf16.msra.mxu1 %v13097_v50  ;;  %v13151_v28 = vld [vmem:[%s17220_s14 + $0x6a8] ss:$16 sps:$4 sm:$0xff]   ;;  %v13156_v50 = vld [vmem:[%s17220_s14 + $0x6c4] ss:$16 sps:$4 sm:$0xff]  }
 0x95f   :  { %9071 = vmatprep.subr.bf16.mxu0 %v13102_v9  ;;  %9153 = vmatprep.subr.bf16.mxu1 %v13105_v46  ;;  %v13159_v9 = vld [vmem:[%s17220_s14 + $0x6cc] ss:$16 sps:$4 sm:$0xff]   ;;  %v13154_v46 = vld [vmem:[%s17220_s14 + $0x6c0] ss:$16 sps:$4 sm:$0xff]  }
 0x962   :  { %9072 = vmatpush1.bf16.msra.mxu0 %v13100_v10  ;;  %9154 = vmatpush1.bf16.msra.mxu1 %v13103_v54  ;;  %v13157_v10 = vld [vmem:[%s17220_s14 + $0x6c8] ss:$16 sps:$4 sm:$0xff]   ;;  %v13162_v54 = vld [vmem:[%s17220_s14 + $0x6e4] ss:$16 sps:$4 sm:$0xff]  }
 0x963   :  { %9073 = vmatprep.subr.bf16.mxu0 %v13108_v16  ;;  %9155 = vmatprep.subr.bf16.mxu1 %v13111_v17  ;;  %v13165_v16 = vld [vmem:[%s17220_s14 + $0x6ec] ss:$16 sps:$4 sm:$0xff]   ;;  %v13160_v17 = vld [vmem:[%s17220_s14 + $0x6e0] ss:$16 sps:$4 sm:$0xff]  }
 0x966   :  { %9074 = vmatpush1.bf16.msra.mxu0 %v13106_v55  ;;  %9156 = vmatpush1.bf16.msra.mxu1 %v13109_v51  ;;  %v13163_v55 = vld [vmem:[%s17220_s14 + $0x6e8] ss:$16 sps:$4 sm:$0xff]   ;;  %v13168_v51 = vld [vmem:[%s17220_s14 + $0x704] ss:$16 sps:$4 sm:$0xff]  }
 0x967   :  { %9075 = vmatprep.subr.bf16.mxu0 %v13114_v18  ;;  %9157 = vmatprep.subr.bf16.mxu1 %v13117_v19  ;;  %v13171_v18 = vld [vmem:[%s17220_s14 + $0x70c] ss:$16 sps:$4 sm:$0xff]   ;;  %v13166_v19 = vld [vmem:[%s17220_s14 + $0x700] ss:$16 sps:$4 sm:$0xff]  }
 0x96a   :  { %9076 = vmatpush1.bf16.msra.mxu0 %v13112_v20  ;;  %9158 = vmatpush1.bf16.msra.mxu1 %v13115_v21  ;;  %v13169_v20 = vld [vmem:[%s17220_s14 + $0x708] ss:$16 sps:$4 sm:$0xff]   ;;  %v13174_v21 = vld [vmem:[%s17220_s14 + $0x724] ss:$16 sps:$4 sm:$0xff]  }
 0x96b   :  { %9086 = vmatprep.subr.bf16.mxu0 %v13120_v22  ;;  %9168 = vmatprep.subr.bf16.mxu1 %v13123_v23  ;;  %v13177_v22 = vld [vmem:[%s17220_s14 + $0x72c] ss:$16 sps:$4 sm:$0xff]   ;;  %v13172_v23 = vld [vmem:[%s17220_s14 + $0x720] ss:$16 sps:$4 sm:$0xff]  }
 0xa00   :  { %v8156_v31 = vpop.f32.mrb[36].mxu0  ;;  %v16904_v27 = vpop.f32.mrb[36].mxu1 }
 0xa01   :  { %v11366_v33 = vadd.f32 %v8156_v31, %v7424_v26  ;;  %v8158_v32 = vpop.f32.mrb[37].mxu0  ;;  %v8240_v34 = vpop.f32.mrb[37].mxu1  ;;  %v13175_v26 = vld [vmem:[%s17220_s14 + $0x728] ss:$16 sps:$4 sm:$0xff]   ;;  %v13178_v31 = vld [vmem:[%s17220_s14 + $0x740] ss:$16 sps:$4 sm:$0xff]  }
 0xa02   :  { %v11367_v5 = vadd.f32 %v8158_v32, %v7428_v63  ;;  %v11369_v36 = vadd.f32 %v8240_v34, %v7436_v30  ;;  %v8160_v39 = vpop.f32.mrb[38].mxu0  ;;  %v8242_v13 = vpop.f32.mrb[38].mxu1  ;;  %v13180_v63 = vld [vmem:[%s17220_s14 + $0x744] ss:$16 sps:$4 sm:$0xff]   ;;  %v13183_v30 = vld [vmem:[%s17220_s14 + $0x74c] ss:$16 sps:$4 sm:$0xff]  }
 0xa03   :  { %v8245_v37 = vmax.f32 %v11366_v33, 0.0  ;;  %v8161_v38 = vpop.f32.mrb[39].mxu0  ;;  %v8243_v24 = vpop.f32.mrb[39].mxu1  ;;  %v13181_v33 = vld [vmem:[%s17220_s14 + $0x748] ss:$16 sps:$4 sm:$0xff]  }
 0xa04   :  { %v8246_v41 = vmax.f32 %v11367_v5, 0.0  ;;  %v8248_v42 = vmax.f32 %v11369_v36, 0.0  ;;  %v13186_v32 = vld [vmem:[%s17220_s14 + $0x764] ss:$16 sps:$4 sm:$0xff]   ;;  %v13189_v34 = vld [vmem:[%s17220_s14 + $0x76c] ss:$16 sps:$4 sm:$0xff]  }
 0xa05   :  { %v8249_v48 = vpack.c.bf16 %v8245_v37, %v8245_v37  ;;  %v13184_v5 = vld [vmem:[%s17220_s14 + $0x760] ss:$16 sps:$4 sm:$0xff]   ;;  %v13187_v36 = vld [vmem:[%s17220_s14 + $0x768] ss:$16 sps:$4 sm:$0xff]   ;;  %v13192_v39 = vld [vmem:[%s17220_s14 + $0x784] ss:$16 sps:$4 sm:$0xff]  }
 0xa06   :  { %v8250_v43 = vpack.c.bf16 %v8246_v41, %v8246_v41  ;;  %v8252_v11 = vpack.c.bf16 %v8248_v42, %v8248_v42  ;;  %v13195_v13 = vld [vmem:[%s17220_s14 + $0x78c] ss:$16 sps:$4 sm:$0xff]   ;;  %v13190_v37 = vld [vmem:[%s17220_s14 + $0x780] ss:$16 sps:$4 sm:$0xff]   ;;  %v13193_v38 = vld [vmem:[%s17220_s14 + $0x788] ss:$16 sps:$4 sm:$0xff]  }
 0xa07   :  { %v13198_v24 = vld [vmem:[%s17220_s14 + $0x7a4] ss:$16 sps:$4 sm:$0xff]   ;;  %v13201_v41 = vld [vmem:[%s17220_s14 + $0x7ac] ss:$16 sps:$4 sm:$0xff]   ;;  %v13196_v42 = vld [vmem:[%s17220_s14 + $0x7a0] ss:$16 sps:$4 sm:$0xff]  }
 0xa08   :  { %9077 = vmatprep.mubr.bf16.mxu0 %v8250_v43  ;;  %9159 = vmatprep.mubr.bf16.mxu1 %v8250_v43  ;;  %v13199_v43 = vld [vmem:[%s17220_s14 + $0x7a8] ss:$16 sps:$4 sm:$0xff]  }
 0xa09   :  { %9078 = vmatmul.mubr.bf16.vlgmr.msra.gmra.mrb[40].mxu0 %v8249_v48  ;;  %9160 = vmatmul.mubr.bf16.vlgmr.msra.gmra.mrb[40].mxu1 %v8249_v48  ;;  %v13207_v48 = vld [vmem:[%s17220_s14 + $0x7cc] ss:$16 sps:$4 sm:$0xff]  }
 0xa0a   :  { %9087 = vmatpush1.bf16.msra.mxu0 %v13118_v45  ;;  %9169 = vmatpush1.bf16.msra.mxu1 %v13121_v47  ;;  %v7432_v45 = vrot.slane %v16896_v25, %v13734_v29  ;;  %v13204_v47 = vld [vmem:[%s17220_s14 + $0x7c4] ss:$16 sps:$4 sm:$0xff]   ;;  %v13205_v25 = vld [vmem:[%s17220_s14 + $0x7c8] ss:$16 sps:$4 sm:$0xff]  }
 0xa0b   :  { %9118 = vmatprep.mubr.bf16.mxu0 %v8252_v11  ;;  %9200 = vmatprep.mubr.bf16.mxu1 %v8252_v11  ;;  %v13210_v11 = vld [vmem:[%s17220_s14 + $0x7e4] ss:$16 sps:$4 sm:$0xff]  }
 0xa0c   :  { %9088 = vmatprep.subr.bf16.mxu0 %v13126_v49  ;;  %9170 = vmatprep.subr.bf16.mxu1 %v13129_v52  ;;  %v13202_v49 = vld [vmem:[%s17220_s14 + $0x7c0] ss:$16 sps:$4 sm:$0xff]   ;;  %v11368_v52 = vadd.f32 %v16904_v27, %v7432_v45  ;;  %v13211_v27 = vld [vmem:[%s17220_s14 + $0x7e8] ss:$16 sps:$4 sm:$0xff]  }
 0xa0e   :  { %9089 = vmatpush1.bf16.msra.mxu0 %v13124_v53  ;;  %9171 = vmatpush1.bf16.msra.mxu1 %v13127_v56  ;;  %v13213_v53 = vld [vmem:[%s17220_s14 + $0x7ec] ss:$16 sps:$4 sm:$0xff]   ;;  %v13208_v56 = vld [vmem:[%s17220_s14 + $0x7e0] ss:$16 sps:$4 sm:$0xff]  }
 0xa0f   :  { %9090 = vmatprep.subr.bf16.mxu0 %v13132_v57  ;;  %9172 = vmatprep.subr.bf16.mxu1 %v13135_v58  ;;  %v8247_v57 = vmax.f32 %v11368_v52, 0.0  ;;  %v13214_v58 = vld [vmem:[%s17222_s16 + $0x140] sm:$0xff]  }
 0xa12   :  { %9091 = vmatpush1.bf16.msra.mxu0 %v13130_v59  ;;  %9173 = vmatpush1.bf16.msra.mxu1 %v13133_v60  ;;  %v13215_v59 = vld [vmem:[%s17222_s16 + $0x1c0] sm:$0xff]  }
 0xa13   :  { %9092 = vmatprep.subr.bf16.mxu0 %v13138_v61  ;;  %9174 = vmatprep.subr.bf16.mxu1 %v13141_v35  ;;  %v13216_v60 = vld [vmem:[%s17222_s16 + $0x100] sm:$0xff]   ;;  %v8251_v35 = vpack.c.bf16 %v8247_v57, %v8247_v57 }
 0xa14   :  { %v13217_v61 = vld [vmem:[%s17222_s16 + $0x180] sm:$0xff]  }
 0xa16   :  { %9093 = vmatpush1.bf16.msra.mxu0 %v13136_v62  ;;  %9175 = vmatpush1.bf16.msra.mxu1 %v13139_v0  ;;  %v13218_v62 = vld [vmem:[%s17222_s16 + $0x148] sm:$0xff]  }
 0xa17   :  { %9094 = vmatprep.subr.bf16.mxu0 %v13144_v2  ;;  %9176 = vmatprep.subr.bf16.mxu1 %v13147_v3  ;;  %v13219_v0 = vld [vmem:[%s17222_s16 + $0x1c8] sm:$0xff]  }
 0xa18   :  { %v13220_v2 = vld [vmem:[%s17222_s16 + $0x108] sm:$0xff]  }
 0xa19   :  { %v13221_v3 = vld [vmem:[%s17222_s16 + $0x188] sm:$0xff]  }
 0xa1a   :  { %9095 = vmatpush1.bf16.msra.mxu0 %v13142_v40  ;;  %9177 = vmatpush1.bf16.msra.mxu1 %v13145_v4  ;;  %v13222_v40 = vld [vmem:[%s17222_s16 + $0x150] sm:$0xff]  }
 0xa1b   :  { %9096 = vmatprep.subr.bf16.mxu0 %v13150_v6  ;;  %9178 = vmatprep.subr.bf16.mxu1 %v13153_v7  ;;  %v13223_v4 = vld [vmem:[%s17222_s16 + $0x1d0] sm:$0xff]  }
 0xa1c   :  { %v13224_v6 = vld [vmem:[%s17222_s16 + $0x110] sm:$0xff]  }
 0xa1d   :  { %v13225_v7 = vld [vmem:[%s17222_s16 + $0x190] sm:$0xff]  }
 0xa1e   :  { %9097 = vmatpush1.bf16.msra.mxu0 %v13148_v8  ;;  %9179 = vmatpush1.bf16.msra.mxu1 %v13151_v28  ;;  %v13226_v8 = vld [vmem:[%s17222_s16 + $0x158] sm:$0xff]  }
 0xa1f   :  { %9098 = vmatprep.subr.bf16.mxu0 %v13156_v50  ;;  %9180 = vmatprep.subr.bf16.mxu1 %v13159_v9  ;;  %v13227_v28 = vld [vmem:[%s17222_s16 + $0x1d8] sm:$0xff]  }
 0xa20   :  { %v13228_v50 = vld [vmem:[%s17222_s16 + $0x118] sm:$0xff]  }
 0xa21   :  { %v13229_v9 = vld [vmem:[%s17222_s16 + $0x198] sm:$0xff]  }
 0xa22   :  { %9099 = vmatpush1.bf16.msra.mxu0 %v13154_v46  ;;  %9181 = vmatpush1.bf16.msra.mxu1 %v13157_v10  ;;  %v13230_v46 = vld [vmem:[%s17222_s16 + $0x160] sm:$0xff]  }
 0xa23   :  { %9100 = vmatprep.subr.bf16.mxu0 %v13162_v54  ;;  %9182 = vmatprep.subr.bf16.mxu1 %v13165_v16  ;;  %v13231_v10 = vld [vmem:[%s17222_s16 + $0x1e0] sm:$0xff]  }
 0xa24   :  { %v13232_v54 = vld [vmem:[%s17222_s16 + $0x120] sm:$0xff]  }
 0xa25   :  { %v13233_v16 = vld [vmem:[%s17222_s16 + $0x1a0] sm:$0xff]  }
 0xa26   :  { %9101 = vmatpush1.bf16.msra.mxu0 %v13160_v17  ;;  %9183 = vmatpush1.bf16.msra.mxu1 %v13163_v55  ;;  %v13234_v17 = vld [vmem:[%s17222_s16 + $0x168] sm:$0xff]  }
 0xa27   :  { %9102 = vmatprep.subr.bf16.mxu0 %v13168_v51  ;;  %9184 = vmatprep.subr.bf16.mxu1 %v13171_v18  ;;  %v13235_v55 = vld [vmem:[%s17222_s16 + $0x1e8] sm:$0xff]  }
 0xa28   :  { %v13236_v51 = vld [vmem:[%s17222_s16 + $0x128] sm:$0xff]  }
 0xa29   :  { %v13237_v18 = vld [vmem:[%s17222_s16 + $0x1a8] sm:$0xff]  }
 0xa2a   :  { %9103 = vmatpush1.bf16.msra.mxu0 %v13166_v19  ;;  %9185 = vmatpush1.bf16.msra.mxu1 %v13169_v20  ;;  %v13238_v19 = vld [vmem:[%s17222_s16 + $0x170] sm:$0xff]  }
 0xa2b   :  { %9104 = vmatprep.subr.bf16.mxu0 %v13174_v21  ;;  %9186 = vmatprep.subr.bf16.mxu1 %v13177_v22  ;;  %v13239_v20 = vld [vmem:[%s17222_s16 + $0x1f0] sm:$0xff]  }
 0xa2c   :  { %v13240_v21 = vld [vmem:[%s17222_s16 + $0x130] sm:$0xff]  }
 0xa2d   :  { %v13241_v22 = vld [vmem:[%s17222_s16 + $0x1b0] sm:$0xff]  }
 0xa2e   :  { %9105 = vmatpush1.bf16.msra.mxu0 %v13172_v23  ;;  %9187 = vmatpush1.bf16.msra.mxu1 %v13175_v26  ;;  %v13242_v23 = vld [vmem:[%s17222_s16 + $0x178] sm:$0xff]  }
 0xa2f   :  { %9106 = vmatprep.subr.bf16.mxu0 %v13180_v63  ;;  %9188 = vmatprep.subr.bf16.mxu1 %v13183_v30  ;;  %v13243_v26 = vld [vmem:[%s17222_s16 + $0x1f8] sm:$0xff]  }
 0xa30   :  { %v13244_v63 = vld [vmem:[%s17222_s16 + $0x138] sm:$0xff]  }
 0xa31   :  { %v13245_v30 = vld [vmem:[%s17222_s16 + $0x1b8] sm:$0xff]  }
 0xa32   :  { %9107 = vmatpush1.bf16.msra.mxu0 %v13178_v31  ;;  %9189 = vmatpush1.bf16.msra.mxu1 %v13181_v33  ;;  %v13246_v31 = vld [vmem:[%s17224_s1] sm:$0xff] }
 0xa33   :  { %9108 = vmatprep.subr.bf16.mxu0 %v13186_v32  ;;  %9190 = vmatprep.subr.bf16.mxu1 %v13189_v34  ;;  %vm9562_vm2 = vcmp.eq.s32.totalorder %v13246_v31, 1  ;;  %v11023_v32 = vld [vmem:[%s17225_s15 + $0x4] sm:$0xf] }
 0xa34   :  { %v9563_v33 = vsel %vm9562_vm2, 1, %v13247_v1  ;;  %v8388_v34 = vrot.slane %v11023_v32, %v13562_v12 }
 0xa35   :  { %9565 = vperm.xlu0 %11447, %v9563_v33  }
 0xa36   :  { %9109 = vmatpush1.bf16.msra.mxu0 %v13184_v5  ;;  %9191 = vmatpush1.bf16.msra.mxu1 %v13187_v36  ;;  %v8396_v5 = vrot.slane %v11023_v32, %v13734_v29  ;;  %v8392_v36 = vrot.slane %v11023_v32, %v13570_v14 }
 0xa37   :  { %9110 = vmatprep.subr.bf16.mxu0 %v13192_v39  ;;  %9192 = vmatprep.subr.bf16.mxu1 %v13195_v13  ;;  %v8400_v39 = vrot.slane %v11023_v32, %v13573_v15 }
 0xa3a   :  { %9111 = vmatpush1.bf16.msra.mxu0 %v13190_v37  ;;  %9193 = vmatpush1.bf16.msra.mxu1 %v13193_v38 }
 0xa3b   :  { %9112 = vmatprep.subr.bf16.mxu0 %v13198_v24  ;;  %9194 = vmatprep.subr.bf16.mxu1 %v13201_v41 }
 0xa3e   :  { %9113 = vmatpush1.bf16.msra.mxu0 %v13196_v42  ;;  %9195 = vmatpush1.bf16.msra.mxu1 %v13199_v43 }
 0xa3f   :  { %9114 = vmatprep.subr.bf16.mxu0 %v13204_v47  ;;  %9196 = vmatprep.subr.bf16.mxu1 %v13207_v48 }
 0xa42   :  { %9115 = vmatpush1.bf16.msra.mxu0 %v13202_v49  ;;  %9197 = vmatpush1.bf16.msra.mxu1 %v13205_v25 }
 0xa43   :  { %9116 = vmatprep.subr.bf16.mxu0 %v13210_v11  ;;  %9198 = vmatprep.subr.bf16.mxu1 %v13213_v53 }
 0xa46   :  { %9117 = vmatpush1.bf16.msra.mxu0 %v13208_v56  ;;  %9199 = vmatpush1.bf16.msra.mxu1 %v13211_v27  ;;  %v6322_v56 = vpop.permute.xlu0 %6321 }
 0xa47   :  { %11294 = vmatprep.subr.bf16.mxu0 %v13214_v58  ;;  %11316 = vmatprep.subr.bf16.mxu1 %v13215_v59  ;;  %v11217_v58 = vld [vmem:[%s17226_s17 + $0x1] ss:$0 sm:$0xff]  ;;  %vm6323_vm3 = vcmp.eq.s32.totalorder %v6322_v56, 1 }
 0xa49   :  { %9119 = vmatmul.mubr.bf16.vlgmr.msra.gmra.mrb[40].mxu0 %v8251_v35  ;;  %9201 = vmatmul.mubr.bf16.vlgmr.msra.gmra.mrb[40].mxu1 %v8251_v35 }
 0xa4a   :  { %11295 = vmatpush3.bf16.msra.mxu0 %v13216_v60  ;;  %11317 = vmatpush3.bf16.msra.mxu1 %v13217_v61 }
 0xa4b   :  { %11296 = vmatprep.subr.bf16.mxu0 %v13218_v62  ;;  %11318 = vmatprep.subr.bf16.mxu1 %v13219_v0 }
 0xa4e   :  { %11297 = vmatpush3.bf16.msra.mxu0 %v13220_v2  ;;  %11319 = vmatpush3.bf16.msra.mxu1 %v13221_v3 }
 0xa4f   :  { %11298 = vmatprep.subr.bf16.mxu0 %v13222_v40  ;;  %11320 = vmatprep.subr.bf16.mxu1 %v13223_v4 }
 0xa52   :  { %11299 = vmatpush3.bf16.msra.mxu0 %v13224_v6  ;;  %11321 = vmatpush3.bf16.msra.mxu1 %v13225_v7  ;;  %v6324_v7 = vsel %vm6323_vm3, %v16485_v44, 0.0 }
 0xa53   :  { %11300 = vmatprep.subr.bf16.mxu0 %v13226_v8  ;;  %11322 = vmatprep.subr.bf16.mxu1 %v13227_v28 }
 0xa56   :  { %11301 = vmatpush3.bf16.msra.mxu0 %v13228_v50  ;;  %11323 = vmatpush3.bf16.msra.mxu1 %v13229_v9 }
 0xa57   :  { %11302 = vmatprep.subr.bf16.mxu0 %v13230_v46  ;;  %11324 = vmatprep.subr.bf16.mxu1 %v13231_v10 }
 0xa5a   :  { %11303 = vmatpush3.bf16.msra.mxu0 %v13232_v54  ;;  %11325 = vmatpush3.bf16.msra.mxu1 %v13233_v16 }
 0xa5b   :  { %11304 = vmatprep.subr.bf16.mxu0 %v13234_v17  ;;  %11326 = vmatprep.subr.bf16.mxu1 %v13235_v55 }
 0xa5e   :  { %11305 = vmatpush3.bf16.msra.mxu0 %v13236_v51  ;;  %11327 = vmatpush3.bf16.msra.mxu1 %v13237_v18 }
 0xa5f   :  { %11306 = vmatprep.subr.bf16.mxu0 %v13238_v19  ;;  %11328 = vmatprep.subr.bf16.mxu1 %v13239_v20 }
 0xa62   :  { %11307 = vmatpush3.bf16.msra.mxu0 %v13240_v21  ;;  %11329 = vmatpush3.bf16.msra.mxu1 %v13241_v22 }
 0xa63   :  { %11308 = vmatprep.subr.bf16.mxu0 %v13242_v23  ;;  %11330 = vmatprep.subr.bf16.mxu1 %v13243_v26 }
 0xa66   :  { %11309 = vmatpush3.bf16.msra.mxu0 %v13244_v63  ;;  %11331 = vmatpush3.bf16.msra.mxu1 %v13245_v30 }
 0xab4   :  { %v9566_v4 = vpop.permute.xlu0 %9565 }
 0xab5   :  { %vm9567_vm4 = vcmp.eq.s32.totalorder %v9566_v4, 1 }
 0xb1c   :  { %v9120_v13 = vpop.f32.mrb[40].mxu0  ;;  %v9202_v37 = vpop.f32.mrb[40].mxu1 }
 0xb1d   :  { %v11370_v38 = vadd.f32 %v9120_v13, %v8388_v34  ;;  %v11372_v24 = vadd.f32 %v9202_v37, %v8396_v5  ;;  %v9122_v41 = vpop.f32.mrb[41].mxu0  ;;  %v9204_v42 = vpop.f32.mrb[41].mxu1 }
 0xb1e   :  { %v11371_v1 = vadd.f32 %v9122_v41, %v8392_v36  ;;  %v11373_v43 = vadd.f32 %v9204_v42, %v8400_v39  ;;  %v9124_v45 = vpop.f32.mrb[42].mxu0  ;;  %v9206_v47 = vpop.f32.mrb[42].mxu1 }
 0xb1f   :  { %v9209_v48 = vmax.f32 %v11370_v38, 0.0  ;;  %v9211_v49 = vmax.f32 %v11372_v24, 0.0  ;;  %v9125_v25 = vpop.f32.mrb[43].mxu0  ;;  %v9207_v12 = vpop.f32.mrb[43].mxu1 }
 0xb20   :  { %v9210_v52 = vmax.f32 %v11371_v1, 0.0  ;;  %v9212_v29 = vmax.f32 %v11373_v43, 0.0 }
 0xb21   :  { %v9213_v53 = vpack.c.bf16 %v9209_v48, %v9209_v48  ;;  %v9215_v15 = vpack.c.bf16 %v9211_v49, %v9211_v49 }
 0xb22   :  { %v9214_v11 = vpack.c.bf16 %v9210_v52, %v9210_v52  ;;  %v9216_v14 = vpack.c.bf16 %v9212_v29, %v9212_v29 }
 0xb24   :  { %9514 = vmatprep.mubr.bf16.mxu0 %v9214_v11  ;;  %9554 = vmatprep.mubr.bf16.mxu1 %v9216_v14 }
 0xb25   :  { %9515 = vmatmul.mubr.bf16.vlgmr.msra.gmra.mrb[44].mxu0 %v9213_v53  ;;  %9555 = vmatmul.mubr.bf16.vlgmr.msra.gmra.mrb[44].mxu1 %v9215_v15 }
 0xbf8   :  { %v11310_v27 = vpop.f32.mrb[44].mxu0  ;;  %v11332_v57 = vpop.f32.mrb[44].mxu1 }
 0xbf9   :  { %v11311_v59 = vpop.f32.mrb[45].mxu0  ;;  %v11333_v60 = vpop.f32.mrb[45].mxu1 }
 0xbfa   :  { %v11312_v61 = vadd.f32 %v11311_v59, %v11310_v27  ;;  %v11334_v35 = vadd.f32 %v11333_v60, %v11332_v57  ;;  %v11313_v62 = vpop.f32.mrb[46].mxu0  ;;  %v11335_v0 = vpop.f32.mrb[46].mxu1 }
 0xbfb   :  { %v11314_v2 = vpop.f32.mrb[47].mxu0  ;;  %v11336_v3 = vpop.f32.mrb[47].mxu1 }
 0xbfc   :  { %v9517_v40 = vadd.f32 %v11312_v61, %v11217_v58 }
 0xbfe   :  { %v9557_v6 = vadd.f32 %v11334_v35, %v9517_v40 }
 0xc00   :  { %v9568_v8 = vsel %vm9567_vm4, %v9557_v6, %v6324_v7 }
 0xc01   :  { %9569 = vst [vmem:[%s17227_s18] sm:$0xff] %v9568_v8 }

</bundles_post_ra>
